<compile_context>
chip_gen: v6e
topology: v6e:2x2x1
jax: 0.10.0
libtpu: 0.0.40
codegen_flags: <defaults>
</compile_context>

<pallas_src>
import functools

import jax
import jax.numpy as jnp
from jax import lax
from jax.experimental import pallas as pl
from jax.experimental.pallas import tpu as pltpu


def _resblock_kernel(x_ref, w1_ref, w2_ref, o_ref, pad_ref, *, res_scale):
    # x_ref   : (1, H, W, C)   input block (also serves as the shortcut/residual)
    # w1_ref  : (3, 3, C, C)   HWIO conv1 weights
    # w2_ref  : (3, 3, C, C)   HWIO conv2 weights
    # o_ref   : (1, H, W, C)   output block
    # pad_ref : (H+2, W+2, C)  VMEM scratch, reused as the zero-padded operand of
    #                          conv1 (holding x) and then conv2 (holding relu(y1))
    _, H, W, C = x_ref.shape
    Hp, Wp = H + 2, W + 2
    dt = pad_ref.dtype

    # ---- zero only the 1-pixel halo (interior is always fully overwritten).
    # Not gated on program_id: scratch is per-core and every step rewrites it.
    zrow = jnp.zeros((1, Wp, C), dt)
    zcol = jnp.zeros((Hp, 1, C), dt)
    pad_ref[0:1, :, :] = zrow
    pad_ref[Hp - 1:Hp, :, :] = zrow
    pad_ref[:, 0:1, :] = zcol
    pad_ref[:, Wp - 1:Wp, :] = zcol

    # ---- conv1 (3x3, same padding, no bias): 9 shifted ref-sliced matmuls ----
    pad_ref[1:H + 1, 1:W + 1, :] = x_ref[0]
    acc1 = jnp.zeros((H * W, C), jnp.float32)
    for di in range(3):
        for dj in range(3):
            patch = pad_ref[di:di + H, dj:dj + W, :].reshape(H * W, C)
            acc1 = acc1 + jnp.dot(patch, w1_ref[di, dj],
                                  preferred_element_type=jnp.float32)
    y1 = jnp.maximum(acc1, 0.0).reshape(H, W, C)          # act = ReLU

    # ---- conv2 (3x3, same padding, no bias): reuse the same padded scratch ----
    pad_ref[1:H + 1, 1:W + 1, :] = y1.astype(dt)
    acc2 = jnp.zeros((H * W, C), jnp.float32)
    for di in range(3):
        for dj in range(3):
            patch = pad_ref[di:di + H, dj:dj + W, :].reshape(H * W, C)
            acc2 = acc2 + jnp.dot(patch, w2_ref[di, dj],
                                  preferred_element_type=jnp.float32)
    body = acc2.reshape(H, W, C) * res_scale

    # ---- residual add (shortcut read straight from the input block) ----
    o_ref[0] = (body + x_ref[0].astype(jnp.float32)).astype(o_ref.dtype)


def setq_resblock(x_nchw, w1_hwio, w2_hwio, res_scale=1.0):
    """Forward of SetQ_ResBlock.  x_nchw: (N, C, H, W) -> (N, C, H, W)."""
    x = jnp.transpose(x_nchw, (0, 2, 3, 1))               # NHWC, channels on lanes
    N, H, W, C = x.shape

    kernel = functools.partial(_resblock_kernel, res_scale=res_scale)
    out_nhwc = pl.pallas_call(
        kernel,
        out_shape=jax.ShapeDtypeStruct((N, H, W, C), x.dtype),
        grid_spec=pltpu.PrefetchScalarGridSpec(
            num_scalar_prefetch=0,
            grid=(N,),
            in_specs=[
                pl.BlockSpec((1, H, W, C), lambda b: (b, 0, 0, 0)),
                pl.BlockSpec((3, 3, C, C), lambda b: (0, 0, 0, 0)),
                pl.BlockSpec((3, 3, C, C), lambda b: (0, 0, 0, 0)),
            ],
            out_specs=pl.BlockSpec((1, H, W, C), lambda b: (b, 0, 0, 0)),
            scratch_shapes=[pltpu.VMEM((H + 2, W + 2, C), x.dtype)],
        ),
        compiler_params=pltpu.CompilerParams(
            dimension_semantics=("parallel",),
            vmem_limit_bytes=48 * 1024 * 1024,
        ),
    )(x, w1_hwio, w2_hwio)
    return jnp.transpose(out_nhwc, (0, 3, 1, 2))           # back to NCHW


def _reference(x_nchw, w1_hwio, w2_hwio, res_scale=1.0):
    """Pure-JAX reference with the same semantics (correctness check)."""
    x = jnp.transpose(x_nchw, (0, 2, 3, 1))
    dn = lax.conv_dimension_numbers(x.shape, w1_hwio.shape, ("NHWC", "HWIO", "NHWC"))
    y = lax.conv_general_dilated(x, w1_hwio, (1, 1), "SAME", dimension_numbers=dn)
    y = jnp.maximum(y, 0.0)
    y = lax.conv_general_dilated(y, w2_hwio, (1, 1), "SAME", dimension_numbers=dn)
    out = y * res_scale + x
    return jnp.transpose(out, (0, 3, 1, 2))


if __name__ == "__main__":
    # Module config: n_feats=4, kernel_size=3, bias=False, res_scale=1, ReLU act.
    N, C, H, W = 2, 4, 16, 16
    KH = KW = 3
    res_scale = 1.0

    key = jax.random.PRNGKey(0)
    kx, kw1, kw2 = jax.random.split(key, 3)
    x = jax.random.normal(kx, (N, C, H, W), dtype=jnp.float32)
    # Deterministic weight init (HWIO), no bias (bias=False in the module).
    w1 = 0.1 * jax.random.normal(kw1, (KH, KW, C, C), dtype=jnp.float32)
    w2 = 0.1 * jax.random.normal(kw2, (KH, KW, C, C), dtype=jnp.float32)

    out = setq_resblock(x, w1, w2, res_scale=res_scale)
    out = jax.block_until_ready(out)

    ref = _reference(x, w1, w2, res_scale=res_scale)
    assert out.shape == (N, C, H, W), out.shape
    assert jnp.allclose(out, ref, rtol=1e-5, atol=1e-5), "mismatch vs. JAX reference"

    print("KERNEL_OK")
</pallas_src>

<mosaic_0001>
module attributes {stable_mosaic.version = 11 : i64} {
  func.func @_resblock_kernel(%arg0: i32, %arg1: memref<1x16x16x4xf32, #tpu.memory_space<vmem>>, %arg2: memref<3x3x4x4xf32, #tpu.memory_space<vmem>>, %arg3: memref<3x3x4x4xf32, #tpu.memory_space<vmem>>, %arg4: memref<1x16x16x4xf32, #tpu.memory_space<vmem>>, %arg5: memref<18x18x4xf32, #tpu.memory_space<vmem>>) attributes {dimension_semantics = [#tpu.dimension_semantics<parallel>], iteration_bounds = array<i64: 2>, scalar_prefetch = 0 : i64, scratch_operands = 1 : i64, tpu.core_type = #tpu.core_type<tc>, window_params = [{transform_indices = @transform_0, window_bounds = array<i64: 1, 16, 16, 4>}, {pipeline_mode = #tpu.pipeline_mode<synchronous>, transform_indices = @transform_1, window_bounds = array<i64: 3, 3, 4, 4>}, {pipeline_mode = #tpu.pipeline_mode<synchronous>, transform_indices = @transform_2, window_bounds = array<i64: 3, 3, 4, 4>}, {transform_indices = @transform_3, window_bounds = array<i64: 1, 16, 16, 4>}]} {
    %cst = arith.constant 0.000000e+00 : f32
    %0 = vector.broadcast %cst : f32 to vector<1x18x4xf32>
    %cst_0 = arith.constant 0.000000e+00 : f32
    %1 = vector.broadcast %cst_0 : f32 to vector<18x1x4xf32>
    %c0 = arith.constant 0 : index
    %c0_1 = arith.constant 0 : index
    %c0_2 = arith.constant 0 : index
    %2 = vector.load %arg5[%c0, %c0_1, %c0_2] : memref<18x18x4xf32, #tpu.memory_space<vmem>>, vector<1x18x4xf32>
    tpu.vector_store %arg5[%c0, %c0_1, %c0_2], %0 {strides = array<i32>} : memref<18x18x4xf32, #tpu.memory_space<vmem>>, vector<1x18x4xf32>,
    %c17 = arith.constant 17 : index
    %c0_3 = arith.constant 0 : index
    %c0_4 = arith.constant 0 : index
    %3 = vector.load %arg5[%c17, %c0_3, %c0_4] : memref<18x18x4xf32, #tpu.memory_space<vmem>>, vector<1x18x4xf32>
    tpu.vector_store %arg5[%c17, %c0_3, %c0_4], %0 {strides = array<i32>} : memref<18x18x4xf32, #tpu.memory_space<vmem>>, vector<1x18x4xf32>,
    %c0_5 = arith.constant 0 : index
    %c0_6 = arith.constant 0 : index
    %c0_7 = arith.constant 0 : index
    %4 = vector.load %arg5[%c0_5, %c0_6, %c0_7] : memref<18x18x4xf32, #tpu.memory_space<vmem>>, vector<18x1x4xf32>
    tpu.vector_store %arg5[%c0_5, %c0_6, %c0_7], %1 {strides = array<i32>} : memref<18x18x4xf32, #tpu.memory_space<vmem>>, vector<18x1x4xf32>,
    %c0_8 = arith.constant 0 : index
    %c17_9 = arith.constant 17 : index
    %c0_10 = arith.constant 0 : index
    %5 = vector.load %arg5[%c0_8, %c17_9, %c0_10] : memref<18x18x4xf32, #tpu.memory_space<vmem>>, vector<18x1x4xf32>
    tpu.vector_store %arg5[%c0_8, %c17_9, %c0_10], %1 {strides = array<i32>} : memref<18x18x4xf32, #tpu.memory_space<vmem>>, vector<18x1x4xf32>,
    %c0_11 = arith.constant 0 : index
    %c0_12 = arith.constant 0 : index
    %c0_13 = arith.constant 0 : index
    %c0_14 = arith.constant 0 : index
    %6 = vector.load %arg1[%c0_11, %c0_12, %c0_13, %c0_14] : memref<1x16x16x4xf32, #tpu.memory_space<vmem>>, vector<1x16x16x4xf32>
    %7 = vector.shape_cast %6 : vector<1x16x16x4xf32> to vector<16x16x4xf32>
    %c1 = arith.constant 1 : index
    %c1_15 = arith.constant 1 : index
    %c0_16 = arith.constant 0 : index
    %8 = vector.load %arg5[%c1, %c1_15, %c0_16] : memref<18x18x4xf32, #tpu.memory_space<vmem>>, vector<16x16x4xf32>
    tpu.vector_store %arg5[%c1, %c1_15, %c0_16], %7 {strides = array<i32>} : memref<18x18x4xf32, #tpu.memory_space<vmem>>, vector<16x16x4xf32>,
    %cst_17 = arith.constant 0.000000e+00 : f32
    %9 = vector.broadcast %cst_17 : f32 to vector<256x4xf32>
    %c0_18 = arith.constant 0 : index
    %c0_19 = arith.constant 0 : index
    %c0_20 = arith.constant 0 : index
    %10 = vector.load %arg5[%c0_18, %c0_19, %c0_20] : memref<18x18x4xf32, #tpu.memory_space<vmem>>, vector<16x16x4xf32>
    %11 = vector.shape_cast %10 : vector<16x16x4xf32> to vector<256x4xf32>
    %c0_21 = arith.constant 0 : index
    %c0_22 = arith.constant 0 : index
    %c0_23 = arith.constant 0 : index
    %c0_24 = arith.constant 0 : index
    %12 = vector.load %arg2[%c0_21, %c0_22, %c0_23, %c0_24] : memref<3x3x4x4xf32, #tpu.memory_space<vmem>>, vector<1x1x4x4xf32>
    %13 = vector.shape_cast %12 : vector<1x1x4x4xf32> to vector<4x4xf32>
    %cst_25 = arith.constant dense<0.000000e+00> : vector<256x4xf32>
    %14 = tpu.matmul %11, %13, %cst_25 {dimension_numbers = #tpu.dot_dimension_numbers<[1], [0], [0], [1], [0, 0, 1, 1], [], []>} : vector<256x4xf32>, vector<4x4xf32>, vector<256x4xf32> -> vector<256x4xf32>
    %15 = arith.addf %9, %14 : vector<256x4xf32>
    %c0_26 = arith.constant 0 : index
    %c1_27 = arith.constant 1 : index
    %c0_28 = arith.constant 0 : index
    %16 = vector.load %arg5[%c0_26, %c1_27, %c0_28] : memref<18x18x4xf32, #tpu.memory_space<vmem>>, vector<16x16x4xf32>
    %17 = vector.shape_cast %16 : vector<16x16x4xf32> to vector<256x4xf32>
    %c0_29 = arith.constant 0 : index
    %c1_30 = arith.constant 1 : index
    %c0_31 = arith.constant 0 : index
    %c0_32 = arith.constant 0 : index
    %18 = vector.load %arg2[%c0_29, %c1_30, %c0_31, %c0_32] : memref<3x3x4x4xf32, #tpu.memory_space<vmem>>, vector<1x1x4x4xf32>
    %19 = vector.shape_cast %18 : vector<1x1x4x4xf32> to vector<4x4xf32>
    %cst_33 = arith.constant dense<0.000000e+00> : vector<256x4xf32>
    %20 = tpu.matmul %17, %19, %cst_33 {dimension_numbers = #tpu.dot_dimension_numbers<[1], [0], [0], [1], [0, 0, 1, 1], [], []>} : vector<256x4xf32>, vector<4x4xf32>, vector<256x4xf32> -> vector<256x4xf32>
    %21 = arith.addf %15, %20 : vector<256x4xf32>
    %c0_34 = arith.constant 0 : index
    %c2 = arith.constant 2 : index
    %c0_35 = arith.constant 0 : index
    %22 = vector.load %arg5[%c0_34, %c2, %c0_35] : memref<18x18x4xf32, #tpu.memory_space<vmem>>, vector<16x16x4xf32>
    %23 = vector.shape_cast %22 : vector<16x16x4xf32> to vector<256x4xf32>
    %c0_36 = arith.constant 0 : index
    %c2_37 = arith.constant 2 : index
    %c0_38 = arith.constant 0 : index
    %c0_39 = arith.constant 0 : index
    %24 = vector.load %arg2[%c0_36, %c2_37, %c0_38, %c0_39] : memref<3x3x4x4xf32, #tpu.memory_space<vmem>>, vector<1x1x4x4xf32>
    %25 = vector.shape_cast %24 : vector<1x1x4x4xf32> to vector<4x4xf32>
    %cst_40 = arith.constant dense<0.000000e+00> : vector<256x4xf32>
    %26 = tpu.matmul %23, %25, %cst_40 {dimension_numbers = #tpu.dot_dimension_numbers<[1], [0], [0], [1], [0, 0, 1, 1], [], []>} : vector<256x4xf32>, vector<4x4xf32>, vector<256x4xf32> -> vector<256x4xf32>
    %27 = arith.addf %21, %26 : vector<256x4xf32>
    %c1_41 = arith.constant 1 : index
    %c0_42 = arith.constant 0 : index
    %c0_43 = arith.constant 0 : index
    %28 = vector.load %arg5[%c1_41, %c0_42, %c0_43] : memref<18x18x4xf32, #tpu.memory_space<vmem>>, vector<16x16x4xf32>
    %29 = vector.shape_cast %28 : vector<16x16x4xf32> to vector<256x4xf32>
    %c1_44 = arith.constant 1 : index
    %c0_45 = arith.constant 0 : index
    %c0_46 = arith.constant 0 : index
    %c0_47 = arith.constant 0 : index
    %30 = vector.load %arg2[%c1_44, %c0_45, %c0_46, %c0_47] : memref<3x3x4x4xf32, #tpu.memory_space<vmem>>, vector<1x1x4x4xf32>
    %31 = vector.shape_cast %30 : vector<1x1x4x4xf32> to vector<4x4xf32>
    %cst_48 = arith.constant dense<0.000000e+00> : vector<256x4xf32>
    %32 = tpu.matmul %29, %31, %cst_48 {dimension_numbers = #tpu.dot_dimension_numbers<[1], [0], [0], [1], [0, 0, 1, 1], [], []>} : vector<256x4xf32>, vector<4x4xf32>, vector<256x4xf32> -> vector<256x4xf32>
    %33 = arith.addf %27, %32 : vector<256x4xf32>
    %c1_49 = arith.constant 1 : index
    %c1_50 = arith.constant 1 : index
    %c0_51 = arith.constant 0 : index
    %34 = vector.load %arg5[%c1_49, %c1_50, %c0_51] : memref<18x18x4xf32, #tpu.memory_space<vmem>>, vector<16x16x4xf32>
    %35 = vector.shape_cast %34 : vector<16x16x4xf32> to vector<256x4xf32>
    %c1_52 = arith.constant 1 : index
    %c1_53 = arith.constant 1 : index
    %c0_54 = arith.constant 0 : index
    %c0_55 = arith.constant 0 : index
    %36 = vector.load %arg2[%c1_52, %c1_53, %c0_54, %c0_55] : memref<3x3x4x4xf32, #tpu.memory_space<vmem>>, vector<1x1x4x4xf32>
    %37 = vector.shape_cast %36 : vector<1x1x4x4xf32> to vector<4x4xf32>
    %cst_56 = arith.constant dense<0.000000e+00> : vector<256x4xf32>
    %38 = tpu.matmul %35, %37, %cst_56 {dimension_numbers = #tpu.dot_dimension_numbers<[1], [0], [0], [1], [0, 0, 1, 1], [], []>} : vector<256x4xf32>, vector<4x4xf32>, vector<256x4xf32> -> vector<256x4xf32>
    %39 = arith.addf %33, %38 : vector<256x4xf32>
    %c1_57 = arith.constant 1 : index
    %c2_58 = arith.constant 2 : index
    %c0_59 = arith.constant 0 : index
    %40 = vector.load %arg5[%c1_57, %c2_58, %c0_59] : memref<18x18x4xf32, #tpu.memory_space<vmem>>, vector<16x16x4xf32>
    %41 = vector.shape_cast %40 : vector<16x16x4xf32> to vector<256x4xf32>
    %c1_60 = arith.constant 1 : index
    %c2_61 = arith.constant 2 : index
    %c0_62 = arith.constant 0 : index
    %c0_63 = arith.constant 0 : index
    %42 = vector.load %arg2[%c1_60, %c2_61, %c0_62, %c0_63] : memref<3x3x4x4xf32, #tpu.memory_space<vmem>>, vector<1x1x4x4xf32>
    %43 = vector.shape_cast %42 : vector<1x1x4x4xf32> to vector<4x4xf32>
    %cst_64 = arith.constant dense<0.000000e+00> : vector<256x4xf32>
    %44 = tpu.matmul %41, %43, %cst_64 {dimension_numbers = #tpu.dot_dimension_numbers<[1], [0], [0], [1], [0, 0, 1, 1], [], []>} : vector<256x4xf32>, vector<4x4xf32>, vector<256x4xf32> -> vector<256x4xf32>
    %45 = arith.addf %39, %44 : vector<256x4xf32>
    %c2_65 = arith.constant 2 : index
    %c0_66 = arith.constant 0 : index
    %c0_67 = arith.constant 0 : index
    %46 = vector.load %arg5[%c2_65, %c0_66, %c0_67] : memref<18x18x4xf32, #tpu.memory_space<vmem>>, vector<16x16x4xf32>
    %47 = vector.shape_cast %46 : vector<16x16x4xf32> to vector<256x4xf32>
    %c2_68 = arith.constant 2 : index
    %c0_69 = arith.constant 0 : index
    %c0_70 = arith.constant 0 : index
    %c0_71 = arith.constant 0 : index
    %48 = vector.load %arg2[%c2_68, %c0_69, %c0_70, %c0_71] : memref<3x3x4x4xf32, #tpu.memory_space<vmem>>, vector<1x1x4x4xf32>
    %49 = vector.shape_cast %48 : vector<1x1x4x4xf32> to vector<4x4xf32>
    %cst_72 = arith.constant dense<0.000000e+00> : vector<256x4xf32>
    %50 = tpu.matmul %47, %49, %cst_72 {dimension_numbers = #tpu.dot_dimension_numbers<[1], [0], [0], [1], [0, 0, 1, 1], [], []>} : vector<256x4xf32>, vector<4x4xf32>, vector<256x4xf32> -> vector<256x4xf32>
    %51 = arith.addf %45, %50 : vector<256x4xf32>
    %c2_73 = arith.constant 2 : index
    %c1_74 = arith.constant 1 : index
    %c0_75 = arith.constant 0 : index
    %52 = vector.load %arg5[%c2_73, %c1_74, %c0_75] : memref<18x18x4xf32, #tpu.memory_space<vmem>>, vector<16x16x4xf32>
    %53 = vector.shape_cast %52 : vector<16x16x4xf32> to vector<256x4xf32>
    %c2_76 = arith.constant 2 : index
    %c1_77 = arith.constant 1 : index
    %c0_78 = arith.constant 0 : index
    %c0_79 = arith.constant 0 : index
    %54 = vector.load %arg2[%c2_76, %c1_77, %c0_78, %c0_79] : memref<3x3x4x4xf32, #tpu.memory_space<vmem>>, vector<1x1x4x4xf32>
    %55 = vector.shape_cast %54 : vector<1x1x4x4xf32> to vector<4x4xf32>
    %cst_80 = arith.constant dense<0.000000e+00> : vector<256x4xf32>
    %56 = tpu.matmul %53, %55, %cst_80 {dimension_numbers = #tpu.dot_dimension_numbers<[1], [0], [0], [1], [0, 0, 1, 1], [], []>} : vector<256x4xf32>, vector<4x4xf32>, vector<256x4xf32> -> vector<256x4xf32>
    %57 = arith.addf %51, %56 : vector<256x4xf32>
    %c2_81 = arith.constant 2 : index
    %c2_82 = arith.constant 2 : index
    %c0_83 = arith.constant 0 : index
    %58 = vector.load %arg5[%c2_81, %c2_82, %c0_83] : memref<18x18x4xf32, #tpu.memory_space<vmem>>, vector<16x16x4xf32>
    %59 = vector.shape_cast %58 : vector<16x16x4xf32> to vector<256x4xf32>
    %c2_84 = arith.constant 2 : index
    %c2_85 = arith.constant 2 : index
    %c0_86 = arith.constant 0 : index
    %c0_87 = arith.constant 0 : index
    %60 = vector.load %arg2[%c2_84, %c2_85, %c0_86, %c0_87] : memref<3x3x4x4xf32, #tpu.memory_space<vmem>>, vector<1x1x4x4xf32>
    %61 = vector.shape_cast %60 : vector<1x1x4x4xf32> to vector<4x4xf32>
    %cst_88 = arith.constant dense<0.000000e+00> : vector<256x4xf32>
    %62 = tpu.matmul %59, %61, %cst_88 {dimension_numbers = #tpu.dot_dimension_numbers<[1], [0], [0], [1], [0, 0, 1, 1], [], []>} : vector<256x4xf32>, vector<4x4xf32>, vector<256x4xf32> -> vector<256x4xf32>
    %63 = arith.addf %57, %62 : vector<256x4xf32>
    %cst_89 = arith.constant 0.000000e+00 : f32
    %64 = vector.broadcast %cst_89 : f32 to vector<256x4xf32>
    %65 = arith.maximumf %63, %64 : vector<256x4xf32>
    %66 = vector.shape_cast %65 : vector<256x4xf32> to vector<16x16x4xf32>
    %c1_90 = arith.constant 1 : index
    %c1_91 = arith.constant 1 : index
    %c0_92 = arith.constant 0 : index
    %67 = vector.load %arg5[%c1_90, %c1_91, %c0_92] : memref<18x18x4xf32, #tpu.memory_space<vmem>>, vector<16x16x4xf32>
    tpu.vector_store %arg5[%c1_90, %c1_91, %c0_92], %66 {strides = array<i32>} : memref<18x18x4xf32, #tpu.memory_space<vmem>>, vector<16x16x4xf32>,
    %cst_93 = arith.constant 0.000000e+00 : f32
    %68 = vector.broadcast %cst_93 : f32 to vector<256x4xf32>
    %c0_94 = arith.constant 0 : index
    %c0_95 = arith.constant 0 : index
    %c0_96 = arith.constant 0 : index
    %69 = vector.load %arg5[%c0_94, %c0_95, %c0_96] : memref<18x18x4xf32, #tpu.memory_space<vmem>>, vector<16x16x4xf32>
    %70 = vector.shape_cast %69 : vector<16x16x4xf32> to vector<256x4xf32>
    %c0_97 = arith.constant 0 : index
    %c0_98 = arith.constant 0 : index
    %c0_99 = arith.constant 0 : index
    %c0_100 = arith.constant 0 : index
    %71 = vector.load %arg3[%c0_97, %c0_98, %c0_99, %c0_100] : memref<3x3x4x4xf32, #tpu.memory_space<vmem>>, vector<1x1x4x4xf32>
    %72 = vector.shape_cast %71 : vector<1x1x4x4xf32> to vector<4x4xf32>
    %cst_101 = arith.constant dense<0.000000e+00> : vector<256x4xf32>
    %73 = tpu.matmul %70, %72, %cst_101 {dimension_numbers = #tpu.dot_dimension_numbers<[1], [0], [0], [1], [0, 0, 1, 1], [], []>} : vector<256x4xf32>, vector<4x4xf32>, vector<256x4xf32> -> vector<256x4xf32>
    %74 = arith.addf %68, %73 : vector<256x4xf32>
    %c0_102 = arith.constant 0 : index
    %c1_103 = arith.constant 1 : index
    %c0_104 = arith.constant 0 : index
    %75 = vector.load %arg5[%c0_102, %c1_103, %c0_104] : memref<18x18x4xf32, #tpu.memory_space<vmem>>, vector<16x16x4xf32>
    %76 = vector.shape_cast %75 : vector<16x16x4xf32> to vector<256x4xf32>
    %c0_105 = arith.constant 0 : index
    %c1_106 = arith.constant 1 : index
    %c0_107 = arith.constant 0 : index
    %c0_108 = arith.constant 0 : index
    %77 = vector.load %arg3[%c0_105, %c1_106, %c0_107, %c0_108] : memref<3x3x4x4xf32, #tpu.memory_space<vmem>>, vector<1x1x4x4xf32>
    %78 = vector.shape_cast %77 : vector<1x1x4x4xf32> to vector<4x4xf32>
    %cst_109 = arith.constant dense<0.000000e+00> : vector<256x4xf32>
    %79 = tpu.matmul %76, %78, %cst_109 {dimension_numbers = #tpu.dot_dimension_numbers<[1], [0], [0], [1], [0, 0, 1, 1], [], []>} : vector<256x4xf32>, vector<4x4xf32>, vector<256x4xf32> -> vector<256x4xf32>
    %80 = arith.addf %74, %79 : vector<256x4xf32>
    %c0_110 = arith.constant 0 : index
    %c2_111 = arith.constant 2 : index
    %c0_112 = arith.constant 0 : index
    %81 = vector.load %arg5[%c0_110, %c2_111, %c0_112] : memref<18x18x4xf32, #tpu.memory_space<vmem>>, vector<16x16x4xf32>
    %82 = vector.shape_cast %81 : vector<16x16x4xf32> to vector<256x4xf32>
    %c0_113 = arith.constant 0 : index
    %c2_114 = arith.constant 2 : index
    %c0_115 = arith.constant 0 : index
    %c0_116 = arith.constant 0 : index
    %83 = vector.load %arg3[%c0_113, %c2_114, %c0_115, %c0_116] : memref<3x3x4x4xf32, #tpu.memory_space<vmem>>, vector<1x1x4x4xf32>
    %84 = vector.shape_cast %83 : vector<1x1x4x4xf32> to vector<4x4xf32>
    %cst_117 = arith.constant dense<0.000000e+00> : vector<256x4xf32>
    %85 = tpu.matmul %82, %84, %cst_117 {dimension_numbers = #tpu.dot_dimension_numbers<[1], [0], [0], [1], [0, 0, 1, 1], [], []>} : vector<256x4xf32>, vector<4x4xf32>, vector<256x4xf32> -> vector<256x4xf32>
    %86 = arith.addf %80, %85 : vector<256x4xf32>
    %c1_118 = arith.constant 1 : index
    %c0_119 = arith.constant 0 : index
    %c0_120 = arith.constant 0 : index
    %87 = vector.load %arg5[%c1_118, %c0_119, %c0_120] : memref<18x18x4xf32, #tpu.memory_space<vmem>>, vector<16x16x4xf32>
    %88 = vector.shape_cast %87 : vector<16x16x4xf32> to vector<256x4xf32>
    %c1_121 = arith.constant 1 : index
    %c0_122 = arith.constant 0 : index
    %c0_123 = arith.constant 0 : index
    %c0_124 = arith.constant 0 : index
    %89 = vector.load %arg3[%c1_121, %c0_122, %c0_123, %c0_124] : memref<3x3x4x4xf32, #tpu.memory_space<vmem>>, vector<1x1x4x4xf32>
    %90 = vector.shape_cast %89 : vector<1x1x4x4xf32> to vector<4x4xf32>
    %cst_125 = arith.constant dense<0.000000e+00> : vector<256x4xf32>
    %91 = tpu.matmul %88, %90, %cst_125 {dimension_numbers = #tpu.dot_dimension_numbers<[1], [0], [0], [1], [0, 0, 1, 1], [], []>} : vector<256x4xf32>, vector<4x4xf32>, vector<256x4xf32> -> vector<256x4xf32>
    %92 = arith.addf %86, %91 : vector<256x4xf32>
    %c1_126 = arith.constant 1 : index
    %c1_127 = arith.constant 1 : index
    %c0_128 = arith.constant 0 : index
    %93 = vector.load %arg5[%c1_126, %c1_127, %c0_128] : memref<18x18x4xf32, #tpu.memory_space<vmem>>, vector<16x16x4xf32>
    %94 = vector.shape_cast %93 : vector<16x16x4xf32> to vector<256x4xf32>
    %c1_129 = arith.constant 1 : index
    %c1_130 = arith.constant 1 : index
    %c0_131 = arith.constant 0 : index
    %c0_132 = arith.constant 0 : index
    %95 = vector.load %arg3[%c1_129, %c1_130, %c0_131, %c0_132] : memref<3x3x4x4xf32, #tpu.memory_space<vmem>>, vector<1x1x4x4xf32>
    %96 = vector.shape_cast %95 : vector<1x1x4x4xf32> to vector<4x4xf32>
    %cst_133 = arith.constant dense<0.000000e+00> : vector<256x4xf32>
    %97 = tpu.matmul %94, %96, %cst_133 {dimension_numbers = #tpu.dot_dimension_numbers<[1], [0], [0], [1], [0, 0, 1, 1], [], []>} : vector<256x4xf32>, vector<4x4xf32>, vector<256x4xf32> -> vector<256x4xf32>
    %98 = arith.addf %92, %97 : vector<256x4xf32>
    %c1_134 = arith.constant 1 : index
    %c2_135 = arith.constant 2 : index
    %c0_136 = arith.constant 0 : index
    %99 = vector.load %arg5[%c1_134, %c2_135, %c0_136] : memref<18x18x4xf32, #tpu.memory_space<vmem>>, vector<16x16x4xf32>
    %100 = vector.shape_cast %99 : vector<16x16x4xf32> to vector<256x4xf32>
    %c1_137 = arith.constant 1 : index
    %c2_138 = arith.constant 2 : index
    %c0_139 = arith.constant 0 : index
    %c0_140 = arith.constant 0 : index
    %101 = vector.load %arg3[%c1_137, %c2_138, %c0_139, %c0_140] : memref<3x3x4x4xf32, #tpu.memory_space<vmem>>, vector<1x1x4x4xf32>
    %102 = vector.shape_cast %101 : vector<1x1x4x4xf32> to vector<4x4xf32>
    %cst_141 = arith.constant dense<0.000000e+00> : vector<256x4xf32>
    %103 = tpu.matmul %100, %102, %cst_141 {dimension_numbers = #tpu.dot_dimension_numbers<[1], [0], [0], [1], [0, 0, 1, 1], [], []>} : vector<256x4xf32>, vector<4x4xf32>, vector<256x4xf32> -> vector<256x4xf32>
    %104 = arith.addf %98, %103 : vector<256x4xf32>
    %c2_142 = arith.constant 2 : index
    %c0_143 = arith.constant 0 : index
    %c0_144 = arith.constant 0 : index
    %105 = vector.load %arg5[%c2_142, %c0_143, %c0_144] : memref<18x18x4xf32, #tpu.memory_space<vmem>>, vector<16x16x4xf32>
    %106 = vector.shape_cast %105 : vector<16x16x4xf32> to vector<256x4xf32>
    %c2_145 = arith.constant 2 : index
    %c0_146 = arith.constant 0 : index
    %c0_147 = arith.constant 0 : index
    %c0_148 = arith.constant 0 : index
    %107 = vector.load %arg3[%c2_145, %c0_146, %c0_147, %c0_148] : memref<3x3x4x4xf32, #tpu.memory_space<vmem>>, vector<1x1x4x4xf32>
    %108 = vector.shape_cast %107 : vector<1x1x4x4xf32> to vector<4x4xf32>
    %cst_149 = arith.constant dense<0.000000e+00> : vector<256x4xf32>
    %109 = tpu.matmul %106, %108, %cst_149 {dimension_numbers = #tpu.dot_dimension_numbers<[1], [0], [0], [1], [0, 0, 1, 1], [], []>} : vector<256x4xf32>, vector<4x4xf32>, vector<256x4xf32> -> vector<256x4xf32>
    %110 = arith.addf %104, %109 : vector<256x4xf32>
    %c2_150 = arith.constant 2 : index
    %c1_151 = arith.constant 1 : index
    %c0_152 = arith.constant 0 : index
    %111 = vector.load %arg5[%c2_150, %c1_151, %c0_152] : memref<18x18x4xf32, #tpu.memory_space<vmem>>, vector<16x16x4xf32>
    %112 = vector.shape_cast %111 : vector<16x16x4xf32> to vector<256x4xf32>
    %c2_153 = arith.constant 2 : index
    %c1_154 = arith.constant 1 : index
    %c0_155 = arith.constant 0 : index
    %c0_156 = arith.constant 0 : index
    %113 = vector.load %arg3[%c2_153, %c1_154, %c0_155, %c0_156] : memref<3x3x4x4xf32, #tpu.memory_space<vmem>>, vector<1x1x4x4xf32>
    %114 = vector.shape_cast %113 : vector<1x1x4x4xf32> to vector<4x4xf32>
    %cst_157 = arith.constant dense<0.000000e+00> : vector<256x4xf32>
    %115 = tpu.matmul %112, %114, %cst_157 {dimension_numbers = #tpu.dot_dimension_numbers<[1], [0], [0], [1], [0, 0, 1, 1], [], []>} : vector<256x4xf32>, vector<4x4xf32>, vector<256x4xf32> -> vector<256x4xf32>
    %116 = arith.addf %110, %115 : vector<256x4xf32>
    %c2_158 = arith.constant 2 : index
    %c2_159 = arith.constant 2 : index
    %c0_160 = arith.constant 0 : index
    %117 = vector.load %arg5[%c2_158, %c2_159, %c0_160] : memref<18x18x4xf32, #tpu.memory_space<vmem>>, vector<16x16x4xf32>
    %118 = vector.shape_cast %117 : vector<16x16x4xf32> to vector<256x4xf32>
    %c2_161 = arith.constant 2 : index
    %c2_162 = arith.constant 2 : index
    %c0_163 = arith.constant 0 : index
    %c0_164 = arith.constant 0 : index
    %119 = vector.load %arg3[%c2_161, %c2_162, %c0_163, %c0_164] : memref<3x3x4x4xf32, #tpu.memory_space<vmem>>, vector<1x1x4x4xf32>
    %120 = vector.shape_cast %119 : vector<1x1x4x4xf32> to vector<4x4xf32>
    %cst_165 = arith.constant dense<0.000000e+00> : vector<256x4xf32>
    %121 = tpu.matmul %118, %120, %cst_165 {dimension_numbers = #tpu.dot_dimension_numbers<[1], [0], [0], [1], [0, 0, 1, 1], [], []>} : vector<256x4xf32>, vector<4x4xf32>, vector<256x4xf32> -> vector<256x4xf32>
    %122 = arith.addf %116, %121 : vector<256x4xf32>
    %123 = vector.shape_cast %122 : vector<256x4xf32> to vector<16x16x4xf32>
    %cst_166 = arith.constant 1.000000e+00 : f32
    %124 = vector.broadcast %cst_166 : f32 to vector<16x16x4xf32>
    %125 = arith.mulf %123, %124 : vector<16x16x4xf32>
    %c0_167 = arith.constant 0 : index
    %c0_168 = arith.constant 0 : index
    %c0_169 = arith.constant 0 : index
    %c0_170 = arith.constant 0 : index
    %126 = vector.load %arg1[%c0_167, %c0_168, %c0_169, %c0_170] : memref<1x16x16x4xf32, #tpu.memory_space<vmem>>, vector<1x16x16x4xf32>
    %127 = vector.shape_cast %126 : vector<1x16x16x4xf32> to vector<16x16x4xf32>
    %128 = arith.addf %125, %127 : vector<16x16x4xf32>
    %c0_171 = arith.constant 0 : index
    %c0_172 = arith.constant 0 : index
    %c0_173 = arith.constant 0 : index
    %c0_174 = arith.constant 0 : index
    %129 = vector.load %arg4[%c0_171, %c0_172, %c0_173, %c0_174] : memref<1x16x16x4xf32, #tpu.memory_space<vmem>>, vector<1x16x16x4xf32>
    %130 = vector.shape_cast %129 : vector<1x16x16x4xf32> to vector<16x16x4xf32>
    %131 = vector.shape_cast %128 : vector<16x16x4xf32> to vector<1x16x16x4xf32>
    tpu.vector_store %arg4[%c0_171, %c0_172, %c0_173, %c0_174], %131 {strides = array<i32>} : memref<1x16x16x4xf32, #tpu.memory_space<vmem>>, vector<1x16x16x4xf32>,
    return
  }
  func.func @transform_0(%arg0: i32) -> (i32, i32, i32, i32) {
    %c0_i32 = arith.constant 0 : i32
    %c0_i32_0 = arith.constant 0 : i32
    %c0_i32_1 = arith.constant 0 : i32
    %c0_i32_2 = arith.constant 0 : i32
    return %arg0, %c0_i32, %c0_i32_0, %c0_i32_1 : i32, i32, i32, i32
  }
  func.func @transform_1(%arg0: i32) -> (i32, i32, i32, i32) {
    %c0_i32 = arith.constant 0 : i32
    %c0_i32_0 = arith.constant 0 : i32
    %c0_i32_1 = arith.constant 0 : i32
    %c0_i32_2 = arith.constant 0 : i32
    %c0_i32_3 = arith.constant 0 : i32
    return %c0_i32, %c0_i32_0, %c0_i32_1, %c0_i32_2 : i32, i32, i32, i32
  }
  func.func @transform_2(%arg0: i32) -> (i32, i32, i32, i32) {
    %c0_i32 = arith.constant 0 : i32
    %c0_i32_0 = arith.constant 0 : i32
    %c0_i32_1 = arith.constant 0 : i32
    %c0_i32_2 = arith.constant 0 : i32
    %c0_i32_3 = arith.constant 0 : i32
    return %c0_i32, %c0_i32_0, %c0_i32_1, %c0_i32_2 : i32, i32, i32, i32
  }
  func.func @transform_3(%arg0: i32) -> (i32, i32, i32, i32) {
    %c0_i32 = arith.constant 0 : i32
    %c0_i32_0 = arith.constant 0 : i32
    %c0_i32_1 = arith.constant 0 : i32
    %c0_i32_2 = arith.constant 0 : i32
    return %arg0, %c0_i32, %c0_i32_0, %c0_i32_1 : i32, i32, i32, i32
  }
}

</mosaic_0001>

<bundles_post_ra>
// kernel: tpu_custom_call.1
= control target key start
LH: loop header
LB: loop body
LE: loop exit
PB: predicated region body
PF: predicated region fallthrough
CT: control target
= control target key end

     0   :  { %s9544_s12 = smov 0   ;;  %s12602_s0 = inlined_call_operand.vmem [shape: f32[2,16,16,4], index: 0, kind: input, shape index: {}]   ;;  %s12603_s1 = inlined_call_operand.vmem [shape: f32[3,3,4,4], index: 1, kind: input, shape index: {}]   ;;  %s12604_s2 = inlined_call_operand.vmem [shape: f32[3,3,4,4], index: 2, kind: input, shape index: {}]   ;;  %s12605_s3 = inlined_call_operand.vmem [shape: f32[2,16,16,4], index: 3, kind: output, shape index: {}]  }
   0x1 LB: > { %s7389_s13 = sadd.s32 4294967295, %s9521_s12   ;;  %p7393_p0 = scmp.ge.s32.totalorder %s9521_s12, 1  ;;  %s9521_s12 = sphi %s9544_s12, %s13_s12  }
   0x2   : > { %p137_p1 = scmp.lt.s32.totalorder %s9521_s12, 3 }
   0x4   : > { %p138_p2 = pnand %p7393_p0, %p137_p1 }
   0x6   : > { %141 = sbr.rel (%p138_p2) target bundleno = 1017 (0x3f9), region = 32 }
   0xb   : > { %v7398_v0 = vld [vmem:[%s12603_s1 + $0x4] sm:$0xf]  ;;  %vm445_vm0 = vcmask 1043456   ;;  %vm171_vm1 = vcmask 31744   ;;  %vm174_vm2 = vcmask 25600   ;;  %v9523_v1 = vmov 0.0  }
   0xc   : > { %8606 = vmatprep.subr.msk.mxu0 %vm445_vm0, %v7398_v0  ;;  %172 = vst.msk [vmem:[#allocation2] sm:$0xff] %vm171_vm1, %v9523_v1  ;;  %173 = vst.msk [vmem:[#allocation2 + $0x8] sm:$0xff] %vm171_vm1, %v9523_v1  ;;  %v314_v2 = vld [vmem:[%s12603_s1] sm:$0xf]  ;;  %vm180_vm3 = vcmask 24576   ;;  %p9570_p3 = scmp.lt.s32.totalorder %s7389_s13, 1 }
   0xd   : > { %177 = vst.msk [vmem:[#allocation2 + $0x198] sm:$0xff] %vm171_vm1, %v9523_v1  ;;  %178 = vst.msk [vmem:[#allocation2 + $0x1a0] sm:$0xff] %vm171_vm1, %v9523_v1  ;;  %v9566_v3 = vld [vmem:[%s12603_s1 + $0x8] sm:$0xf]  ;;  %8607 = vmatpush3.msk.msra.mxu0 %vm445_vm0, %v7398_v0  ;;  %8656 = vmatprep.subr.msk.mxu1 %vm445_vm0, %v314_v2  ;;  %v7499_v4 = vld [vmem:[%s12603_s1 + $0xc] sm:$0xf] }
   0xe   : > { %175 = vst.msk [vmem:[#allocation2 + $0x10] sm:$0x3] %vm174_vm2, %v9523_v1  ;;  %179 = vst.msk [vmem:[#allocation2 + $0x1a8] sm:$0x3] %vm174_vm2, %v9523_v1  ;;  %8657 = vmatpush3.msk.msra.mxu1 %vm445_vm0, %v314_v2  ;;  %8706 = vmatprep.subr.msk.mxu0 %vm445_vm0, %v9566_v3  ;;  %s13104_s13 = smov (!%p9570_p3, %s7389_s13), 1 }
   0xf   : > { %181 = vst.msk [vmem:[#allocation2] sm:$0x1] %vm180_vm3, %v9523_v1  ;;  %182 = vst.msk [vmem:[#allocation2 + $0x18] sm:$0x1] %vm180_vm3, %v9523_v1  ;;  %8756 = vmatprep.subr.msk.mxu1 %vm445_vm0, %v7499_v4  ;;  %s8010_s23 = sshll.u32 %s13104_s13, 8 }
  0x10   : > { %183 = vst.msk [vmem:[#allocation2 + $0x30] sm:$0x1] %vm180_vm3, %v9523_v1  ;;  %184 = vst.msk [vmem:[#allocation2 + $0x48] sm:$0x1] %vm180_vm3, %v9523_v1  ;;  %s9631_s26 = scalar_lea.vmem %s12602_s0, %s8010_s23  ;;  %v9639_v8 = vld [vmem:[%s12603_s1 + $0x10] sm:$0xf]  ;;  %s12388_s7 = scalar_lea.vmem %s12605_s3, %s8010_s23 }
  0x11   : > { %185 = vst.msk [vmem:[#allocation2 + $0x60] sm:$0x1] %vm180_vm3, %v9523_v1  ;;  %186 = vst.msk [vmem:[#allocation2 + $0x78] sm:$0x1] %vm180_vm3, %v9523_v1  ;;  %v217_v5 = vld [vmem:[%s9631_s26] sm:$0xff]  ;;  %v218_v6 = vld [vmem:[%s9631_s26 + $0x8] sm:$0xff] }
  0x12   : > { %187 = vst.msk [vmem:[#allocation2 + $0x90] sm:$0x1] %vm180_vm3, %v9523_v1  ;;  %188 = vst.msk [vmem:[#allocation2 + $0xa8] sm:$0x1] %vm180_vm3, %v9523_v1  ;;  %v219_v7 = vld [vmem:[%s9631_s26 + $0x10] sm:$0xff]  ;;  %v220_v13 = vld [vmem:[%s9631_s26 + $0x18] sm:$0xff] }
  0x13   : > { %189 = vst.msk [vmem:[#allocation2 + $0xc0] sm:$0x1] %vm180_vm3, %v9523_v1  ;;  %190 = vst.msk [vmem:[#allocation2 + $0xd8] sm:$0x1] %vm180_vm3, %v9523_v1  ;;  %v315_v9 = vld [vmem:[#allocation2 + $0x1] sm:$0xff]  ;;  %v223_v16 = vld [vmem:[%s9631_s26 + $0x30] sm:$0xff] }
  0x14   : > { %191 = vst.msk [vmem:[#allocation2 + $0xf0] sm:$0x1] %vm180_vm3, %v9523_v1  ;;  %192 = vst.msk [vmem:[#allocation2 + $0x108] sm:$0x1] %vm180_vm3, %v9523_v1  ;;  %v283_v11 = vld [vmem:[#allocation2 + $0x8] sm:$0xff]  ;;  %8608 = vmatprep.mubr.msk.f32.mxu0 %vm171_vm1, %v315_v9  ;;  %v221_v14 = vld [vmem:[%s9631_s26 + $0x20] sm:$0xff] }
  0x15   : > { %193 = vst.msk [vmem:[#allocation2 + $0x120] sm:$0x1] %vm180_vm3, %v9523_v1  ;;  %194 = vst.msk [vmem:[#allocation2 + $0x138] sm:$0x1] %vm180_vm3, %v9523_v1  ;;  %v316_v10 = vld [vmem:[#allocation2 + $0x9] sm:$0xff]  ;;  %v224_v17 = vld [vmem:[%s9631_s26 + $0x38] sm:$0xff] }
  0x16   : > { %195 = vst.msk [vmem:[#allocation2 + $0x150] sm:$0x1] %vm180_vm3, %v9523_v1  ;;  %196 = vst.msk [vmem:[#allocation2 + $0x168] sm:$0x1] %vm180_vm3, %v9523_v1  ;;  %v282_v12 = vld [vmem:[#allocation2] sm:$0xff]  ;;  %8609 = vmatmul.mubr.msk.f32.vlgmr.msra.gmra.mxu0 %vm171_vm1, %v316_v10  ;;  %v222_v15 = vld [vmem:[%s9631_s26 + $0x28] sm:$0xff] }
  0x17   : > { %197 = vst.msk [vmem:[#allocation2 + $0x180] sm:$0x1] %vm180_vm3, %v9523_v1  ;;  %198 = vst.msk [vmem:[#allocation2 + $0x198] sm:$0x1] %vm180_vm3, %v9523_v1  ;;  %8658 = vmatprep.mubr.msk.f32.mxu1 %vm171_vm1, %v282_v12  ;;  %8707 = vmatpush3.msk.msra.mxu0 %vm445_vm0, %v9566_v3  ;;  %v225_v18 = vld [vmem:[%s9631_s26 + $0x40] sm:$0xff]  ;;  %v226_v19 = vld [vmem:[%s9631_s26 + $0x48] sm:$0xff] }
  0x18   : > { %199 = vst.msk [vmem:[#allocation2 + $0x11] sm:$0x1] %vm180_vm3, %v9523_v1  ;;  %200 = vst.msk [vmem:[#allocation2 + $0x29] sm:$0x1] %vm180_vm3, %v9523_v1  ;;  %8659 = vmatmul.mubr.msk.f32.vlgmr.msra.gmra.mxu1 %vm171_vm1, %v283_v11  ;;  %v227_v20 = vld [vmem:[%s9631_s26 + $0x50] sm:$0xff]  ;;  %v228_v21 = vld [vmem:[%s9631_s26 + $0x58] sm:$0xff]  ;;  %8806 = vmatprep.subr.msk.mxu0 %vm445_vm0, %v9639_v8 }
  0x19   : > { %201 = vst.msk [vmem:[#allocation2 + $0x41] sm:$0x1] %vm180_vm3, %v9523_v1  ;;  %202 = vst.msk [vmem:[#allocation2 + $0x59] sm:$0x1] %vm180_vm3, %v9523_v1  ;;  %v229_v22 = vld [vmem:[%s9631_s26 + $0x60] sm:$0xff]  ;;  %v230_v23 = vld [vmem:[%s9631_s26 + $0x68] sm:$0xff]  ;;  %8757 = vmatpush3.msk.msra.mxu1 %vm445_vm0, %v7499_v4 }
  0x1a   : > { %203 = vst.msk [vmem:[#allocation2 + $0x71] sm:$0x1] %vm180_vm3, %v9523_v1  ;;  %204 = vst.msk [vmem:[#allocation2 + $0x89] sm:$0x1] %vm180_vm3, %v9523_v1  ;;  %v231_v24 = vld [vmem:[%s9631_s26 + $0x70] sm:$0xff]  ;;  %v232_v25 = vld [vmem:[%s9631_s26 + $0x78] sm:$0xff] }
  0x1b   : > { %205 = vst.msk [vmem:[#allocation2 + $0xa1] sm:$0x1] %vm180_vm3, %v9523_v1  ;;  %206 = vst.msk [vmem:[#allocation2 + $0xb9] sm:$0x1] %vm180_vm3, %v9523_v1  ;;  %v233_v26 = vld [vmem:[%s9631_s26 + $0x80] sm:$0xff]  ;;  %v234_v27 = vld [vmem:[%s9631_s26 + $0x88] sm:$0xff] }
  0x1c   : > { %207 = vst.msk [vmem:[#allocation2 + $0xd1] sm:$0x1] %vm180_vm3, %v9523_v1  ;;  %208 = vst.msk [vmem:[#allocation2 + $0xe9] sm:$0x1] %vm180_vm3, %v9523_v1  ;;  %v235_v28 = vld [vmem:[%s9631_s26 + $0x90] sm:$0xff]  ;;  %v236_v29 = vld [vmem:[%s9631_s26 + $0x98] sm:$0xff] }
  0x1d   : > { %209 = vst.msk [vmem:[#allocation2 + $0x101] sm:$0x1] %vm180_vm3, %v9523_v1  ;;  %210 = vst.msk [vmem:[#allocation2 + $0x119] sm:$0x1] %vm180_vm3, %v9523_v1  ;;  %v237_v50 = vld [vmem:[%s9631_s26 + $0xa0] sm:$0xff]  ;;  %v238_v51 = vld [vmem:[%s9631_s26 + $0xa8] sm:$0xff] }
  0x1e   : > { %211 = vst.msk [vmem:[#allocation2 + $0x131] sm:$0x1] %vm180_vm3, %v9523_v1  ;;  %212 = vst.msk [vmem:[#allocation2 + $0x149] sm:$0x1] %vm180_vm3, %v9523_v1  ;;  %v239_v53 = vld [vmem:[%s9631_s26 + $0xb0] sm:$0xff]  ;;  %v240_v54 = vld [vmem:[%s9631_s26 + $0xb8] sm:$0xff] }
  0x1f   : > { %213 = vst.msk [vmem:[#allocation2 + $0x161] sm:$0x1] %vm180_vm3, %v9523_v1  ;;  %214 = vst.msk [vmem:[#allocation2 + $0x179] sm:$0x1] %vm180_vm3, %v9523_v1  ;;  %v241_v55 = vld [vmem:[%s9631_s26 + $0xc0] sm:$0xff]  ;;  %v242_v56 = vld [vmem:[%s9631_s26 + $0xc8] sm:$0xff] }
  0x20   : > { %215 = vst.msk [vmem:[#allocation2 + $0x191] sm:$0x1] %vm180_vm3, %v9523_v1  ;;  %216 = vst.msk [vmem:[#allocation2 + $0x1a9] sm:$0x1] %vm180_vm3, %v9523_v1  ;;  %v243_v57 = vld [vmem:[%s9631_s26 + $0xd0] sm:$0xff]  ;;  %v244_v58 = vld [vmem:[%s9631_s26 + $0xd8] sm:$0xff] }
  0x21   : > { %250 = vst.msk [vmem:[#allocation2 + $0x19] sm:$0xff] %vm171_vm1, %v217_v5  ;;  %251 = vst.msk [vmem:[#allocation2 + $0x21] sm:$0xff] %vm171_vm1, %v218_v6  ;;  %v245_v60 = vld [vmem:[%s9631_s26 + $0xe0] sm:$0xff]  ;;  %v246_v61 = vld [vmem:[%s9631_s26 + $0xe8] sm:$0xff] }
  0x22   : > { %252 = vst.msk [vmem:[#allocation2 + $0x31] sm:$0xff] %vm171_vm1, %v219_v7  ;;  %253 = vst.msk [vmem:[#allocation2 + $0x39] sm:$0xff] %vm171_vm1, %v220_v13 }
  0x23   : > { %254 = vst.msk [vmem:[#allocation2 + $0x49] sm:$0xff] %vm171_vm1, %v221_v14  ;;  %255 = vst.msk [vmem:[#allocation2 + $0x51] sm:$0xff] %vm171_vm1, %v222_v15  ;;  %v247_v15 = vld [vmem:[%s9631_s26 + $0xf0] sm:$0xff] }
  0x24   : > { %256 = vst.msk [vmem:[#allocation2 + $0x61] sm:$0xff] %vm171_vm1, %v223_v16  ;;  %257 = vst.msk [vmem:[#allocation2 + $0x69] sm:$0xff] %vm171_vm1, %v224_v17  ;;  %v9859_v16 = vld [vmem:[%s12603_s1 + $0x14] sm:$0xf]  ;;  %v248_v17 = vld [vmem:[%s9631_s26 + $0xf8] sm:$0xff] }
  0x25   : > { %258 = vst.msk [vmem:[#allocation2 + $0x79] sm:$0xff] %vm171_vm1, %v225_v18  ;;  %259 = vst.msk [vmem:[#allocation2 + $0x81] sm:$0xff] %vm171_vm1, %v226_v19  ;;  %8856 = vmatprep.subr.msk.mxu1 %vm445_vm0, %v9859_v16 }
  0x26   : > { %260 = vst.msk [vmem:[#allocation2 + $0x91] sm:$0xff] %vm171_vm1, %v227_v20  ;;  %261 = vst.msk [vmem:[#allocation2 + $0x99] sm:$0xff] %vm171_vm1, %v228_v21 }
  0x27   : > { %262 = vst.msk [vmem:[#allocation2 + $0xa9] sm:$0xff] %vm171_vm1, %v229_v22  ;;  %263 = vst.msk [vmem:[#allocation2 + $0xb1] sm:$0xff] %vm171_vm1, %v230_v23 }
  0x28   : > { %264 = vst.msk [vmem:[#allocation2 + $0xc1] sm:$0xff] %vm171_vm1, %v231_v24  ;;  %265 = vst.msk [vmem:[#allocation2 + $0xc9] sm:$0xff] %vm171_vm1, %v232_v25  ;;  %v9684_v30 = vld [vmem:[#allocation2 + $0x19] sm:$0xff]  ;;  %v9688_v32 = vld [vmem:[#allocation2 + $0x21] sm:$0xff] }
  0x29   : > { %266 = vst.msk [vmem:[#allocation2 + $0xd9] sm:$0xff] %vm171_vm1, %v233_v26  ;;  %v9686_v31 = vld [vmem:[#allocation2 + $0x18] sm:$0xff]  ;;  %267 = vst.msk [vmem:[#allocation2 + $0xe1] sm:$0xff] %vm171_vm1, %v234_v27  ;;  %8611 = vmatprep.mubr.msk.f32.mxu0 %vm171_vm1, %v9684_v30  ;;  %v9697_v33 = vld [vmem:[#allocation2 + $0x20] sm:$0xff] }
  0x2a   : > { %268 = vst.msk [vmem:[#allocation2 + $0xf1] sm:$0xff] %vm171_vm1, %v235_v28  ;;  %269 = vst.msk [vmem:[#allocation2 + $0xf9] sm:$0xff] %vm171_vm1, %v236_v29  ;;  %8661 = vmatprep.mubr.msk.f32.mxu1 %vm171_vm1, %v9686_v31  ;;  %v9699_v34 = vld [vmem:[#allocation2 + $0x31] sm:$0xff]  ;;  %8612 = vmatmul.mubr.msk.f32.gmra.mxu0 %vm171_vm1, %v9688_v32  ;;  %v9711_v36 = vld [vmem:[#allocation2 + $0x39] sm:$0xff] }
  0x2b   : > { %v9701_v35 = vld [vmem:[#allocation2 + $0x30] sm:$0xff]  ;;  %8662 = vmatmul.mubr.msk.f32.gmra.mxu1 %vm171_vm1, %v9697_v33  ;;  %8614 = vmatprep.mubr.msk.f32.mxu0 %vm171_vm1, %v9699_v34  ;;  %v9713_v37 = vld [vmem:[#allocation2 + $0x38] sm:$0xff]  ;;  %v9717_v39 = vld [vmem:[#allocation2 + $0x48] sm:$0xff]  ;;  %270 = vst.msk [vmem:[#allocation2 + $0x109] sm:$0xff] %vm171_vm1, %v237_v50 }
  0x2c   : > { %12673 = vst [vmem:[#allocation3_spill] sm:$0xff] %v9701_v35  ;;  %8664 = vmatprep.mubr.msk.f32.mxu1 %vm171_vm1, %v9701_v35  ;;  %12674 = vst [vmem:[#allocation4_spill] sm:$0xff] %v9713_v37  ;;  %v9715_v38 = vld [vmem:[#allocation2 + $0x49] sm:$0xff]  ;;  %v9727_v40 = vld [vmem:[#allocation2 + $0x51] sm:$0xff] }
  0x2d   : > { %12675 = vst [vmem:[#allocation5_spill] sm:$0xff] %v9717_v39  ;;  %v9729_v41 = vld [vmem:[#allocation2 + $0x50] sm:$0xff]  ;;  %v9731_v42 = vld [vmem:[#allocation2 + $0x61] sm:$0xff]  ;;  %v9747_v46 = vld [vmem:[#allocation2 + $0x79] sm:$0xff] }
  0x2e   : > { %8615 = vmatmul.mubr.msk.f32.gmra.mxu0 %vm171_vm1, %v9711_v36  ;;  %12676 = vst [vmem:[#allocation6_spill] sm:$0xff] %v9729_v41  ;;  %v9733_v43 = vld [vmem:[#allocation2 + $0x60] sm:$0xff]  ;;  %v9743_v44 = vld [vmem:[#allocation2 + $0x69] sm:$0xff]  ;;  %v9749_v47 = vld [vmem:[#allocation2 + $0x78] sm:$0xff] }
  0x2f   : > { %8665 = vmatmul.mubr.msk.f32.gmra.mxu1 %vm171_vm1, %v9713_v37  ;;  %8617 = vmatprep.mubr.msk.f32.mxu0 %vm171_vm1, %v9715_v38  ;;  %12677 = vst [vmem:[#allocation7_spill] sm:$0xff] %v9733_v43  ;;  %v9745_v45 = vld [vmem:[#allocation2 + $0x68] sm:$0xff]  ;;  %12679 = vst [vmem:[#allocation9_spill] sm:$0xff] %v9749_v47  ;;  %v9753_v49 = vld [vmem:[#allocation2 + $0x80] sm:$0xff] }
  0x30   : > { %8667 = vmatprep.mubr.msk.f32.mxu1 %vm171_vm1, %v9717_v39  ;;  %12678 = vst [vmem:[#allocation8_spill] sm:$0xff] %v9745_v45  ;;  %v9751_v48 = vld [vmem:[#allocation2 + $0x81] sm:$0xff]  ;;  %12680 = vst [vmem:[#allocation10_spill] sm:$0xff] %v9753_v49  ;;  %v9761_v52 = vld [vmem:[#allocation2 + $0x91] sm:$0xff] }
  0x31   : > { %271 = vst.msk [vmem:[#allocation2 + $0x111] sm:$0xff] %vm171_vm1, %v238_v51  ;;  %272 = vst.msk [vmem:[#allocation2 + $0x121] sm:$0xff] %vm171_vm1, %v239_v53  ;;  %v9778_v59 = vld [vmem:[#allocation2 + $0x90] sm:$0xff]  ;;  %v9795_v62 = vld [vmem:[#allocation2 + $0x99] sm:$0xff] }
  0x32   : > { %8618 = vmatmul.mubr.msk.f32.gmra.mxu0 %vm171_vm1, %v9727_v40  ;;  %273 = vst.msk [vmem:[#allocation2 + $0x129] sm:$0xff] %vm171_vm1, %v240_v54  ;;  %274 = vst.msk [vmem:[#allocation2 + $0x139] sm:$0xff] %vm171_vm1, %v241_v55  ;;  %v9797_v63 = vld [vmem:[#allocation2 + $0x98] sm:$0xff]  ;;  %v9799_v0 = vld [vmem:[#allocation2 + $0xa9] sm:$0xff] }
  0x33   : > { %8668 = vmatmul.mubr.msk.f32.gmra.mxu1 %vm171_vm1, %v9729_v41  ;;  %8620 = vmatprep.mubr.msk.f32.mxu0 %vm171_vm1, %v9731_v42  ;;  %12681 = vst [vmem:[#allocation11_spill] sm:$0xff] %v9778_v59  ;;  %275 = vst.msk [vmem:[#allocation2 + $0x141] sm:$0xff] %vm171_vm1, %v242_v56  ;;  %v9801_v1 = vld [vmem:[#allocation2 + $0xa8] sm:$0xff]  ;;  %v9811_v2 = vld [vmem:[#allocation2 + $0xb1] sm:$0xff] }
  0x34   : > { %8670 = vmatprep.mubr.msk.f32.mxu1 %vm171_vm1, %v9733_v43  ;;  %276 = vst.msk [vmem:[#allocation2 + $0x151] sm:$0xff] %vm171_vm1, %v243_v57  ;;  %277 = vst.msk [vmem:[#allocation2 + $0x159] sm:$0xff] %vm171_vm1, %v244_v58  ;;  %v9813_v3 = vld [vmem:[#allocation2 + $0xb0] sm:$0xff]  ;;  %v9815_v4 = vld [vmem:[#allocation2 + $0xc1] sm:$0xff] }
  0x35   : > { %278 = vst.msk [vmem:[#allocation2 + $0x169] sm:$0xff] %vm171_vm1, %v245_v60  ;;  %279 = vst.msk [vmem:[#allocation2 + $0x171] sm:$0xff] %vm171_vm1, %v246_v61  ;;  %v9817_v5 = vld [vmem:[#allocation2 + $0xc0] sm:$0xff]  ;;  %v9827_v6 = vld [vmem:[#allocation2 + $0xc9] sm:$0xff] }
  0x36   : > { %8621 = vmatmul.mubr.msk.f32.gmra.mxu0 %vm171_vm1, %v9743_v44  ;;  %12682 = vst [vmem:[#allocation12_spill] sm:$0xff] %v9797_v63  ;;  %12683 = vst [vmem:[#allocation13_spill] sm:$0xff] %v9801_v1  ;;  %v9829_v7 = vld [vmem:[#allocation2 + $0xc8] sm:$0xff]  ;;  %v9831_v9 = vld [vmem:[#allocation2 + $0xd9] sm:$0xff] }
  0x37   : > { %8671 = vmatmul.mubr.msk.f32.gmra.mxu1 %vm171_vm1, %v9745_v45  ;;  %8623 = vmatprep.mubr.msk.f32.mxu0 %vm171_vm1, %v9747_v46  ;;  %12684 = vst [vmem:[#allocation14_spill] sm:$0xff] %v9813_v3  ;;  %12685 = vst [vmem:[#allocation15_spill] sm:$0xff] %v9817_v5  ;;  %v9833_v10 = vld [vmem:[#allocation2 + $0xd8] sm:$0xff]  ;;  %v9843_v11 = vld [vmem:[#allocation2 + $0xe1] sm:$0xff] }
  0x38   : > { %8673 = vmatprep.mubr.msk.f32.mxu1 %vm171_vm1, %v9749_v47  ;;  %12686 = vst [vmem:[#allocation16_spill] sm:$0xff] %v9829_v7  ;;  %12687 = vst [vmem:[#allocation17_spill] sm:$0xff] %v9833_v10  ;;  %v9845_v12 = vld [vmem:[#allocation2 + $0xe0] sm:$0xff]  ;;  %v9847_v13 = vld [vmem:[#allocation2 + $0xf1] sm:$0xff] }
  0x39   : > { %12688 = vst [vmem:[#allocation18_spill] sm:$0xff] %v9845_v12  ;;  %v9849_v14 = vld [vmem:[#allocation2 + $0xf0] sm:$0xff]  ;;  %v9866_v18 = vld [vmem:[#allocation2 + $0xf9] sm:$0xff]  ;;  %280 = vst.msk [vmem:[#allocation2 + $0x181] sm:$0xff] %vm171_vm1, %v247_v15 }
  0x3a   : > { %8624 = vmatmul.mubr.msk.f32.gmra.mxu0 %vm171_vm1, %v9751_v48  ;;  %12689 = vst [vmem:[#allocation19_spill] sm:$0xff] %v9849_v14  ;;  %v9868_v19 = vld [vmem:[#allocation2 + $0xf8] sm:$0xff]  ;;  %281 = vst.msk [vmem:[#allocation2 + $0x189] sm:$0xff] %vm171_vm1, %v248_v17  ;;  %v9872_v20 = vld [vmem:[#allocation2 + $0x109] sm:$0xff] }
  0x3b   : > { %8674 = vmatmul.mubr.msk.f32.gmra.mxu1 %vm171_vm1, %v9753_v49  ;;  %8626 = vmatprep.mubr.msk.f32.mxu0 %vm171_vm1, %v9761_v52  ;;  %12690 = vst [vmem:[#allocation20_spill] sm:$0xff] %v9868_v19  ;;  %v9874_v21 = vld [vmem:[#allocation2 + $0x108] sm:$0xff]  ;;  %v9886_v22 = vld [vmem:[#allocation2 + $0x111] sm:$0xff]  ;;  %v9892_v25 = vld [vmem:[#allocation2 + $0x120] sm:$0xff] }
  0x3c   : > { %8676 = vmatprep.mubr.msk.f32.mxu1 %vm171_vm1, %v9778_v59  ;;  %12691 = vst [vmem:[#allocation21_spill] sm:$0xff] %v9874_v21  ;;  %v9888_v23 = vld [vmem:[#allocation2 + $0x110] sm:$0xff]  ;;  %v9890_v24 = vld [vmem:[#allocation2 + $0x121] sm:$0xff]  ;;  %12693 = vst [vmem:[#allocation23_spill] sm:$0xff] %v9892_v25 }
  0x3d   : > { %12692 = vst [vmem:[#allocation22_spill] sm:$0xff] %v9888_v23  ;;  %v9902_v26 = vld [vmem:[#allocation2 + $0x129] sm:$0xff]  ;;  %v9906_v28 = vld [vmem:[#allocation2 + $0x139] sm:$0xff]  ;;  %v9918_v50 = vld [vmem:[#allocation2 + $0x141] sm:$0xff] }
  0x3e   : > { %8627 = vmatmul.mubr.msk.f32.gmra.mxu0 %vm171_vm1, %v9795_v62  ;;  %v9904_v27 = vld [vmem:[#allocation2 + $0x128] sm:$0xff]  ;;  %v9908_v29 = vld [vmem:[#allocation2 + $0x138] sm:$0xff]  ;;  %v9920_v51 = vld [vmem:[#allocation2 + $0x140] sm:$0xff] }
  0x3f   : > { %8677 = vmatmul.mubr.msk.f32.gmra.mxu1 %vm171_vm1, %v9797_v63  ;;  %8629 = vmatprep.mubr.msk.f32.mxu0 %vm171_vm1, %v9799_v0  ;;  %12694 = vst [vmem:[#allocation24_spill] sm:$0xff] %v9904_v27  ;;  %12695 = vst [vmem:[#allocation25_spill] sm:$0xff] %v9908_v29  ;;  %v9922_v53 = vld [vmem:[#allocation2 + $0x151] sm:$0xff]  ;;  %v9934_v55 = vld [vmem:[#allocation2 + $0x159] sm:$0xff] }
  0x40   : > { %8679 = vmatprep.mubr.msk.f32.mxu1 %vm171_vm1, %v9801_v1  ;;  %12696 = vst [vmem:[#allocation26_spill] sm:$0xff] %v9920_v51  ;;  %v9924_v54 = vld [vmem:[#allocation2 + $0x150] sm:$0xff]  ;;  %v9936_v56 = vld [vmem:[#allocation2 + $0x158] sm:$0xff]  ;;  %v9940_v58 = vld [vmem:[#allocation2 + $0x168] sm:$0xff] }
  0x41   : > { %12697 = vst [vmem:[#allocation27_spill] sm:$0xff] %v9924_v54  ;;  %12698 = vst [vmem:[#allocation28_spill] sm:$0xff] %v9936_v56  ;;  %v9938_v57 = vld [vmem:[#allocation2 + $0x169] sm:$0xff]  ;;  %v9950_v60 = vld [vmem:[#allocation2 + $0x171] sm:$0xff] }
  0x42   : > { %8630 = vmatmul.mubr.msk.f32.gmra.mxu0 %vm171_vm1, %v9811_v2  ;;  %12699 = vst [vmem:[#allocation29_spill] sm:$0xff] %v9938_v57  ;;  %12700 = vst [vmem:[#allocation30_spill] sm:$0xff] %v9950_v60  ;;  %v9952_v61 = vld [vmem:[#allocation2 + $0x170] sm:$0xff]  ;;  %v998_v15 = vld [vmem:[#allocation2 + $0x2] sm:$0xff] }
  0x43   : > { %8680 = vmatmul.mubr.msk.f32.gmra.mxu1 %vm171_vm1, %v9813_v3  ;;  %8632 = vmatprep.mubr.msk.f32.mxu0 %vm171_vm1, %v9815_v4  ;;  %v999_v17 = vld [vmem:[#allocation2 + $0xa] sm:$0xff] }
  0x44   : > { %8682 = vmatprep.mubr.msk.f32.mxu1 %vm171_vm1, %v9817_v5 }
  0x46   : > { %8633 = vmatmul.mubr.msk.f32.gmra.mxu0 %vm171_vm1, %v9827_v6 }
  0x47   : > { %8683 = vmatmul.mubr.msk.f32.gmra.mxu1 %vm171_vm1, %v9829_v7  ;;  %8635 = vmatprep.mubr.msk.f32.mxu0 %vm171_vm1, %v9831_v9 }
  0x48   : > { %8685 = vmatprep.mubr.msk.f32.mxu1 %vm171_vm1, %v9833_v10 }
  0x4a   : > { %8636 = vmatmul.mubr.msk.f32.gmra.mxu0 %vm171_vm1, %v9843_v11 }
  0x4b   : > { %8686 = vmatmul.mubr.msk.f32.gmra.mxu1 %vm171_vm1, %v9845_v12  ;;  %8638 = vmatprep.mubr.msk.f32.mxu0 %vm171_vm1, %v9847_v13 }
  0x4c   : > { %8688 = vmatprep.mubr.msk.f32.mxu1 %vm171_vm1, %v9849_v14 }
  0x4e   : > { %8639 = vmatmul.mubr.msk.f32.gmra.mxu0 %vm171_vm1, %v9866_v18 }
  0x4f   : > { %8689 = vmatmul.mubr.msk.f32.gmra.mxu1 %vm171_vm1, %v9868_v19  ;;  %8641 = vmatprep.mubr.msk.f32.mxu0 %vm171_vm1, %v9872_v20 }
  0x50   : > { %8691 = vmatprep.mubr.msk.f32.mxu1 %vm171_vm1, %v9874_v21 }
  0x52   : > { %8642 = vmatmul.mubr.msk.f32.gmra.mxu0 %vm171_vm1, %v9886_v22 }
  0x53   : > { %8692 = vmatmul.mubr.msk.f32.gmra.mxu1 %vm171_vm1, %v9888_v23  ;;  %8644 = vmatprep.mubr.msk.f32.mxu0 %vm171_vm1, %v9890_v24 }
  0x54   : > { %8694 = vmatprep.mubr.msk.f32.mxu1 %vm171_vm1, %v9892_v25 }
  0x56   : > { %8645 = vmatmul.mubr.msk.f32.gmra.mxu0 %vm171_vm1, %v9902_v26 }
  0x57   : > { %8695 = vmatmul.mubr.msk.f32.gmra.mxu1 %vm171_vm1, %v9904_v27  ;;  %8647 = vmatprep.mubr.msk.f32.mxu0 %vm171_vm1, %v9906_v28 }
  0x58   : > { %8697 = vmatprep.mubr.msk.f32.mxu1 %vm171_vm1, %v9908_v29 }
  0x5a   : > { %8648 = vmatmul.mubr.msk.f32.gmra.mxu0 %vm171_vm1, %v9918_v50 }
  0x5b   : > { %8698 = vmatmul.mubr.msk.f32.gmra.mxu1 %vm171_vm1, %v9920_v51  ;;  %8650 = vmatprep.mubr.msk.f32.mxu0 %vm171_vm1, %v9922_v53 }
  0x5c   : > { %8700 = vmatprep.mubr.msk.f32.mxu1 %vm171_vm1, %v9924_v54 }
  0x5e   : > { %8651 = vmatmul.mubr.msk.f32.gmra.mxu0 %vm171_vm1, %v9934_v55 }
  0x5f   : > { %8701 = vmatmul.mubr.msk.f32.gmra.mxu1 %vm171_vm1, %v9936_v56  ;;  %8653 = vmatprep.mubr.msk.f32.mxu0 %vm171_vm1, %v9938_v57  ;;  %v9961_v57 = vld [vmem:[#allocation2 + $0x1a] sm:$0xff] }
  0x60   : > { %8703 = vmatprep.mubr.msk.f32.mxu1 %vm171_vm1, %v9940_v58 }
  0x62   : > { %8654 = vmatmul.mubr.msk.f32.gmra.mxu0 %vm171_vm1, %v9950_v60  ;;  %v9969_v60 = vld [vmem:[%s12603_s1 + $0x18] sm:$0xf] }
  0x63   : > { %8704 = vmatmul.mubr.msk.f32.gmra.mxu1 %vm171_vm1, %v9952_v61  ;;  %8708 = vmatprep.mubr.msk.f32.mxu0 %vm171_vm1, %v998_v15  ;;  %v9974_v15 = vld [vmem:[%s12603_s1 + $0x1c] sm:$0xf] }
  0x64   : > { %8758 = vmatprep.mubr.msk.f32.mxu1 %vm171_vm1, %v9686_v31  ;;  %v9980_v31 = vld [vmem:[#allocation2 + $0x22] sm:$0xff] }
  0x66   : > { %8709 = vmatmul.mubr.msk.f32.vlgmr.msra.gmra.mxu0 %vm171_vm1, %v999_v17  ;;  %v10010_v17 = vld [vmem:[#allocation2 + $0x52] sm:$0xff] }
  0x67   : > { %8759 = vmatmul.mubr.msk.f32.vlgmr.msra.gmra.mxu1 %vm171_vm1, %v9697_v33  ;;  %8807 = vmatpush3.msk.msra.mxu0 %vm445_vm0, %v9639_v8  ;;  %v9984_v33 = vld [vmem:[#allocation2 + $0x32] sm:$0xff]  ;;  %v9998_v8 = vld [vmem:[#allocation2 + $0x3a] sm:$0xff] }
  0x68   : > { %8711 = vmatprep.mubr.msk.f32.mxu0 %vm171_vm1, %v9961_v57  ;;  %8761 = vmatprep.mubr.msk.f32.mxu1 %vm171_vm1, %v9701_v35  ;;  %v10148_v35 = vld [vmem:[#allocation2 + $0x180] sm:$0xff] }
  0x69   : > { %8857 = vmatpush3.msk.msra.mxu1 %vm445_vm0, %v9859_v16  ;;  %8906 = vmatprep.subr.msk.mxu0 %vm445_vm0, %v9969_v60  ;;  %v10002_v16 = vld [vmem:[#allocation2 + $0x4a] sm:$0xff]  ;;  %12701 = vst [vmem:[#allocation31_spill] sm:$0xff] %v10148_v35 }
  0x6a   : > { %8956 = vmatprep.subr.msk.mxu1 %vm445_vm0, %v9974_v15  ;;  %8712 = vmatmul.mubr.msk.f32.gmra.mxu0 %vm171_vm1, %v9980_v31 }
  0x6b   : > { %8762 = vmatmul.mubr.msk.f32.gmra.mxu1 %vm171_vm1, %v9713_v37  ;;  %8714 = vmatprep.mubr.msk.f32.mxu0 %vm171_vm1, %v9984_v33  ;;  %v10014_v37 = vld [vmem:[#allocation2 + $0x62] sm:$0xff] }
  0x6c   : > { %8764 = vmatprep.mubr.msk.f32.mxu1 %vm171_vm1, %v9717_v39  ;;  %v10026_v39 = vld [vmem:[#allocation2 + $0x7a] sm:$0xff] }
  0x6e   : > { %8715 = vmatmul.mubr.msk.f32.gmra.mxu0 %vm171_vm1, %v9998_v8 }
  0x6f   : > { %8765 = vmatmul.mubr.msk.f32.gmra.mxu1 %vm171_vm1, %v9729_v41  ;;  %8717 = vmatprep.mubr.msk.f32.mxu0 %vm171_vm1, %v10002_v16  ;;  %v10022_v41 = vld [vmem:[#allocation2 + $0x6a] sm:$0xff] }
  0x70   : > { %8767 = vmatprep.mubr.msk.f32.mxu1 %vm171_vm1, %v9733_v43  ;;  %v10038_v43 = vld [vmem:[#allocation2 + $0x92] sm:$0xff] }
  0x72   : > { %8718 = vmatmul.mubr.msk.f32.gmra.mxu0 %vm171_vm1, %v10010_v17 }
  0x73   : > { %8768 = vmatmul.mubr.msk.f32.gmra.mxu1 %vm171_vm1, %v9745_v45  ;;  %8720 = vmatprep.mubr.msk.f32.mxu0 %vm171_vm1, %v10014_v37  ;;  %v10034_v45 = vld [vmem:[#allocation2 + $0x82] sm:$0xff] }
  0x74   : > { %8770 = vmatprep.mubr.msk.f32.mxu1 %vm171_vm1, %v9749_v47  ;;  %v10050_v47 = vld [vmem:[#allocation2 + $0xaa] sm:$0xff] }
  0x76   : > { %8721 = vmatmul.mubr.msk.f32.gmra.mxu0 %vm171_vm1, %v10022_v41 }
  0x77   : > { %8771 = vmatmul.mubr.msk.f32.gmra.mxu1 %vm171_vm1, %v9753_v49  ;;  %8723 = vmatprep.mubr.msk.f32.mxu0 %vm171_vm1, %v10026_v39  ;;  %v10046_v49 = vld [vmem:[#allocation2 + $0x9a] sm:$0xff] }
  0x78   : > { %8773 = vmatprep.mubr.msk.f32.mxu1 %vm171_vm1, %v9778_v59  ;;  %v10062_v59 = vld [vmem:[#allocation2 + $0xc2] sm:$0xff] }
  0x7a   : > { %8724 = vmatmul.mubr.msk.f32.gmra.mxu0 %vm171_vm1, %v10034_v45 }
  0x7b   : > { %8774 = vmatmul.mubr.msk.f32.gmra.mxu1 %vm171_vm1, %v9797_v63  ;;  %8726 = vmatprep.mubr.msk.f32.mxu0 %vm171_vm1, %v10038_v43  ;;  %v10058_v63 = vld [vmem:[#allocation2 + $0xb2] sm:$0xff] }
  0x7c   : > { %8776 = vmatprep.mubr.msk.f32.mxu1 %vm171_vm1, %v9801_v1  ;;  %v10074_v1 = vld [vmem:[#allocation2 + $0xda] sm:$0xff] }
  0x7e   : > { %8727 = vmatmul.mubr.msk.f32.gmra.mxu0 %vm171_vm1, %v10046_v49 }
  0x7f   : > { %8777 = vmatmul.mubr.msk.f32.gmra.mxu1 %vm171_vm1, %v9813_v3  ;;  %8729 = vmatprep.mubr.msk.f32.mxu0 %vm171_vm1, %v10050_v47  ;;  %v10070_v3 = vld [vmem:[#allocation2 + $0xca] sm:$0xff] }
  0x80   : > { %8779 = vmatprep.mubr.msk.f32.mxu1 %vm171_vm1, %v9817_v5  ;;  %v10086_v5 = vld [vmem:[#allocation2 + $0xf2] sm:$0xff] }
  0x82   : > { %8730 = vmatmul.mubr.msk.f32.gmra.mxu0 %vm171_vm1, %v10058_v63 }
  0x83   : > { %8780 = vmatmul.mubr.msk.f32.gmra.mxu1 %vm171_vm1, %v9829_v7  ;;  %8732 = vmatprep.mubr.msk.f32.mxu0 %vm171_vm1, %v10062_v59  ;;  %v10082_v7 = vld [vmem:[#allocation2 + $0xe2] sm:$0xff] }
  0x84   : > { %8782 = vmatprep.mubr.msk.f32.mxu1 %vm171_vm1, %v9833_v10  ;;  %v10098_v10 = vld [vmem:[#allocation2 + $0x10a] sm:$0xff] }
  0x86   : > { %8733 = vmatmul.mubr.msk.f32.gmra.mxu0 %vm171_vm1, %v10070_v3 }
  0x87   : > { %8783 = vmatmul.mubr.msk.f32.gmra.mxu1 %vm171_vm1, %v9845_v12  ;;  %8735 = vmatprep.mubr.msk.f32.mxu0 %vm171_vm1, %v10074_v1  ;;  %v10094_v12 = vld [vmem:[#allocation2 + $0xfa] sm:$0xff] }
  0x88   : > { %8785 = vmatprep.mubr.msk.f32.mxu1 %vm171_vm1, %v9849_v14  ;;  %v10110_v14 = vld [vmem:[#allocation2 + $0x122] sm:$0xff] }
  0x8a   : > { %8736 = vmatmul.mubr.msk.f32.gmra.mxu0 %vm171_vm1, %v10082_v7 }
  0x8b   : > { %8786 = vmatmul.mubr.msk.f32.gmra.mxu1 %vm171_vm1, %v9868_v19  ;;  %8738 = vmatprep.mubr.msk.f32.mxu0 %vm171_vm1, %v10086_v5  ;;  %v10106_v19 = vld [vmem:[#allocation2 + $0x112] sm:$0xff] }
  0x8c   : > { %8788 = vmatprep.mubr.msk.f32.mxu1 %vm171_vm1, %v9874_v21  ;;  %v10122_v21 = vld [vmem:[#allocation2 + $0x13a] sm:$0xff] }
  0x8e   : > { %8739 = vmatmul.mubr.msk.f32.gmra.mxu0 %vm171_vm1, %v10094_v12 }
  0x8f   : > { %8789 = vmatmul.mubr.msk.f32.gmra.mxu1 %vm171_vm1, %v9888_v23  ;;  %8741 = vmatprep.mubr.msk.f32.mxu0 %vm171_vm1, %v10098_v10  ;;  %v10118_v23 = vld [vmem:[#allocation2 + $0x12a] sm:$0xff] }
  0x90   : > { %8791 = vmatprep.mubr.msk.f32.mxu1 %vm171_vm1, %v9892_v25  ;;  %v10134_v25 = vld [vmem:[#allocation2 + $0x152] sm:$0xff] }
  0x92   : > { %8742 = vmatmul.mubr.msk.f32.gmra.mxu0 %vm171_vm1, %v10106_v19 }
  0x93   : > { %8792 = vmatmul.mubr.msk.f32.gmra.mxu1 %vm171_vm1, %v9904_v27  ;;  %8744 = vmatprep.mubr.msk.f32.mxu0 %vm171_vm1, %v10110_v14  ;;  %v10130_v27 = vld [vmem:[#allocation2 + $0x142] sm:$0xff] }
  0x94   : > { %8794 = vmatprep.mubr.msk.f32.mxu1 %vm171_vm1, %v9908_v29  ;;  %v10146_v29 = vld [vmem:[#allocation2 + $0x16a] sm:$0xff] }
  0x96   : > { %8745 = vmatmul.mubr.msk.f32.gmra.mxu0 %vm171_vm1, %v10118_v23 }
  0x97   : > { %8795 = vmatmul.mubr.msk.f32.gmra.mxu1 %vm171_vm1, %v9920_v51  ;;  %8747 = vmatprep.mubr.msk.f32.mxu0 %vm171_vm1, %v10122_v21  ;;  %v10142_v51 = vld [vmem:[#allocation2 + $0x15a] sm:$0xff] }
  0x98   : > { %8797 = vmatprep.mubr.msk.f32.mxu1 %vm171_vm1, %v9924_v54  ;;  %v10160_v54 = vld [vmem:[#allocation2 + $0x188] sm:$0xff] }
  0x9a   : > { %8748 = vmatmul.mubr.msk.f32.gmra.mxu0 %vm171_vm1, %v10130_v27 }
  0x9b   : > { %8798 = vmatmul.mubr.msk.f32.gmra.mxu1 %vm171_vm1, %v9936_v56  ;;  %8750 = vmatprep.mubr.msk.f32.mxu0 %vm171_vm1, %v10134_v25  ;;  %v10156_v56 = vld [vmem:[#allocation2 + $0x172] sm:$0xff] }
  0x9c   : > { %8800 = vmatprep.mubr.msk.f32.mxu1 %vm171_vm1, %v9940_v58 }
  0x9e   : > { %8751 = vmatmul.mubr.msk.f32.gmra.mxu0 %vm171_vm1, %v10142_v51 }
  0x9f   : > { %8801 = vmatmul.mubr.msk.f32.gmra.mxu1 %vm171_vm1, %v9952_v61  ;;  %8753 = vmatprep.mubr.msk.f32.mxu0 %vm171_vm1, %v10146_v29 }
  0xa0   : > { %8803 = vmatprep.mubr.msk.f32.mxu1 %vm171_vm1, %v10148_v35  ;;  %v10177_v35 = vld [vmem:[%s12603_s1 + $0x20] sm:$0xf] }
  0xa2   : > { %8754 = vmatmul.mubr.msk.f32.gmra.mxu0 %vm171_vm1, %v10156_v56 }
  0xa3   : > { %8804 = vmatmul.mubr.msk.f32.gmra.mxu1 %vm171_vm1, %v10160_v54  ;;  %8808 = vmatprep.mubr.msk.f32.mxu0 %vm171_vm1, %v9684_v30  ;;  %v12702_v30 = vld [vmem:[#allocation29_spill] sm:$0xff] }
  0xa4   : > { %8858 = vmatprep.mubr.msk.f32.mxu1 %vm171_vm1, %v9961_v57 }
  0xa6   : > { %8809 = vmatmul.mubr.msk.f32.vlgmr.msra.gmra.mxu0 %vm171_vm1, %v9688_v32  ;;  %v10293_v32 = vld [vmem:[#allocation2 + $0x181] sm:$0xff] }
  0xa7   : > { %8859 = vmatmul.mubr.msk.f32.vlgmr.msra.gmra.mxu1 %vm171_vm1, %v9980_v31  ;;  %8907 = vmatpush3.msk.msra.mxu0 %vm445_vm0, %v9969_v60  ;;  %v12706_v60 = vld [vmem:[#allocation5_spill] sm:$0xff]  ;;  %v12707_v31 = vld [vmem:[#allocation6_spill] sm:$0xff] }
  0xa8   : > { %8811 = vmatprep.mubr.msk.f32.mxu0 %vm171_vm1, %v9699_v34  ;;  %8861 = vmatprep.mubr.msk.f32.mxu1 %vm171_vm1, %v9984_v33 }
  0xa9   : > { %8957 = vmatpush3.msk.msra.mxu1 %vm445_vm0, %v9974_v15  ;;  %9006 = vmatprep.subr.msk.mxu0 %vm445_vm0, %v10177_v35 }
  0xaa   : > { %8812 = vmatmul.mubr.msk.f32.gmra.mxu0 %vm171_vm1, %v9711_v36 }
  0xab   : > { %8862 = vmatmul.mubr.msk.f32.gmra.mxu1 %vm171_vm1, %v9998_v8  ;;  %8814 = vmatprep.mubr.msk.f32.mxu0 %vm171_vm1, %v9715_v38 }
  0xac   : > { %8864 = vmatprep.mubr.msk.f32.mxu1 %vm171_vm1, %v10002_v16 }
  0xae   : > { %8815 = vmatmul.mubr.msk.f32.gmra.mxu0 %vm171_vm1, %v9727_v40 }
  0xaf   : > { %8865 = vmatmul.mubr.msk.f32.gmra.mxu1 %vm171_vm1, %v10010_v17  ;;  %8817 = vmatprep.mubr.msk.f32.mxu0 %vm171_vm1, %v9731_v42 }
  0xb0   : > { %8867 = vmatprep.mubr.msk.f32.mxu1 %vm171_vm1, %v10014_v37 }
  0xb2   : > { %8818 = vmatmul.mubr.msk.f32.gmra.mxu0 %vm171_vm1, %v9743_v44 }
  0xb3   : > { %8868 = vmatmul.mubr.msk.f32.gmra.mxu1 %vm171_vm1, %v10022_v41  ;;  %8820 = vmatprep.mubr.msk.f32.mxu0 %vm171_vm1, %v9747_v46 }
  0xb4   : > { %8870 = vmatprep.mubr.msk.f32.mxu1 %vm171_vm1, %v10026_v39 }
  0xb6   : > { %8821 = vmatmul.mubr.msk.f32.gmra.mxu0 %vm171_vm1, %v9751_v48 }
  0xb7   : > { %8871 = vmatmul.mubr.msk.f32.gmra.mxu1 %vm171_vm1, %v10034_v45  ;;  %8823 = vmatprep.mubr.msk.f32.mxu0 %vm171_vm1, %v9761_v52 }
  0xb8   : > { %8873 = vmatprep.mubr.msk.f32.mxu1 %vm171_vm1, %v10038_v43 }
  0xba   : > { %8824 = vmatmul.mubr.msk.f32.gmra.mxu0 %vm171_vm1, %v9795_v62 }
  0xbb   : > { %8874 = vmatmul.mubr.msk.f32.gmra.mxu1 %vm171_vm1, %v10046_v49  ;;  %8826 = vmatprep.mubr.msk.f32.mxu0 %vm171_vm1, %v9799_v0 }
  0xbc   : > { %8876 = vmatprep.mubr.msk.f32.mxu1 %vm171_vm1, %v10050_v47 }
  0xbe   : > { %8827 = vmatmul.mubr.msk.f32.gmra.mxu0 %vm171_vm1, %v9811_v2 }
  0xbf   : > { %8877 = vmatmul.mubr.msk.f32.gmra.mxu1 %vm171_vm1, %v10058_v63  ;;  %8829 = vmatprep.mubr.msk.f32.mxu0 %vm171_vm1, %v9815_v4 }
  0xc0   : > { %8879 = vmatprep.mubr.msk.f32.mxu1 %vm171_vm1, %v10062_v59 }
  0xc2   : > { %8830 = vmatmul.mubr.msk.f32.gmra.mxu0 %vm171_vm1, %v9827_v6 }
  0xc3   : > { %8880 = vmatmul.mubr.msk.f32.gmra.mxu1 %vm171_vm1, %v10070_v3  ;;  %8832 = vmatprep.mubr.msk.f32.mxu0 %vm171_vm1, %v9831_v9 }
  0xc4   : > { %8882 = vmatprep.mubr.msk.f32.mxu1 %vm171_vm1, %v10074_v1 }
  0xc6   : > { %8833 = vmatmul.mubr.msk.f32.gmra.mxu0 %vm171_vm1, %v9843_v11 }
  0xc7   : > { %8883 = vmatmul.mubr.msk.f32.gmra.mxu1 %vm171_vm1, %v10082_v7  ;;  %8835 = vmatprep.mubr.msk.f32.mxu0 %vm171_vm1, %v9847_v13 }
  0xc8   : > { %8885 = vmatprep.mubr.msk.f32.mxu1 %vm171_vm1, %v10086_v5 }
  0xca   : > { %8836 = vmatmul.mubr.msk.f32.gmra.mxu0 %vm171_vm1, %v9866_v18 }
  0xcb   : > { %8886 = vmatmul.mubr.msk.f32.gmra.mxu1 %vm171_vm1, %v10094_v12  ;;  %8838 = vmatprep.mubr.msk.f32.mxu0 %vm171_vm1, %v9872_v20  ;;  %v12703_v12 = vld [vmem:[#allocation30_spill] sm:$0xff] }
  0xcc   : > { %8888 = vmatprep.mubr.msk.f32.mxu1 %vm171_vm1, %v10098_v10  ;;  %v10295_v10 = vld [vmem:[#allocation2 + $0x182] sm:$0xff] }
  0xce   : > { %8839 = vmatmul.mubr.msk.f32.gmra.mxu0 %vm171_vm1, %v9886_v22 }
  0xcf   : > { %8889 = vmatmul.mubr.msk.f32.gmra.mxu1 %vm171_vm1, %v10106_v19  ;;  %8841 = vmatprep.mubr.msk.f32.mxu0 %vm171_vm1, %v9890_v24  ;;  %v10307_v19 = vld [vmem:[#allocation2 + $0x18a] sm:$0xff] }
  0xd0   : > { %8891 = vmatprep.mubr.msk.f32.mxu1 %vm171_vm1, %v10110_v14  ;;  %v10303_v14 = vld [vmem:[#allocation2 + $0x189] sm:$0xff] }
  0xd2   : > { %8842 = vmatmul.mubr.msk.f32.gmra.mxu0 %vm171_vm1, %v9902_v26 }
  0xd3   : > { %8892 = vmatmul.mubr.msk.f32.gmra.mxu1 %vm171_vm1, %v10118_v23  ;;  %8844 = vmatprep.mubr.msk.f32.mxu0 %vm171_vm1, %v9906_v28  ;;  %v12704_v23 = vld [vmem:[#allocation3_spill] sm:$0xff] }
  0xd4   : > { %8894 = vmatprep.mubr.msk.f32.mxu1 %vm171_vm1, %v10122_v21 }
  0xd6   : > { %8845 = vmatmul.mubr.msk.f32.gmra.mxu0 %vm171_vm1, %v9918_v50  ;;  %v8610_v21 = vpop.f32.mrf.mxu0 }
  0xd7   : > { %8895 = vmatmul.mubr.msk.f32.gmra.mxu1 %vm171_vm1, %v10130_v27  ;;  %8847 = vmatprep.mubr.msk.f32.mxu0 %vm171_vm1, %v9922_v53 }
  0xd8   : > { %8897 = vmatprep.mubr.msk.f32.mxu1 %vm171_vm1, %v10134_v25  ;;  %v8660_v25 = vpop.f32.mrf.mxu1 }
  0xd9   : > { %v10317_v27 = vadd.f32 %v8660_v25, %v8610_v21  ;;  %v12708_v21 = vld [vmem:[#allocation7_spill] sm:$0xff] }
  0xda   : > { %8848 = vmatmul.mubr.msk.f32.gmra.mxu0 %vm171_vm1, %v9934_v55 }
  0xdb   : > { %8898 = vmatmul.mubr.msk.f32.gmra.mxu1 %vm171_vm1, %v10142_v51  ;;  %8850 = vmatprep.mubr.msk.f32.mxu0 %vm171_vm1, %v12702_v30  ;;  %v12705_v51 = vld [vmem:[#allocation4_spill] sm:$0xff] }
  0xdc   : > { %8900 = vmatprep.mubr.msk.f32.mxu1 %vm171_vm1, %v10146_v29  ;;  %v515_v29 = vpop.f32.mrf.mxu0 }
  0xde   : > { %8851 = vmatmul.mubr.msk.f32.gmra.mxu0 %vm171_vm1, %v12703_v12 }
  0xdf   : > { %8901 = vmatmul.mubr.msk.f32.gmra.mxu1 %vm171_vm1, %v10156_v56  ;;  %8853 = vmatprep.mubr.msk.f32.mxu0 %vm171_vm1, %v10293_v32  ;;  %v839_v56 = vpop.f32.mrf.mxu1 }
  0xe0   : > { %8903 = vmatprep.mubr.msk.f32.mxu1 %vm171_vm1, %v10295_v10  ;;  %v10325_v57 = vadd.f32 %v839_v56, %v515_v29  ;;  %v12710_v56 = vld [vmem:[#allocation9_spill] sm:$0xff] }
  0xe2   : > { %8854 = vmatmul.mubr.msk.f32.gmra.mxu0 %vm171_vm1, %v10303_v14 }
  0xe3   : > { %8904 = vmatmul.mubr.msk.f32.gmra.mxu1 %vm171_vm1, %v10307_v19  ;;  %8908 = vmatprep.mubr.msk.f32.mxu0 %vm171_vm1, %v12704_v23 }
  0xe4   : > { %8958 = vmatprep.mubr.msk.f32.mxu1 %vm171_vm1, %v9699_v34 }
  0xe6   : > { %8909 = vmatmul.mubr.msk.f32.vlgmr.msra.gmra.mxu0 %vm171_vm1, %v12705_v51  ;;  %v12709_v51 = vld [vmem:[#allocation8_spill] sm:$0xff] }
  0xe7   : > { %8959 = vmatmul.mubr.msk.f32.vlgmr.msra.gmra.mxu1 %vm171_vm1, %v9711_v36  ;;  %9007 = vmatpush3.msk.msra.mxu0 %vm445_vm0, %v10177_v35 }
  0xe8   : > { %8911 = vmatprep.mubr.msk.f32.mxu0 %vm171_vm1, %v12706_v60  ;;  %8961 = vmatprep.mubr.msk.f32.mxu1 %vm171_vm1, %v9715_v38 }
  0xea   : > { %v8613_v34 = vpop.f32.mrf.mxu0  ;;  %8912 = vmatmul.mubr.msk.f32.gmra.mxu0 %vm171_vm1, %v12707_v31 }
  0xeb   : > { %v8663_v15 = vpop.f32.mrf.mxu1  ;;  %8962 = vmatmul.mubr.msk.f32.gmra.mxu1 %vm171_vm1, %v9727_v40  ;;  %8914 = vmatprep.mubr.msk.f32.mxu0 %vm171_vm1, %v12708_v21  ;;  %v12711_v21 = vld [vmem:[#allocation10_spill] sm:$0xff] }
  0xec   : > { %v10335_v36 = vadd.f32 %v8663_v15, %v8613_v34  ;;  %8964 = vmatprep.mubr.msk.f32.mxu1 %vm171_vm1, %v9731_v42  ;;  %v525_v35 = vpop.f32.mrf.mxu0 }
  0xed   : > { %v849_v23 = vpop.f32.mrf.mxu1 }
  0xee   : > { %v10341_v25 = vadd.f32 %v849_v23, %v525_v35  ;;  %v8616_v38 = vpop.f32.mrf.mxu0  ;;  %8915 = vmatmul.mubr.msk.f32.gmra.mxu0 %vm171_vm1, %v12709_v51  ;;  %v12712_v35 = vld [vmem:[#allocation11_spill] sm:$0xff] }
  0xef   : > { %v8666_v29 = vpop.f32.mrf.mxu1  ;;  %8965 = vmatmul.mubr.msk.f32.gmra.mxu1 %vm171_vm1, %v9743_v44  ;;  %8917 = vmatprep.mubr.msk.f32.mxu0 %vm171_vm1, %v12710_v56  ;;  %v12713_v56 = vld [vmem:[#allocation12_spill] sm:$0xff] }
  0xf0   : > { %v10347_v40 = vadd.f32 %v8666_v29, %v8616_v38  ;;  %8967 = vmatprep.mubr.msk.f32.mxu1 %vm171_vm1, %v9747_v46  ;;  %v535_v42 = vpop.f32.mrf.mxu0 }
  0xf1   : > { %v859_v60 = vpop.f32.mrf.mxu1 }
  0xf2   : > { %v10353_v34 = vadd.f32 %v859_v60, %v535_v42  ;;  %v8619_v15 = vpop.f32.mrf.mxu0  ;;  %8918 = vmatmul.mubr.msk.f32.gmra.mxu0 %vm171_vm1, %v12711_v21  ;;  %v12714_v42 = vld [vmem:[#allocation13_spill] sm:$0xff] }
  0xf3   : > { %v8669_v31 = vpop.f32.mrf.mxu1  ;;  %8968 = vmatmul.mubr.msk.f32.gmra.mxu1 %vm171_vm1, %v9751_v48  ;;  %8920 = vmatprep.mubr.msk.f32.mxu0 %vm171_vm1, %v12712_v35  ;;  %v12715_v35 = vld [vmem:[#allocation14_spill] sm:$0xff] }
  0xf4   : > { %v10359_v44 = vadd.f32 %v8669_v31, %v8619_v15  ;;  %8970 = vmatprep.mubr.msk.f32.mxu1 %vm171_vm1, %v9761_v52  ;;  %v545_v46 = vpop.f32.mrf.mxu0 }
  0xf5   : > { %v869_v23 = vpop.f32.mrf.mxu1 }
  0xf6   : > { %v10365_v38 = vadd.f32 %v869_v23, %v545_v46  ;;  %v8622_v29 = vpop.f32.mrf.mxu0  ;;  %8921 = vmatmul.mubr.msk.f32.gmra.mxu0 %vm171_vm1, %v12713_v56  ;;  %v12716_v46 = vld [vmem:[#allocation15_spill] sm:$0xff] }
  0xf7   : > { %v8672_v51 = vpop.f32.mrf.mxu1  ;;  %8971 = vmatmul.mubr.msk.f32.gmra.mxu1 %vm171_vm1, %v9795_v62  ;;  %8923 = vmatprep.mubr.msk.f32.mxu0 %vm171_vm1, %v12714_v42  ;;  %v12717_v42 = vld [vmem:[#allocation16_spill] sm:$0xff] }
  0xf8   : > { %v10371_v48 = vadd.f32 %v8672_v51, %v8622_v29  ;;  %8973 = vmatprep.mubr.msk.f32.mxu1 %vm171_vm1, %v9799_v0  ;;  %v555_v52 = vpop.f32.mrf.mxu0 }
  0xf9   : > { %v879_v60 = vpop.f32.mrf.mxu1 }
  0xfa   : > { %v10377_v15 = vadd.f32 %v879_v60, %v555_v52  ;;  %v8625_v31 = vpop.f32.mrf.mxu0  ;;  %8924 = vmatmul.mubr.msk.f32.gmra.mxu0 %vm171_vm1, %v12715_v35  ;;  %v12718_v52 = vld [vmem:[#allocation17_spill] sm:$0xff] }
  0xfb   : > { %v8675_v21 = vpop.f32.mrf.mxu1  ;;  %8974 = vmatmul.mubr.msk.f32.gmra.mxu1 %vm171_vm1, %v9811_v2  ;;  %8926 = vmatprep.mubr.msk.f32.mxu0 %vm171_vm1, %v12716_v46  ;;  %v12719_v46 = vld [vmem:[#allocation18_spill] sm:$0xff] }
  0xfc   : > { %v10383_v62 = vadd.f32 %v8675_v21, %v8625_v31  ;;  %8976 = vmatprep.mubr.msk.f32.mxu1 %vm171_vm1, %v9815_v4  ;;  %v565_v0 = vpop.f32.mrf.mxu0 }
  0xfd   : > { %v889_v23 = vpop.f32.mrf.mxu1 }
  0xfe   : > { %v10389_v29 = vadd.f32 %v889_v23, %v565_v0  ;;  %v8628_v51 = vpop.f32.mrf.mxu0  ;;  %8927 = vmatmul.mubr.msk.f32.gmra.mxu0 %vm171_vm1, %v12717_v42  ;;  %v12720_v0 = vld [vmem:[#allocation19_spill] sm:$0xff] }
  0xff   : > { %v8678_v56 = vpop.f32.mrf.mxu1  ;;  %8977 = vmatmul.mubr.msk.f32.gmra.mxu1 %vm171_vm1, %v9827_v6  ;;  %8929 = vmatprep.mubr.msk.f32.mxu0 %vm171_vm1, %v12718_v52  ;;  %v12721_v52 = vld [vmem:[#allocation20_spill] sm:$0xff] }
 0x100   : > { %v10395_v2 = vadd.f32 %v8678_v56, %v8628_v51  ;;  %8979 = vmatprep.mubr.msk.f32.mxu1 %vm171_vm1, %v9831_v9  ;;  %v575_v4 = vpop.f32.mrf.mxu0 }
 0x101   : > { %v899_v60 = vpop.f32.mrf.mxu1 }
 0x102   : > { %v10401_v31 = vadd.f32 %v899_v60, %v575_v4  ;;  %v8631_v21 = vpop.f32.mrf.mxu0  ;;  %8930 = vmatmul.mubr.msk.f32.gmra.mxu0 %vm171_vm1, %v12719_v46  ;;  %v12722_v4 = vld [vmem:[#allocation21_spill] sm:$0xff]  ;;  %v12723_v46 = vld [vmem:[#allocation22_spill] sm:$0xff] }
 0x103   : > { %v8681_v35 = vpop.f32.mrf.mxu1  ;;  %8980 = vmatmul.mubr.msk.f32.gmra.mxu1 %vm171_vm1, %v9843_v11  ;;  %8932 = vmatprep.mubr.msk.f32.mxu0 %vm171_vm1, %v12720_v0  ;;  %v12724_v0 = vld [vmem:[#allocation23_spill] sm:$0xff] }
 0x104   : > { %v10407_v6 = vadd.f32 %v8681_v35, %v8631_v21  ;;  %8982 = vmatprep.mubr.msk.f32.mxu1 %vm171_vm1, %v9847_v13  ;;  %v585_v9 = vpop.f32.mrf.mxu0 }
 0x105   : > { %v909_v23 = vpop.f32.mrf.mxu1 }
 0x106   : > { %v10413_v51 = vadd.f32 %v909_v23, %v585_v9  ;;  %v8634_v56 = vpop.f32.mrf.mxu0  ;;  %8933 = vmatmul.mubr.msk.f32.gmra.mxu0 %vm171_vm1, %v12721_v52  ;;  %v12728_v52 = vld [vmem:[#allocation25_spill] sm:$0xff] }
 0x107   : > { %v8684_v42 = vpop.f32.mrf.mxu1  ;;  %8983 = vmatmul.mubr.msk.f32.gmra.mxu1 %vm171_vm1, %v9866_v18  ;;  %8935 = vmatprep.mubr.msk.f32.mxu0 %vm171_vm1, %v12722_v4 }
 0x108   : > { %v10419_v11 = vadd.f32 %v8684_v42, %v8634_v56  ;;  %8985 = vmatprep.mubr.msk.f32.mxu1 %vm171_vm1, %v9872_v20  ;;  %v10425_v13 = vpop.f32.mrf.mxu0  ;;  %v12727_v42 = vld [vmem:[#allocation24_spill] sm:$0xff] }
 0x109   : > { %v10427_v60 = vpop.f32.mrf.mxu1 }
 0x10a   : > { %v8637_v21 = vpop.f32.mrf.mxu0  ;;  %8936 = vmatmul.mubr.msk.f32.gmra.mxu0 %vm171_vm1, %v12723_v46  ;;  %v12731_v46 = vld [vmem:[#allocation26_spill] sm:$0xff] }
 0x10b   : > { %v8687_v35 = vpop.f32.mrf.mxu1  ;;  %8986 = vmatmul.mubr.msk.f32.gmra.mxu1 %vm171_vm1, %v9886_v22  ;;  %8938 = vmatprep.mubr.msk.f32.mxu0 %vm171_vm1, %v12724_v0  ;;  %v12732_v0 = vld [vmem:[#allocation27_spill] sm:$0xff] }
 0x10c   : > { %v10433_v18 = vadd.f32 %v8687_v35, %v8637_v21  ;;  %8988 = vmatprep.mubr.msk.f32.mxu1 %vm171_vm1, %v9890_v24  ;;  %v10439_v20 = vpop.f32.mrf.mxu0 }
 0x10d   : > { %12725 = vst [vmem:[#allocation29_spill] sm:$0xff] %v10439_v20  ;;  %v10441_v9 = vpop.f32.mrf.mxu1 }
 0x10e   : > { %12726 = vst [vmem:[#allocation30_spill] sm:$0xff] %v10441_v9  ;;  %v8640_v23 = vpop.f32.mrf.mxu0  ;;  %8939 = vmatmul.mubr.msk.f32.gmra.mxu0 %vm171_vm1, %v12727_v42 }
 0x10f   : > { %v8690_v56 = vpop.f32.mrf.mxu1  ;;  %8989 = vmatmul.mubr.msk.f32.gmra.mxu1 %vm171_vm1, %v9902_v26  ;;  %8941 = vmatprep.mubr.msk.f32.mxu0 %vm171_vm1, %v12728_v52  ;;  %v12735_v52 = vld [vmem:[#allocation28_spill] sm:$0xff] }
 0x110   : > { %v10447_v22 = vadd.f32 %v8690_v56, %v8640_v23  ;;  %8991 = vmatprep.mubr.msk.f32.mxu1 %vm171_vm1, %v9906_v28  ;;  %v10453_v24 = vpop.f32.mrf.mxu0 }
 0x111   : > { %12729 = vst [vmem:[#allocation3_spill] sm:$0xff] %v10453_v24  ;;  %v10455_v4 = vpop.f32.mrf.mxu1 }
 0x112   : > { %12730 = vst [vmem:[#allocation4_spill] sm:$0xff] %v10455_v4  ;;  %v8643_v21 = vpop.f32.mrf.mxu0  ;;  %8942 = vmatmul.mubr.msk.f32.gmra.mxu0 %vm171_vm1, %v12731_v46 }
 0x113   : > { %v8693_v35 = vpop.f32.mrf.mxu1  ;;  %8992 = vmatmul.mubr.msk.f32.gmra.mxu1 %vm171_vm1, %v9918_v50  ;;  %8944 = vmatprep.mubr.msk.f32.mxu0 %vm171_vm1, %v12732_v0  ;;  %v12738_v0 = vld [vmem:[#allocation31_spill] sm:$0xff] }
 0x114   : > { %v10461_v26 = vadd.f32 %v8693_v35, %v8643_v21  ;;  %8994 = vmatprep.mubr.msk.f32.mxu1 %vm171_vm1, %v9922_v53  ;;  %v10467_v28 = vpop.f32.mrf.mxu0 }
 0x115   : > { %12733 = vst [vmem:[#allocation5_spill] sm:$0xff] %v10467_v28  ;;  %v10469_v23 = vpop.f32.mrf.mxu1 }
 0x116   : > { %12734 = vst [vmem:[#allocation6_spill] sm:$0xff] %v10469_v23  ;;  %v8646_v56 = vpop.f32.mrf.mxu0  ;;  %8945 = vmatmul.mubr.msk.f32.gmra.mxu0 %vm171_vm1, %v12735_v52 }
 0x117   : > { %v8696_v42 = vpop.f32.mrf.mxu1  ;;  %8995 = vmatmul.mubr.msk.f32.gmra.mxu1 %vm171_vm1, %v9934_v55  ;;  %8947 = vmatprep.mubr.msk.f32.mxu0 %vm171_vm1, %v9940_v58 }
 0x118   : > { %v10475_v50 = vadd.f32 %v8696_v42, %v8646_v56  ;;  %8997 = vmatprep.mubr.msk.f32.mxu1 %vm171_vm1, %v12702_v30  ;;  %v10481_v53 = vpop.f32.mrf.mxu0  ;;  %v2589_v56 = vld [vmem:[#allocation2 + $0x198] sm:$0xff] }
 0x119   : > { %12736 = vst [vmem:[#allocation7_spill] sm:$0xff] %v10481_v53  ;;  %v10483_v21 = vpop.f32.mrf.mxu1  ;;  %v2979_v42 = vld [vmem:[#allocation2 + $0x199] sm:$0xff] }
 0x11a   : > { %12737 = vst [vmem:[#allocation8_spill] sm:$0xff] %v10483_v21  ;;  %v8649_v35 = vpop.f32.mrf.mxu0  ;;  %8948 = vmatmul.mubr.msk.f32.gmra.mxu0 %vm171_vm1, %v9952_v61 }
 0x11b   : > { %v8699_v46 = vpop.f32.mrf.mxu1  ;;  %8998 = vmatmul.mubr.msk.f32.gmra.mxu1 %vm171_vm1, %v12703_v12  ;;  %8950 = vmatprep.mubr.msk.f32.mxu0 %vm171_vm1, %v12738_v0  ;;  %v2590_v12 = vld [vmem:[#allocation2 + $0x1a0] sm:$0xff] }
 0x11c   : > { %v10489_v55 = vadd.f32 %v8699_v46, %v8649_v35  ;;  %9000 = vmatprep.mubr.msk.f32.mxu1 %vm171_vm1, %v10293_v32  ;;  %v10495_v58 = vpop.f32.mrf.mxu0  ;;  %v2980_v32 = vld [vmem:[#allocation2 + $0x1a1] sm:$0xff] }
 0x11d   : > { %12739 = vst [vmem:[#allocation9_spill] sm:$0xff] %v10495_v58  ;;  %v10497_v30 = vpop.f32.mrf.mxu1 }
 0x11e   : > { %12740 = vst [vmem:[#allocation10_spill] sm:$0xff] %v10497_v30  ;;  %v8652_v52 = vpop.f32.mrf.mxu0  ;;  %8951 = vmatmul.mubr.msk.f32.gmra.mxu0 %vm171_vm1, %v10160_v54 }
 0x11f   : > { %v8702_v21 = vpop.f32.mrf.mxu1  ;;  %9001 = vmatmul.mubr.msk.f32.gmra.mxu1 %vm171_vm1, %v10303_v14  ;;  %8953 = vmatprep.mubr.msk.f32.mxu0 %vm171_vm1, %v2589_v56 }
 0x120   : > { %v10503_v61 = vadd.f32 %v8702_v21, %v8652_v52  ;;  %9003 = vmatprep.mubr.msk.f32.mxu1 %vm171_vm1, %v2979_v42  ;;  %v10507_v35 = vpop.f32.mrf.mxu0 }
 0x121   : > { %12741 = vst [vmem:[#allocation11_spill] sm:$0xff] %v10507_v35  ;;  %v10509_v46 = vpop.f32.mrf.mxu1 }
 0x122   : > { %12742 = vst [vmem:[#allocation12_spill] sm:$0xff] %v10509_v46  ;;  %v8655_v0 = vpop.f32.mrf.mxu0  ;;  %8954 = vmatmul.mubr.msk.f32.gmra.mxu0 %vm171_vm1, %v2590_v12 }
 0x123   : > { %v8705_v30 = vpop.f32.mrf.mxu1  ;;  %9004 = vmatmul.mubr.msk.f32.gmra.mxu1 %vm171_vm1, %v2980_v32  ;;  %9008 = vmatprep.mubr.msk.f32.mxu0 %vm171_vm1, %v9984_v33 }
 0x124   : > { %v10513_v54 = vadd.f32 %v8705_v30, %v8655_v0  ;;  %v10517_v14 = vpop.f32.mrf.mxu0 }
 0x125   : > { %12743 = vst [vmem:[#allocation13_spill] sm:$0xff] %v10517_v14  ;;  %v10519_v21 = vpop.f32.mrf.mxu1 }
 0x126   : > { %12744 = vst [vmem:[#allocation14_spill] sm:$0xff] %v10519_v21  ;;  %v8710_v56 = vpop.f32.mrf.mxu0  ;;  %9009 = vmatmul.mubr.msk.f32.vlgmr.msra.gmra.mxu0 %vm171_vm1, %v9998_v8 }
 0x127   : > { %v8760_v42 = vpop.f32.mrf.mxu1  ;;  %v1357_v52 = vadd.f32 %v8710_v56, %v10317_v27  ;;  %9011 = vmatprep.mubr.msk.f32.mxu0 %vm171_vm1, %v10002_v16 }
 0x128   : > { %v1197_v12 = vpop.f32.mrf.mxu0 }
 0x129   : > { %v10526_v30 = vpop.f32.mrf.mxu1  ;;  %v10529_v32 = vadd.f32 %v1197_v12, %v10325_v57  ;;  %v10531_v33 = vadd.f32 %v8760_v42, %v1357_v52 }
 0x12a   : > { %v8713_v0 = vpop.f32.mrf.mxu0  ;;  %9012 = vmatmul.mubr.msk.f32.gmra.mxu0 %vm171_vm1, %v10010_v17 }
 0x12b   : > { %v8763_v21 = vpop.f32.mrf.mxu1  ;;  %v1359_v8 = vadd.f32 %v8713_v0, %v10335_v36  ;;  %9014 = vmatprep.mubr.msk.f32.mxu0 %vm171_vm1, %v10014_v37 }
 0x12c   : > { %v1207_v27 = vpop.f32.mrf.mxu0 }
 0x12d   : > { %v10538_v16 = vpop.f32.mrf.mxu1  ;;  %v10541_v56 = vadd.f32 %v1207_v27, %v10341_v25  ;;  %v10543_v57 = vadd.f32 %v8763_v21, %v1359_v8  ;;  %v7703_v21 = vld [vmem:[%s12604_s2 + $0x4] sm:$0xf] }
 0x12e   : > { %v8716_v42 = vpop.f32.mrf.mxu0  ;;  %9015 = vmatmul.mubr.msk.f32.gmra.mxu0 %vm171_vm1, %v10022_v41  ;;  %9056 = vmatprep.subr.msk.mxu1 %vm445_vm0, %v7703_v21 }
 0x12f   : > { %v8766_v52 = vpop.f32.mrf.mxu1  ;;  %v1361_v17 = vadd.f32 %v8716_v42, %v10347_v40  ;;  %9017 = vmatprep.mubr.msk.f32.mxu0 %vm171_vm1, %v10026_v39  ;;  %9057 = vmatpush3.msk.msra.mxu1 %vm445_vm0, %v7703_v21 }
 0x130   : > { %v1217_v36 = vpop.f32.mrf.mxu0 }
 0x131   : > { %v10550_v37 = vpop.f32.mrf.mxu1  ;;  %v10553_v12 = vadd.f32 %v1217_v36, %v10353_v34  ;;  %v10555_v25 = vadd.f32 %v8766_v52, %v1361_v17 }
 0x132   : > { %v8719_v0 = vpop.f32.mrf.mxu0  ;;  %9018 = vmatmul.mubr.msk.f32.gmra.mxu0 %vm171_vm1, %v10034_v45 }
 0x133   : > { %v8769_v41 = vpop.f32.mrf.mxu1  ;;  %v1363_v39 = vadd.f32 %v8719_v0, %v10359_v44  ;;  %9020 = vmatprep.mubr.msk.f32.mxu0 %vm171_vm1, %v10038_v43 }
 0x134   : > { %v1227_v40 = vpop.f32.mrf.mxu0 }
 0x135   : > { %v10567_v34 = vpop.f32.mrf.mxu1  ;;  %v10570_v8 = vadd.f32 %v1227_v40, %v10365_v38  ;;  %v10572_v27 = vadd.f32 %v8769_v41, %v1363_v39 }
 0x136   : > { %v8722_v42 = vpop.f32.mrf.mxu0  ;;  %9021 = vmatmul.mubr.msk.f32.gmra.mxu0 %vm171_vm1, %v10046_v49 }
 0x137   : > { %v8772_v45 = vpop.f32.mrf.mxu1  ;;  %v1365_v44 = vadd.f32 %v8722_v42, %v10371_v48  ;;  %9023 = vmatprep.mubr.msk.f32.mxu0 %vm171_vm1, %v10050_v47 }
 0x138   : > { %v1237_v43 = vpop.f32.mrf.mxu0 }
 0x139   : > { %v10579_v52 = vpop.f32.mrf.mxu1  ;;  %v10582_v17 = vadd.f32 %v1237_v43, %v10377_v15  ;;  %v10584_v38 = vadd.f32 %v8772_v45, %v1365_v44  ;;  %v3357_v43 = vld [vmem:[#allocation2 + $0x10a] sm:$0xff] }
 0x13a   : > { %v8725_v36 = vpop.f32.mrf.mxu0  ;;  %9024 = vmatmul.mubr.msk.f32.gmra.mxu0 %vm171_vm1, %v10058_v63 }
 0x13b   : > { %v8775_v21 = vpop.f32.mrf.mxu1  ;;  %v1367_v49 = vadd.f32 %v8725_v36, %v10383_v62  ;;  %9026 = vmatprep.mubr.msk.f32.mxu0 %vm171_vm1, %v10062_v59 }
 0x13c   : > { %v1247_v48 = vpop.f32.mrf.mxu0 }
 0x13d   : > { %v10591_v47 = vpop.f32.mrf.mxu1  ;;  %v10594_v0 = vadd.f32 %v1247_v48, %v10389_v29  ;;  %v10596_v15 = vadd.f32 %v8775_v21, %v1367_v49 }
 0x13e   : > { %v8728_v41 = vpop.f32.mrf.mxu0  ;;  %9027 = vmatmul.mubr.msk.f32.gmra.mxu0 %vm171_vm1, %v10070_v3 }
 0x13f   : > { %v8778_v39 = vpop.f32.mrf.mxu1  ;;  %v1369_v63 = vadd.f32 %v8728_v41, %v10395_v2  ;;  %9029 = vmatprep.mubr.msk.f32.mxu0 %vm171_vm1, %v10074_v1  ;;  %v3356_v2 = vld [vmem:[#allocation2 + $0xfa] sm:$0xff] }
 0x140   : > { %v1257_v62 = vpop.f32.mrf.mxu0 }
 0x141   : > { %v10603_v59 = vpop.f32.mrf.mxu1  ;;  %v10606_v40 = vadd.f32 %v1257_v62, %v10401_v31  ;;  %v10608_v29 = vadd.f32 %v8778_v39, %v1369_v63  ;;  %v3359_v39 = vld [vmem:[#allocation2 + $0x122] sm:$0xff] }
 0x142   : > { %v8731_v42 = vpop.f32.mrf.mxu0  ;;  %9030 = vmatmul.mubr.msk.f32.gmra.mxu0 %vm171_vm1, %v10082_v7 }
 0x143   : > { %v8781_v45 = vpop.f32.mrf.mxu1  ;;  %v1371_v3 = vadd.f32 %v8731_v42, %v10407_v6  ;;  %9032 = vmatprep.mubr.msk.f32.mxu0 %vm171_vm1, %v10086_v5  ;;  %v920_v6 = vadd.f32 %v10427_v60, %v10425_v13  ;;  %v3358_v5 = vld [vmem:[#allocation2 + $0x112] sm:$0xff] }
 0x144   : > { %v1267_v1 = vpop.f32.mrf.mxu0 }
 0x145   : > { %v10615_v44 = vpop.f32.mrf.mxu1  ;;  %v10618_v31 = vadd.f32 %v1267_v1, %v10413_v51  ;;  %v10620_v36 = vadd.f32 %v8781_v45, %v1371_v3  ;;  %v3361_v3 = vld [vmem:[#allocation2 + $0x13a] sm:$0xff] }
 0x146   : > { %12745 = vst [vmem:[#allocation15_spill] sm:$0xff] %v10615_v44  ;;  %v8734_v21 = vpop.f32.mrf.mxu0  ;;  %9033 = vmatmul.mubr.msk.f32.gmra.mxu0 %vm171_vm1, %v3356_v2 }
 0x147   : > { %12746 = vst [vmem:[#allocation16_spill] sm:$0xff] %v10618_v31  ;;  %v8784_v7 = vpop.f32.mrf.mxu1  ;;  %v1373_v49 = vadd.f32 %v8734_v21, %v10419_v11  ;;  %9035 = vmatprep.mubr.msk.f32.mxu0 %vm171_vm1, %v3357_v43  ;;  %v3360_v11 = vld [vmem:[#allocation2 + $0x12a] sm:$0xff] }
 0x148   : > { %v1277_v48 = vpop.f32.mrf.mxu0 }
 0x149   : > { %v10627_v41 = vpop.f32.mrf.mxu1  ;;  %v10629_v51 = vadd.f32 %v1277_v48, %v920_v6  ;;  %v10631_v63 = vadd.f32 %v8784_v7, %v1373_v49  ;;  %v3362_v7 = vld [vmem:[#allocation2 + $0x142] sm:$0xff]  ;;  %v3363_v49 = vld [vmem:[#allocation2 + $0x152] sm:$0xff] }
 0x14a   : > { %12747 = vst [vmem:[#allocation17_spill] sm:$0xff] %v10627_v41  ;;  %v8737_v62 = vpop.f32.mrf.mxu0  ;;  %9036 = vmatmul.mubr.msk.f32.gmra.mxu0 %vm171_vm1, %v3358_v5 }
 0x14b   : > { %12748 = vst [vmem:[#allocation18_spill] sm:$0xff] %v10629_v51  ;;  %v8787_v42 = vpop.f32.mrf.mxu1  ;;  %v1375_v45 = vadd.f32 %v8737_v62, %v10433_v18  ;;  %9038 = vmatprep.mubr.msk.f32.mxu0 %vm171_vm1, %v3359_v39 }
 0x14c   : > { %v10636_v13 = vpop.f32.mrf.mxu0 }
 0x14d   : > { %12749 = vst [vmem:[#allocation19_spill] sm:$0xff] %v10636_v13  ;;  %v10638_v60 = vpop.f32.mrf.mxu1  ;;  %v10640_v2 = vadd.f32 %v8787_v42, %v1375_v45  ;;  %v3364_v42 = vld [vmem:[#allocation2 + $0x15a] sm:$0xff] }
 0x14e   : > { %12750 = vst [vmem:[#allocation20_spill] sm:$0xff] %v10638_v60  ;;  %v8740_v1 = vpop.f32.mrf.mxu0  ;;  %9039 = vmatmul.mubr.msk.f32.gmra.mxu0 %vm171_vm1, %v3360_v11  ;;  %v3365_v11 = vld [vmem:[#allocation2 + $0x16a] sm:$0xff] }
 0x14f   : > { %v8790_v43 = vpop.f32.mrf.mxu1  ;;  %v1377_v21 = vadd.f32 %v8740_v1, %v10447_v22  ;;  %9041 = vmatprep.mubr.msk.f32.mxu0 %vm171_vm1, %v3361_v3 }
 0x150   : > { %v10645_v18 = vpop.f32.mrf.mxu0 }
 0x151   : > { %12751 = vst [vmem:[#allocation21_spill] sm:$0xff] %v10645_v18  ;;  %v10647_v6 = vpop.f32.mrf.mxu1  ;;  %v10649_v5 = vadd.f32 %v8790_v43, %v1377_v21 }
 0x152   : > { %12752 = vst [vmem:[#allocation22_spill] sm:$0xff] %v10647_v6  ;;  %v8743_v48 = vpop.f32.mrf.mxu0  ;;  %9042 = vmatmul.mubr.msk.f32.gmra.mxu0 %vm171_vm1, %v3362_v7  ;;  %v3366_v7 = vld [vmem:[#allocation2 + $0x172] sm:$0xff] }
 0x153   : > { %v8793_v39 = vpop.f32.mrf.mxu1  ;;  %v1379_v62 = vadd.f32 %v8743_v48, %v10461_v26  ;;  %9044 = vmatprep.mubr.msk.f32.mxu0 %vm171_vm1, %v3363_v49 }
 0x154   : > { %v10654_v22 = vpop.f32.mrf.mxu0 }
 0x155   : > { %12753 = vst [vmem:[#allocation23_spill] sm:$0xff] %v10654_v22  ;;  %v10656_v45 = vpop.f32.mrf.mxu1  ;;  %v10658_v3 = vadd.f32 %v8793_v39, %v1379_v62 }
 0x156   : > { %12754 = vst [vmem:[#allocation24_spill] sm:$0xff] %v10656_v45  ;;  %v8746_v1 = vpop.f32.mrf.mxu0  ;;  %9045 = vmatmul.mubr.msk.f32.gmra.mxu0 %vm171_vm1, %v3364_v42 }
 0x157   : > { %v8796_v43 = vpop.f32.mrf.mxu1  ;;  %v1381_v21 = vadd.f32 %v8746_v1, %v10475_v50  ;;  %9047 = vmatprep.mubr.msk.f32.mxu0 %vm171_vm1, %v3365_v11  ;;  %v3369_v11 = vld [vmem:[#allocation2 + $0x19a] sm:$0xff] }
 0x158   : > { %v10663_v26 = vpop.f32.mrf.mxu0 }
 0x159   : > { %12755 = vst [vmem:[#allocation25_spill] sm:$0xff] %v10663_v26  ;;  %v10665_v49 = vpop.f32.mrf.mxu1  ;;  %v10667_v48 = vadd.f32 %v8796_v43, %v1381_v21 }
 0x15a   : > { %12756 = vst [vmem:[#allocation26_spill] sm:$0xff] %v10665_v49  ;;  %v8749_v14 = vpop.f32.mrf.mxu0  ;;  %9048 = vmatmul.mubr.msk.f32.gmra.mxu0 %vm171_vm1, %v3366_v7 }
 0x15b   : > { %v8799_v39 = vpop.f32.mrf.mxu1  ;;  %v1383_v62 = vadd.f32 %v8749_v14, %v10489_v55  ;;  %9050 = vmatprep.mubr.msk.f32.mxu0 %vm171_vm1, %v10295_v10  ;;  %v3370_v55 = vld [vmem:[#allocation2 + $0x1a2] sm:$0xff] }
 0x15c   : > { %v10673_v42 = vpop.f32.mrf.mxu0 }
 0x15d   : > { %12757 = vst [vmem:[#allocation27_spill] sm:$0xff] %v10673_v42  ;;  %v10675_v50 = vpop.f32.mrf.mxu1  ;;  %v10677_v1 = vadd.f32 %v8799_v39, %v1383_v62 }
 0x15e   : > { %12758 = vst [vmem:[#allocation28_spill] sm:$0xff] %v10675_v50  ;;  %v8752_v46 = vpop.f32.mrf.mxu0  ;;  %9051 = vmatmul.mubr.msk.f32.gmra.mxu0 %vm171_vm1, %v10307_v19 }
 0x15f   : > { %v8802_v43 = vpop.f32.mrf.mxu1  ;;  %v1385_v21 = vadd.f32 %v8752_v46, %v10503_v61  ;;  %9053 = vmatprep.mubr.msk.f32.mxu0 %vm171_vm1, %v3369_v11 }
 0x160   : > { %v10683_v14 = vpop.f32.mrf.mxu0 }
 0x161   : > { %12759 = vst [vmem:[#allocation31_spill] sm:$0xff] %v10683_v14  ;;  %v10685_v10 = vpop.f32.mrf.mxu1  ;;  %v10687_v7 = vadd.f32 %v8802_v43, %v1385_v21 }
 0x162   : > { %12760 = vst [vmem:[#allocation32_spill] sm:$0xff] %v10685_v10  ;;  %v8755_v50 = vpop.f32.mrf.mxu0  ;;  %9054 = vmatmul.mubr.msk.f32.gmra.mxu0 %vm171_vm1, %v3370_v55 }
 0x163   : > { %v8805_v39 = vpop.f32.mrf.mxu1  ;;  %v1387_v62 = vadd.f32 %v8755_v50, %v10513_v54 }
 0x164   : > { %v10691_v35 = vpop.f32.mrf.mxu0 }
 0x165   : > { %12761 = vst [vmem:[#allocation33_spill] sm:$0xff] %v10691_v35  ;;  %v10693_v19 = vpop.f32.mrf.mxu1  ;;  %v10695_v61 = vadd.f32 %v8805_v39, %v1387_v62  ;;  %v3825_v62 = vld [vmem:[%s12604_s2] sm:$0xf] }
 0x166   : > { %12762 = vst [vmem:[#allocation34_spill] sm:$0xff] %v10693_v19  ;;  %v8810_v46 = vpop.f32.mrf.mxu0  ;;  %9106 = vmatprep.subr.msk.mxu0 %vm445_vm0, %v3825_v62  ;;  %v3826_v19 = vld [vmem:[#allocation2 + $0x1] sm:$0xff] }
 0x167   : > { %v10697_v11 = vpop.f32.mrf.mxu1  ;;  %v10700_v14 = vadd.f32 %v8810_v46, %v10531_v33  ;;  %v3793_v35 = vld [vmem:[#allocation2] sm:$0xff]  ;;  %9058 = vmatprep.mubr.msk.f32.mxu1 %vm171_vm1, %v3826_v19  ;;  %9107 = vmatpush3.msk.msra.mxu0 %vm445_vm0, %v3825_v62 }
 0x168   : > { %v10702_v43 = vpop.f32.mrf.mxu0  ;;  %9108 = vmatprep.mubr.msk.f32.mxu0 %vm171_vm1, %v3793_v35 }
 0x169   : > { %v10704_v21 = vpop.f32.mrf.mxu1 }
 0x16a   : > { %v8813_v55 = vpop.f32.mrf.mxu0 }
 0x16b   : > { %v10706_v10 = vpop.f32.mrf.mxu1  ;;  %v10709_v54 = vadd.f32 %v8813_v55, %v10543_v57  ;;  %v3827_v57 = vld [vmem:[#allocation2 + $0x9] sm:$0xff] }
 0x16c   : > { %v10711_v50 = vpop.f32.mrf.mxu0  ;;  %v3794_v55 = vld [vmem:[#allocation2 + $0x8] sm:$0xff]  ;;  %9059 = vmatmul.mubr.msk.f32.vlgmr.msra.gmra.mxu1 %vm171_vm1, %v3827_v57 }
 0x16d   : > { %v10713_v39 = vpop.f32.mrf.mxu1  ;;  %9109 = vmatmul.mubr.msk.f32.vlgmr.msra.gmra.mxu0 %vm171_vm1, %v3794_v55 }
 0x16e   : > { %v8816_v33 = vpop.f32.mrf.mxu0 }
 0x16f   : > { %v10718_v46 = vpop.f32.mrf.mxu1  ;;  %v10722_v42 = vadd.f32 %v8816_v33, %v10555_v25  ;;  %v7770_v33 = vld [vmem:[%s12604_s2 + $0x8] sm:$0xf] }
 0x170   : > { %v10726_v49 = vpop.f32.mrf.mxu0  ;;  %9156 = vmatprep.subr.msk.mxu1 %vm445_vm0, %v7770_v33 }
 0x171   : > { %v10728_v58 = vpop.f32.mrf.mxu1  ;;  %9157 = vmatpush3.msk.msra.mxu1 %vm445_vm0, %v7770_v33 }
 0x172   : > { %v8819_v26 = vpop.f32.mrf.mxu0 }
 0x173   : > { %v10733_v45 = vpop.f32.mrf.mxu1  ;;  %v10736_v25 = vadd.f32 %v8819_v26, %v10572_v27 }
 0x174   : > { %v10738_v19 = vpop.f32.mrf.mxu0 }
 0x175   : > { %v10740_v62 = vpop.f32.mrf.mxu1 }
 0x176   : > { %v8822_v53 = vpop.f32.mrf.mxu0 }
 0x177   : > { %v10745_v35 = vpop.f32.mrf.mxu1  ;;  %v10749_v57 = vadd.f32 %v8822_v53, %v10584_v38 }
 0x178   : > { %v10752_v27 = vpop.f32.mrf.mxu0 }
 0x179   : > { %v10754_v26 = vpop.f32.mrf.mxu1 }
 0x17a   : > { %v8825_v55 = vpop.f32.mrf.mxu0 }
 0x17b   : > { %v10756_v22 = vpop.f32.mrf.mxu1  ;;  %v10759_v6 = vadd.f32 %v8825_v55, %v10596_v15 }
 0x17c   : > { %v10761_v23 = vpop.f32.mrf.mxu0 }
 0x17d   : > { %v10763_v28 = vpop.f32.mrf.mxu1 }
 0x17e   : > { %12763 = vst [vmem:[#allocation35_spill] sm:$0xff] %v10763_v28  ;;  %v8828_v18 = vpop.f32.mrf.mxu0 }
 0x17f   : > { %v10765_v60 = vpop.f32.mrf.mxu1  ;;  %v10768_v53 = vadd.f32 %v8828_v18, %v10608_v29 }
 0x180   : > { %12764 = vst [vmem:[#allocation36_spill] sm:$0xff] %v10765_v60  ;;  %v10770_v38 = vpop.f32.mrf.mxu0 }
 0x181   : > { %12765 = vst [vmem:[#allocation37_spill] sm:$0xff] %v10768_v53  ;;  %12766 = vst [vmem:[#allocation38_spill] sm:$0xff] %v10770_v38  ;;  %v10772_v33 = vpop.f32.mrf.mxu1 }
 0x182   : > { %12767 = vst [vmem:[#allocation39_spill] sm:$0xff] %v10772_v33  ;;  %v8831_v4 = vpop.f32.mrf.mxu0 }
 0x183   : > { %v10774_v24 = vpop.f32.mrf.mxu1  ;;  %v10777_v15 = vadd.f32 %v8831_v4, %v10620_v36 }
 0x184   : > { %12768 = vst [vmem:[#allocation40_spill] sm:$0xff] %v10774_v24  ;;  %v10779_v55 = vpop.f32.mrf.mxu0 }
 0x185   : > { %12769 = vst [vmem:[#allocation41_spill] sm:$0xff] %v10777_v15  ;;  %12770 = vst [vmem:[#allocation42_spill] sm:$0xff] %v10779_v55  ;;  %v10781_v13 = vpop.f32.mrf.mxu1 }
 0x186   : > { %12771 = vst [vmem:[#allocation43_spill] sm:$0xff] %v10781_v13  ;;  %v8834_v41 = vpop.f32.mrf.mxu0 }
 0x187   : > { %v10783_v51 = vpop.f32.mrf.mxu1  ;;  %v10786_v29 = vadd.f32 %v8834_v41, %v10631_v63 }
 0x188   : > { %12772 = vst [vmem:[#allocation44_spill] sm:$0xff] %v10783_v51  ;;  %v10788_v18 = vpop.f32.mrf.mxu0 }
 0x189   : > { %12773 = vst [vmem:[#allocation45_spill] sm:$0xff] %v10786_v29  ;;  %12774 = vst [vmem:[#allocation46_spill] sm:$0xff] %v10788_v18  ;;  %v10790_v9 = vpop.f32.mrf.mxu1 }
 0x18a   : > { %12775 = vst [vmem:[#allocation47_spill] sm:$0xff] %v10790_v9  ;;  %v8837_v33 = vpop.f32.mrf.mxu0 }
 0x18b   : > { %v10792_v20 = vpop.f32.mrf.mxu1  ;;  %v10795_v4 = vadd.f32 %v8837_v33, %v10640_v2 }
 0x18c   : > { %12776 = vst [vmem:[#allocation48_spill] sm:$0xff] %v10792_v20  ;;  %v10797_v36 = vpop.f32.mrf.mxu0 }
 0x18d   : > { %12777 = vst [vmem:[#allocation49_spill] sm:$0xff] %v10795_v4  ;;  %12778 = vst [vmem:[#allocation50_spill] sm:$0xff] %v10797_v36  ;;  %v10799_v24 = vpop.f32.mrf.mxu1 }
 0x18e   : > { %12779 = vst [vmem:[#allocation51_spill] sm:$0xff] %v10799_v24  ;;  %v8840_v13 = vpop.f32.mrf.mxu0 }
 0x18f   : > { %v10801_v15 = vpop.f32.mrf.mxu1  ;;  %v10804_v41 = vadd.f32 %v8840_v13, %v10649_v5 }
 0x190   : > { %12780 = vst [vmem:[#allocation52_spill] sm:$0xff] %v10801_v15  ;;  %v10806_v63 = vpop.f32.mrf.mxu0 }
 0x191   : > { %12781 = vst [vmem:[#allocation53_spill] sm:$0xff] %v10804_v41  ;;  %12782 = vst [vmem:[#allocation54_spill] sm:$0xff] %v10806_v63  ;;  %v10808_v51 = vpop.f32.mrf.mxu1 }
 0x192   : > { %12783 = vst [vmem:[#allocation55_spill] sm:$0xff] %v10808_v51  ;;  %v8843_v9 = vpop.f32.mrf.mxu0 }
 0x193   : > { %v10810_v29 = vpop.f32.mrf.mxu1  ;;  %v10813_v2 = vadd.f32 %v8843_v9, %v10658_v3 }
 0x194   : > { %12784 = vst [vmem:[#allocation56_spill] sm:$0xff] %v10810_v29  ;;  %v10815_v33 = vpop.f32.mrf.mxu0 }
 0x195   : > { %12785 = vst [vmem:[#allocation57_spill] sm:$0xff] %v10813_v2  ;;  %12786 = vst [vmem:[#allocation58_spill] sm:$0xff] %v10815_v33  ;;  %v10817_v20 = vpop.f32.mrf.mxu1 }
 0x196   : > { %12787 = vst [vmem:[#allocation59_spill] sm:$0xff] %v10817_v20  ;;  %v8846_v24 = vpop.f32.mrf.mxu0 }
 0x197   : > { %v10819_v4 = vpop.f32.mrf.mxu1  ;;  %v10822_v13 = vadd.f32 %v8846_v24, %v10667_v48 }
 0x198   : > { %12788 = vst [vmem:[#allocation60_spill] sm:$0xff] %v10819_v4  ;;  %v10824_v5 = vpop.f32.mrf.mxu0 }
 0x199   : > { %12789 = vst [vmem:[#allocation61_spill] sm:$0xff] %v10822_v13  ;;  %12790 = vst [vmem:[#allocation62_spill] sm:$0xff] %v10824_v5  ;;  %v10826_v15 = vpop.f32.mrf.mxu1 }
 0x19a   : > { %12791 = vst [vmem:[#allocation63_spill] sm:$0xff] %v10826_v15  ;;  %v8849_v51 = vpop.f32.mrf.mxu0 }
 0x19b   : > { %v10828_v41 = vpop.f32.mrf.mxu1  ;;  %v10831_v9 = vadd.f32 %v8849_v51, %v10677_v1 }
 0x19c   : > { %12792 = vst [vmem:[#allocation64_spill] sm:$0xff] %v10828_v41  ;;  %v10833_v3 = vpop.f32.mrf.mxu0 }
 0x19d   : > { %12793 = vst [vmem:[#allocation65_spill] sm:$0xff] %v10831_v9  ;;  %12794 = vst [vmem:[#allocation66_spill] sm:$0xff] %v10833_v3  ;;  %v10835_v29 = vpop.f32.mrf.mxu1 }
 0x19e   : > { %12795 = vst [vmem:[#allocation67_spill] sm:$0xff] %v10835_v29  ;;  %v8852_v20 = vpop.f32.mrf.mxu0 }
 0x19f   : > { %v10837_v2 = vpop.f32.mrf.mxu1  ;;  %v10840_v24 = vadd.f32 %v8852_v20, %v10687_v7 }
 0x1a0   : > { %12796 = vst [vmem:[#allocation68_spill] sm:$0xff] %v10837_v2  ;;  %v10842_v48 = vpop.f32.mrf.mxu0 }
 0x1a1   : > { %12797 = vst [vmem:[#allocation69_spill] sm:$0xff] %v10840_v24  ;;  %12798 = vst [vmem:[#allocation70_spill] sm:$0xff] %v10842_v48  ;;  %v10844_v4 = vpop.f32.mrf.mxu1 }
 0x1a2   : > { %12799 = vst [vmem:[#allocation71_spill] sm:$0xff] %v10844_v4  ;;  %v8855_v15 = vpop.f32.mrf.mxu0 }
 0x1a3   : > { %v10846_v13 = vpop.f32.mrf.mxu1  ;;  %v10849_v51 = vadd.f32 %v8855_v15, %v10695_v61  ;;  %v7804_v61 = vld [vmem:[%s12604_s2 + $0xc] sm:$0xf]  ;;  %v10874_v15 = vld [vmem:[%s12604_s2 + $0x10] sm:$0xf] }
 0x1a4   : > { %12800 = vst [vmem:[#allocation72_spill] sm:$0xff] %v10846_v13  ;;  %v10851_v1 = vpop.f32.mrf.mxu0  ;;  %9206 = vmatprep.subr.msk.mxu0 %vm445_vm0, %v7804_v61  ;;  %12804 = vst [vmem:[#allocation76_spill] sm:$0xff] %v10874_v15  ;;  %9256 = vmatprep.subr.msk.mxu1 %vm445_vm0, %v10874_v15 }
 0x1a5   : > { %12801 = vst [vmem:[#allocation73_spill] sm:$0xff] %v10849_v51  ;;  %12802 = vst [vmem:[#allocation74_spill] sm:$0xff] %v10851_v1  ;;  %v10853_v41 = vpop.f32.mrf.mxu1  ;;  %9207 = vmatpush3.msk.msra.mxu0 %vm445_vm0, %v7804_v61 }
 0x1a6   : > { %12803 = vst [vmem:[#allocation75_spill] sm:$0xff] %v10853_v41  ;;  %v8910_v29 = vpop.f32.mrf.mxu0 }
 0x1a7   : > { %v10855_v9 = vpop.f32.mrf.mxu1 }
 0x1a8   : > { %v2758_v2 = vpop.f32.mrf.mxu0 }
 0x1a9   : > { %v10857_v20 = vpop.f32.mrf.mxu1 }
 0x1aa   : > { %v10859_v7 = vpop.f32.mrf.mxu0 }
 0x1ab   : > { %v10863_v4 = vpop.f32.mrf.mxu1 }
 0x1ac   : > { %v10861_v24 = vpop.f32.mrf.mxu0 }
 0x1ad   : > { %v10876_v41 = vpop.f32.mrf.mxu1 }
 0x1ae   : > { %v10865_v13 = vpop.f32.mrf.mxu0 }
 0x1af   : > { %v10885_v48 = vpop.f32.mrf.mxu1 }
 0x1b0   : > { %v10878_v51 = vpop.f32.mrf.mxu0 }
 0x1b1   : > { %v10891_v33 = vpop.f32.mrf.mxu1 }
 0x1b2   : > { %v10883_v1 = vpop.f32.mrf.mxu0 }
 0x1b3   : > { %v10897_v18 = vpop.f32.mrf.mxu1 }
 0x1b4   : > { %v10887_v3 = vpop.f32.mrf.mxu0 }
 0x1b5   : > { %v10903_v15 = vpop.f32.mrf.mxu1 }
 0x1b6   : > { %v10889_v5 = vpop.f32.mrf.mxu0  ;;  %12809 = vst [vmem:[#allocation81_spill] sm:$0xff] %v10903_v15 }
 0x1b7   : > { %v10909_v44 = vpop.f32.mrf.mxu1 }
 0x1b8   : > { %v10893_v63 = vpop.f32.mrf.mxu0  ;;  %12812 = vst [vmem:[#allocation84_spill] sm:$0xff] %v10909_v44 }
 0x1b9   : > { %12805 = vst [vmem:[#allocation77_spill] sm:$0xff] %v10893_v63  ;;  %v10915_v28 = vpop.f32.mrf.mxu1 }
 0x1ba   : > { %v10895_v36 = vpop.f32.mrf.mxu0  ;;  %12815 = vst [vmem:[#allocation87_spill] sm:$0xff] %v10915_v28 }
 0x1bb   : > { %12806 = vst [vmem:[#allocation78_spill] sm:$0xff] %v10895_v36 }
 0x1bc   : > { %v10899_v61 = vpop.f32.mrf.mxu0 }
 0x1bd   : > { %12807 = vst [vmem:[#allocation79_spill] sm:$0xff] %v10899_v61  ;;  %v10921_v61 = vpop.f32.mrf.mxu1 }
 0x1be   : > { %v10901_v55 = vpop.f32.mrf.mxu0  ;;  %12818 = vst [vmem:[#allocation90_spill] sm:$0xff] %v10921_v61 }
 0x1bf   : > { %12808 = vst [vmem:[#allocation80_spill] sm:$0xff] %v10901_v55 }
 0x1c0   : > { %v10905_v60 = vpop.f32.mrf.mxu0 }
 0x1c1   : > { %12810 = vst [vmem:[#allocation82_spill] sm:$0xff] %v10905_v60  ;;  %v10927_v60 = vpop.f32.mrf.mxu1 }
 0x1c2   : > { %v10907_v53 = vpop.f32.mrf.mxu0 }
 0x1c3   : > { %12811 = vst [vmem:[#allocation83_spill] sm:$0xff] %v10907_v53 }
 0x1c4   : > { %v10911_v31 = vpop.f32.mrf.mxu0 }
 0x1c5   : > { %12813 = vst [vmem:[#allocation85_spill] sm:$0xff] %v10911_v31  ;;  %v10933_v31 = vpop.f32.mrf.mxu1 }
 0x1c6   : > { %v10913_v38 = vpop.f32.mrf.mxu0  ;;  %12823 = vst [vmem:[#allocation95_spill] sm:$0xff] %v10933_v31 }
 0x1c7   : > { %12814 = vst [vmem:[#allocation86_spill] sm:$0xff] %v10913_v38 }
 0x1c8   : > { %v10917_v36 = vpop.f32.mrf.mxu0 }
 0x1c9   : > { %12816 = vst [vmem:[#allocation88_spill] sm:$0xff] %v10917_v36  ;;  %v10939_v36 = vpop.f32.mrf.mxu1 }
 0x1ca   : > { %v10919_v63 = vpop.f32.mrf.mxu0 }
 0x1cb   : > { %12817 = vst [vmem:[#allocation89_spill] sm:$0xff] %v10919_v63 }
 0x1cc   : > { %v10923_v55 = vpop.f32.mrf.mxu0 }
 0x1cd   : > { %12819 = vst [vmem:[#allocation91_spill] sm:$0xff] %v10923_v55  ;;  %v10947_v55 = vpop.f32.mrf.mxu1 }
 0x1ce   : > { %v10925_v15 = vpop.f32.mrf.mxu0  ;;  %12828 = vst [vmem:[#allocation100_spill] sm:$0xff] %v10947_v55 }
 0x1cf   : > { %12820 = vst [vmem:[#allocation92_spill] sm:$0xff] %v10925_v15  ;;  %v1746_v15 = vadd.f32 %v10526_v30, %v10529_v32 }
 0x1d0   : > { %v10929_v53 = vpop.f32.mrf.mxu0 }
 0x1d1   : > { %12821 = vst [vmem:[#allocation93_spill] sm:$0xff] %v10929_v53 }
 0x1d2   : > { %v10931_v44 = vpop.f32.mrf.mxu0 }
 0x1d3   : > { %12822 = vst [vmem:[#allocation94_spill] sm:$0xff] %v10931_v44  ;;  %v2136_v44 = vadd.f32 %v10702_v43, %v1746_v15  ;;  %v1750_v43 = vadd.f32 %v10550_v37, %v10553_v12  ;;  %v1752_v37 = vadd.f32 %v10567_v34, %v10570_v8 }
 0x1d4   : > { %v10935_v38 = vpop.f32.mrf.mxu0 }
 0x1d5   : > { %12824 = vst [vmem:[#allocation96_spill] sm:$0xff] %v10935_v38  ;;  %v2527_v38 = vadd.f32 %v10697_v11, %v10700_v14  ;;  %v2526_v30 = vadd.f32 %v10704_v21, %v2136_v44  ;;  %v2140_v14 = vadd.f32 %v10726_v49, %v1750_v43 }
 0x1d6   : > { %v10937_v28 = vpop.f32.mrf.mxu0 }
 0x1d7   : > { %12825 = vst [vmem:[#allocation97_spill] sm:$0xff] %v10937_v28  ;;  %v1748_v28 = vadd.f32 %v10538_v16, %v10541_v56  ;;  %v2918_v55 = vadd.f32 %v8910_v29, %v2527_v38  ;;  %v2529_v16 = vadd.f32 %v10706_v10, %v10709_v54  ;;  %v2917_v56 = vadd.f32 %v2758_v2, %v2526_v30 }
 0x1d8   : > { %v10941_v63 = vpop.f32.mrf.mxu0  ;;  %v2531_v10 = vadd.f32 %v10718_v46, %v10722_v42  ;;  %v2530_v38 = vadd.f32 %v10728_v58, %v2140_v14  ;;  %v1754_v42 = vadd.f32 %v10579_v52, %v10582_v17  ;;  %v2533_v46 = vadd.f32 %v10733_v45, %v10736_v25 }
 0x1d9   : > { %12826 = vst [vmem:[#allocation98_spill] sm:$0xff] %v10941_v63  ;;  %v10958_v63 = vpop.f32.mrf.mxu1  ;;  %v2138_v32 = vadd.f32 %v10711_v50, %v1748_v28  ;;  %v3308_v28 = vadd.f32 %v10855_v9, %v2918_v55  ;;  %v2920_v21 = vadd.f32 %v10859_v7, %v2529_v16  ;;  %v3307_v54 = vadd.f32 %v10857_v20, %v2917_v56 }
 0x1da   : > { %v10943_v61 = vpop.f32.mrf.mxu0  ;;  %v2922_v34 = vadd.f32 %v10865_v13, %v2531_v10  ;;  %v2144_v13 = vadd.f32 %v10752_v27, %v1754_v42  ;;  %v2924_v17 = vadd.f32 %v10883_v1, %v2533_v46  ;;  %v11014_v1 = vld [vmem:[%s12604_s2 + $0x14] sm:$0xf]  ;;  %v12836_v46 = vld [vmem:[#allocation16_spill] sm:$0xff] }
 0x1db   : > { %12827 = vst [vmem:[#allocation99_spill] sm:$0xff] %v10943_v61  ;;  %v10971_v11 = vpop.f32.mrf.mxu1  ;;  %v2528_v44 = vadd.f32 %v10713_v39, %v2138_v32  ;;  %v2142_v39 = vadd.f32 %v10738_v19, %v1752_v37  ;;  %v3310_v2 = vadd.f32 %v10863_v4, %v2920_v21  ;;  %v2921_v19 = vadd.f32 %v10878_v51, %v2530_v38  ;;  %v12831_v37 = vld [vmem:[#allocation77_spill] sm:$0xff] }
 0x1dc   : > { %v10949_v53 = vpop.f32.mrf.mxu0  ;;  %v3312_v52 = vadd.f32 %v10885_v48, %v2922_v34  ;;  %v2535_v51 = vadd.f32 %v10745_v35, %v10749_v57  ;;  %v2534_v56 = vadd.f32 %v10754_v26, %v2144_v13  ;;  %9306 = vmatprep.subr.msk.mxu0 %vm445_vm0, %v11014_v1  ;;  %v3314_v57 = vadd.f32 %v10897_v18, %v2924_v17  ;;  %v12840_v13 = vld [vmem:[#allocation87_spill] sm:$0xff] }
 0x1dd   : > { %v2919_v49 = vadd.f32 %v10861_v24, %v2528_v44  ;;  %v10986_v29 = vpop.f32.mrf.mxu1  ;;  %v2532_v4 = vadd.f32 %v10740_v62, %v2142_v39  ;;  %v3311_v27 = vadd.f32 %v10891_v33, %v2921_v19  ;;  %v1758_v44 = vadd.f32 %v10603_v59, %v10606_v40  ;;  %v12838_v19 = vld [vmem:[#allocation37_spill] sm:$0xff] }
 0x1de   : > { %v10952_v31 = vpop.f32.mrf.mxu0  ;;  %v2926_v33 = vadd.f32 %v10889_v5, %v2535_v51  ;;  %v12832_v5 = vld [vmem:[#allocation35_spill] sm:$0xff]  ;;  %v12843_v51 = vld [vmem:[#allocation30_spill] sm:$0xff] }
 0x1df   : > { %12829 = vst [vmem:[#allocation101_spill] sm:$0xff] %v10952_v31  ;;  %v3309_v58 = vadd.f32 %v10876_v41, %v2919_v49  ;;  %v10999_v30 = vpop.f32.mrf.mxu1  ;;  %v1756_v41 = vadd.f32 %v10591_v47, %v10594_v0  ;;  %v2923_v43 = vadd.f32 %v10887_v3, %v2532_v4  ;;  %v12833_v49 = vld [vmem:[#allocation38_spill] sm:$0xff] }
 0x1e0   : > { %v10960_v61 = vpop.f32.mrf.mxu0 }
 0x1e1   : > { %v2146_v47 = vadd.f32 %v10761_v23, %v1756_v41  ;;  %v11018_v0 = vpop.f32.mrf.mxu1  ;;  %v2537_v23 = vadd.f32 %v10756_v22, %v10759_v6  ;;  %v12834_v22 = vld [vmem:[#allocation84_spill] sm:$0xff]  ;;  %v12842_v41 = vld [vmem:[#allocation29_spill] sm:$0xff] }
 0x1e2   : > { %v10966_v15 = vpop.f32.mrf.mxu0 }
 0x1e3   : > { %v11034_v38 = vpop.f32.mrf.mxu1 }
 0x1e4   : > { %v10973_v31 = vpop.f32.mrf.mxu0 }
 0x1e6   : > { %v9010_v12 = vpop.f32.mrf.mxu0 }
 0x1e7   : > { %v3698_v50 = vadd.f32 %v9010_v12, %v3308_v28  ;;  %v12830_v28 = vld [vmem:[#allocation81_spill] sm:$0xff]  ;;  %v2925_v12 = vadd.f32 %v12831_v37, %v2534_v56  ;;  %v11066_v56 = vpop.f32.mrf.mxu1  ;;  %v12848_v37 = vld [vmem:[#allocation18_spill] sm:$0xff] }
 0x1e8   : > { %v3538_v55 = vpop.f32.mrf.mxu0  ;;  %v3313_v21 = vadd.f32 %v12830_v28, %v2923_v43 }
 0x1e9   : > { %v3730_v8 = vmax.f32 %v3698_v50, 0.0  ;;  %v3697_v9 = vadd.f32 %v3538_v55, %v3307_v54  ;;  %v2536_v54 = vadd.f32 %v12832_v5, %v2146_v47  ;;  %v2148_v50 = vadd.f32 %v12833_v49, %v1758_v44  ;;  %v12847_v44 = vld [vmem:[#allocation80_spill] sm:$0xff] }
 0x1ea   : > { %v9013_v24 = vpop.f32.mrf.mxu0  ;;  %v3316_v55 = vadd.f32 %v12834_v22, %v2926_v33  ;;  %v12852_v49 = vld [vmem:[#allocation40_spill] sm:$0xff] }
 0x1eb   : > { %3762 = vst.msk [vmem:[#allocation2 + $0x21] sm:$0xff] %vm171_vm1, %v3730_v8  ;;  %v3729_v20 = vmax.f32 %v3697_v9, 0.0  ;;  %v3700_v7 = vadd.f32 %v9013_v24, %v3310_v2  ;;  %v12835_v2 = vld [vmem:[#allocation78_spill] sm:$0xff]  ;;  %v12837_v24 = vld [vmem:[#allocation15_spill] sm:$0xff] }
 0x1ec   : > { %v3548_v32 = vpop.f32.mrf.mxu0  ;;  %v2928_v34 = vadd.f32 %v12835_v2, %v2537_v23 }
 0x1ed   : > { %3761 = vst.msk [vmem:[#allocation2 + $0x19] sm:$0xff] %vm171_vm1, %v3729_v20  ;;  %v3732_v45 = vmax.f32 %v3700_v7, 0.0  ;;  %v3699_v25 = vadd.f32 %v3548_v32, %v3309_v58  ;;  %v1760_v58 = vadd.f32 %v12837_v24, %v12836_v46  ;;  %v12839_v20 = vld [vmem:[#allocation36_spill] sm:$0xff]  ;;  %v3315_v32 = vadd.f32 %v12840_v13, %v2925_v12  ;;  %v12849_v12 = vld [vmem:[#allocation17_spill] sm:$0xff] }
 0x1ee   : > { %v9016_v62 = vpop.f32.mrf.mxu0  ;;  %v2539_v7 = vadd.f32 %v12839_v20, %v12838_v19  ;;  %v12855_v46 = vld [vmem:[#allocation4_spill] sm:$0xff]  ;;  %v12857_v20 = vld [vmem:[#allocation46_spill] sm:$0xff] }
 0x1ef   : > { %3764 = vst.msk [vmem:[#allocation2 + $0x39] sm:$0xff] %vm171_vm1, %v3732_v45  ;;  %v3731_v48 = vmax.f32 %v3699_v25, 0.0  ;;  %v3702_v16 = vadd.f32 %v9016_v62, %v3312_v52  ;;  %v12841_v52 = vld [vmem:[#allocation79_spill] sm:$0xff]  ;;  %v930_v62 = vadd.f32 %v12843_v51, %v12842_v41 }
 0x1f0   : > { %v3558_v35 = vpop.f32.mrf.mxu0  ;;  %v2927_v17 = vadd.f32 %v12841_v52, %v2536_v54  ;;  %v2930_v23 = vadd.f32 %v12847_v44, %v2539_v7  ;;  %v12851_v54 = vld [vmem:[#allocation41_spill] sm:$0xff] }
 0x1f1   : > { %3763 = vst.msk [vmem:[#allocation2 + $0x31] sm:$0xff] %vm171_vm1, %v3731_v48  ;;  %v3734_v3 = vmax.f32 %v3702_v16, 0.0  ;;  %v3701_v14 = vadd.f32 %v3558_v35, %v3311_v27  ;;  %v12844_v27 = vld [vmem:[#allocation39_spill] sm:$0xff]  ;;  %v12845_v48 = vld [vmem:[#allocation42_spill] sm:$0xff] }
 0x1f2   : > { %v9019_v26 = vpop.f32.mrf.mxu0  ;;  %v11049_v42 = vld [vmem:[#allocation2 + $0x21] sm:$0xff]  ;;  %v2538_v43 = vadd.f32 %v12844_v27, %v2148_v50  ;;  %v2150_v16 = vadd.f32 %v12845_v48, %v1760_v58  ;;  %v2541_v50 = vadd.f32 %v12852_v49, %v12851_v54  ;;  %v3317_v22 = vadd.f32 %v10927_v60, %v2927_v17  ;;  %v12856_v58 = vld [vmem:[#allocation43_spill] sm:$0xff] }
 0x1f3   : > { %3766 = vst.msk [vmem:[#allocation2 + $0x51] sm:$0xff] %vm171_vm1, %v3734_v3  ;;  %v3733_v18 = vmax.f32 %v3701_v14, 0.0  ;;  %v3704_v10 = vadd.f32 %v9019_v26, %v3314_v57  ;;  %v12846_v3 = vld [vmem:[#allocation90_spill] sm:$0xff]  ;;  %v12858_v17 = vld [vmem:[#allocation95_spill] sm:$0xff] }
 0x1f4   : > { %v3568_v39 = vpop.f32.mrf.mxu0  ;;  %v11036_v59 = vld [vmem:[#allocation2 + $0x19] sm:$0xff]  ;;  %v3318_v14 = vadd.f32 %v12846_v3, %v2928_v34  ;;  %v2540_v19 = vadd.f32 %v12856_v58, %v2150_v16  ;;  %v12867_v49 = vld [vmem:[#allocation47_spill] sm:$0xff] }
 0x1f5   : > { %v11038_v40 = vld [vmem:[#allocation2 + $0x18] sm:$0xff]  ;;  %v11040_v6 = vld [vmem:[#allocation2 + $0x20] sm:$0xff]  ;;  %3765 = vst.msk [vmem:[#allocation2 + $0x49] sm:$0xff] %vm171_vm1, %v3733_v18  ;;  %v3736_v8 = vmax.f32 %v3704_v10, 0.0  ;;  %v3703_v9 = vadd.f32 %v3568_v39, %v3313_v21  ;;  %9061 = vmatprep.mubr.msk.f32.mxu1 %vm171_vm1, %v11036_v59  ;;  %v1762_v18 = vadd.f32 %v12849_v12, %v12848_v37  ;;  %v12850_v10 = vld [vmem:[#allocation19_spill] sm:$0xff] }
 0x1f6   : > { %9111 = vmatprep.mubr.msk.f32.mxu0 %vm171_vm1, %v11038_v40  ;;  %v9022_v4 = vpop.f32.mrf.mxu0  ;;  %9062 = vmatmul.mubr.msk.f32.gmra.mxu1 %vm171_vm1, %v11049_v42  ;;  %v11081_v21 = vld [vmem:[#allocation2 + $0x39] sm:$0xff]  ;;  %v1374_v5 = vadd.f32 %v12850_v10, %v930_v62 }
 0x1f7   : > { %9112 = vmatmul.mubr.msk.f32.gmra.mxu0 %vm171_vm1, %v11040_v6  ;;  %3768 = vst.msk [vmem:[#allocation2 + $0x69] sm:$0xff] %vm171_vm1, %v3736_v8  ;;  %v3735_v45 = vmax.f32 %v3703_v9, 0.0  ;;  %v3706_v25 = vadd.f32 %v9022_v4, %v3316_v55  ;;  %v12853_v55 = vld [vmem:[#allocation82_spill] sm:$0xff]  ;;  %v12854_v9 = vld [vmem:[#allocation3_spill] sm:$0xff]  ;;  %v2152_v7 = vadd.f32 %v12857_v20, %v1762_v18  ;;  %v11099_v4 = vpop.f32.mrf.mxu1  ;;  %v12861_v16 = vld [vmem:[#allocation21_spill] sm:$0xff] }
 0x1f8   : > { %v3578_v47 = vpop.f32.mrf.mxu0  ;;  %v11068_v35 = vld [vmem:[#allocation2 + $0x31] sm:$0xff]  ;;  %v2929_v2 = vadd.f32 %v12853_v55, %v2538_v43  ;;  %v940_v24 = vadd.f32 %v12855_v46, %v12854_v9  ;;  %v12862_v3 = vld [vmem:[#allocation45_spill] sm:$0xff] }
 0x1f9   : > { %v11070_v57 = vld [vmem:[#allocation2 + $0x30] sm:$0xff]  ;;  %v11072_v33 = vld [vmem:[#allocation2 + $0x38] sm:$0xff]  ;;  %3767 = vst.msk [vmem:[#allocation2 + $0x61] sm:$0xff] %vm171_vm1, %v3735_v45  ;;  %v3738_v26 = vmax.f32 %v3706_v25, 0.0  ;;  %v3705_v28 = vadd.f32 %v3578_v47, %v3315_v32  ;;  %9064 = vmatprep.mubr.msk.f32.mxu1 %vm171_vm1, %v11068_v35  ;;  %v3320_v45 = vadd.f32 %v12858_v17, %v2930_v23  ;;  %v12865_v10 = vld [vmem:[#allocation5_spill] sm:$0xff]  ;;  %v11131_v55 = vpop.f32.mrf.mxu1 }
 0x1fa   : > { %9114 = vmatprep.mubr.msk.f32.mxu0 %vm171_vm1, %v11070_v57  ;;  %v9025_v39 = vpop.f32.mrf.mxu0  ;;  %9065 = vmatmul.mubr.msk.f32.gmra.mxu1 %vm171_vm1, %v11081_v21  ;;  %v12859_v25 = vld [vmem:[#allocation83_spill] sm:$0xff]  ;;  %v12860_v43 = vld [vmem:[#allocation20_spill] sm:$0xff]  ;;  %v1376_v47 = vadd.f32 %v12861_v16, %v940_v24  ;;  %v12872_v24 = vld [vmem:[#allocation86_spill] sm:$0xff] }
 0x1fb   : > { %9115 = vmatmul.mubr.msk.f32.gmra.mxu0 %vm171_vm1, %v11072_v33  ;;  %3770 = vst.msk [vmem:[#allocation2 + $0x81] sm:$0xff] %vm171_vm1, %v3738_v26  ;;  %v3737_v34 = vmax.f32 %v3705_v28, 0.0  ;;  %v3708_v8 = vadd.f32 %v9025_v39, %v3318_v14  ;;  %v2932_v41 = vadd.f32 %v12859_v25, %v2541_v50  ;;  %v11114_v27 = vld [vmem:[#allocation2 + $0x51] sm:$0xff]  ;;  %v1764_v48 = vadd.f32 %v12860_v43, %v1374_v5  ;;  %v12864_v28 = vld [vmem:[#allocation85_spill] sm:$0xff]  ;;  %v12866_v5 = vld [vmem:[#allocation6_spill] sm:$0xff] }
 0x1fc   : > { %v3588_v13 = vpop.f32.mrf.mxu0  ;;  %v11101_v32 = vld [vmem:[#allocation2 + $0x49] sm:$0xff]  ;;  %v12863_v14 = vld [vmem:[#allocation44_spill] sm:$0xff]  ;;  %v3319_v26 = vadd.f32 %v10939_v36, %v2929_v2  ;;  %v2931_v37 = vadd.f32 %v12864_v28, %v2540_v19  ;;  %v950_v54 = vadd.f32 %v12866_v5, %v12865_v10  ;;  %v2542_v50 = vadd.f32 %v12867_v49, %v2152_v7  ;;  %v11163_v5 = vpop.f32.mrf.mxu1 }
 0x1fd   : > { %v11103_v52 = vld [vmem:[#allocation2 + $0x48] sm:$0xff]  ;;  %v11105_v60 = vld [vmem:[#allocation2 + $0x50] sm:$0xff]  ;;  %3769 = vst.msk [vmem:[#allocation2 + $0x79] sm:$0xff] %vm171_vm1, %v3737_v34  ;;  %v3740_v51 = vmax.f32 %v3708_v8, 0.0  ;;  %v3707_v62 = vadd.f32 %v3588_v13, %v3317_v22  ;;  %9067 = vmatprep.mubr.msk.f32.mxu1 %vm171_vm1, %v11101_v32  ;;  %v2543_v44 = vadd.f32 %v12863_v14, %v12862_v3  ;;  %v12871_v2 = vld [vmem:[#allocation100_spill] sm:$0xff] }
 0x1fe   : > { %9117 = vmatprep.mubr.msk.f32.mxu0 %vm171_vm1, %v11103_v52  ;;  %v9028_v23 = vpop.f32.mrf.mxu0  ;;  %9068 = vmatmul.mubr.msk.f32.gmra.mxu1 %vm171_vm1, %v11114_v27  ;;  %v12868_v39 = vld [vmem:[#allocation50_spill] sm:$0xff]  ;;  %v3322_v46 = vadd.f32 %v12871_v2, %v2932_v41  ;;  %v12876_v41 = vld [vmem:[#allocation48_spill] sm:$0xff]  ;;  %v12880_v28 = vld [vmem:[#allocation51_spill] sm:$0xff] }
 0x1ff   : > { %9118 = vmatmul.mubr.msk.f32.gmra.mxu0 %vm171_vm1, %v11105_v60  ;;  %3772 = vst.msk [vmem:[#allocation2 + $0x99] sm:$0xff] %vm171_vm1, %v3740_v51  ;;  %v3739_v12 = vmax.f32 %v3707_v62, 0.0  ;;  %v3710_v18 = vadd.f32 %v9028_v23, %v3320_v45  ;;  %v2154_v22 = vadd.f32 %v12868_v39, %v1764_v48  ;;  %v2934_v58 = vadd.f32 %v12872_v24, %v2543_v44  ;;  %v11146_v7 = vld [vmem:[#allocation2 + $0x69] sm:$0xff]  ;;  %v12875_v51 = vld [vmem:[#allocation49_spill] sm:$0xff]  ;;  %v12877_v16 = vld [vmem:[#allocation88_spill] sm:$0xff] }
 0x200   : > { %v3598_v34 = vpop.f32.mrf.mxu0  ;;  %v11133_v8 = vld [vmem:[#allocation2 + $0x61] sm:$0xff]  ;;  %v12874_v45 = vld [vmem:[#allocation23_spill] sm:$0xff]  ;;  %v2545_v62 = vadd.f32 %v12876_v41, %v12875_v51  ;;  %v3321_v48 = vadd.f32 %v10958_v63, %v2931_v37  ;;  %v2933_v3 = vadd.f32 %v12877_v16, %v2542_v50  ;;  %v12879_v23 = vld [vmem:[#allocation8_spill] sm:$0xff] }
 0x201   : > { %v11135_v9 = vld [vmem:[#allocation2 + $0x60] sm:$0xff]  ;;  %v11137_v36 = vld [vmem:[#allocation2 + $0x68] sm:$0xff]  ;;  %3771 = vst.msk [vmem:[#allocation2 + $0x91] sm:$0xff] %vm171_vm1, %v3739_v12  ;;  %v3742_v19 = vmax.f32 %v3710_v18, 0.0  ;;  %v3709_v20 = vadd.f32 %v3598_v34, %v3319_v26  ;;  %9070 = vmatprep.mubr.msk.f32.mxu1 %vm171_vm1, %v11133_v8  ;;  %v1378_v25 = vadd.f32 %v12874_v45, %v950_v54  ;;  %v12878_v44 = vld [vmem:[#allocation7_spill] sm:$0xff]  ;;  %v2544_v12 = vadd.f32 %v12880_v28, %v2154_v22  ;;  %v11195_v28 = vpop.f32.mrf.mxu1 }
 0x202   : > { %12869 = vst [vmem:[#allocation81_spill] sm:$0xff] %v11135_v9  ;;  %12870 = vst [vmem:[#allocation77_spill] sm:$0xff] %v11137_v36  ;;  %9120 = vmatprep.mubr.msk.f32.mxu0 %vm171_vm1, %v11135_v9  ;;  %v12873_v13 = vld [vmem:[#allocation22_spill] sm:$0xff]  ;;  %v9031_v43 = vpop.f32.mrf.mxu0  ;;  %9071 = vmatmul.mubr.msk.f32.gmra.mxu1 %vm171_vm1, %v11146_v7  ;;  %v960_v26 = vadd.f32 %v12879_v23, %v12878_v44  ;;  %v3324_v37 = vadd.f32 %v10971_v11, %v2934_v58  ;;  %v12884_v50 = vld [vmem:[#allocation89_spill] sm:$0xff] }
 0x203   : > { %v1766_v17 = vadd.f32 %v12873_v13, %v1376_v47  ;;  %9121 = vmatmul.mubr.msk.f32.gmra.mxu0 %vm171_vm1, %v11137_v36  ;;  %3774 = vst.msk [vmem:[#allocation2 + $0xb1] sm:$0xff] %vm171_vm1, %v3742_v19  ;;  %v3741_v14 = vmax.f32 %v3709_v20, 0.0  ;;  %v3712_v47 = vadd.f32 %v9031_v43, %v3322_v46  ;;  %v12881_v18 = vld [vmem:[#allocation54_spill] sm:$0xff]  ;;  %v2936_v34 = vadd.f32 %v12884_v50, %v2545_v62  ;;  %v12885_v24 = vld [vmem:[#allocation24_spill] sm:$0xff]  ;;  %v12886_v20 = vld [vmem:[#allocation25_spill] sm:$0xff] }
 0x204   : > { %v3608_v54 = vpop.f32.mrf.mxu0  ;;  %v11165_v49 = vld [vmem:[#allocation2 + $0x79] sm:$0xff]  ;;  %v11178_v22 = vld [vmem:[#allocation2 + $0x81] sm:$0xff]  ;;  %v1768_v19 = vadd.f32 %v12885_v24, %v1378_v25  ;;  %v1380_v13 = vadd.f32 %v12886_v20, %v960_v26  ;;  %v3323_v51 = vadd.f32 %v10986_v29, %v2933_v3  ;;  %v12889_v41 = vld [vmem:[#allocation91_spill] sm:$0xff] }
 0x205   : > { %v2156_v10 = vadd.f32 %v12881_v18, %v1766_v17  ;;  %v11167_v39 = vld [vmem:[#allocation2 + $0x78] sm:$0xff]  ;;  %v11169_v63 = vld [vmem:[#allocation2 + $0x80] sm:$0xff]  ;;  %3773 = vst.msk [vmem:[#allocation2 + $0xa9] sm:$0xff] %vm171_vm1, %v3741_v14  ;;  %v3744_v2 = vmax.f32 %v3712_v47, 0.0  ;;  %v3711_v46 = vadd.f32 %v3608_v54, %v3321_v48  ;;  %9073 = vmatprep.mubr.msk.f32.mxu1 %vm171_vm1, %v11165_v49  ;;  %v2935_v62 = vadd.f32 %v12889_v41, %v2544_v12  ;;  %v12891_v16 = vld [vmem:[#allocation10_spill] sm:$0xff] }
 0x206   : > { %12882 = vst [vmem:[#allocation35_spill] sm:$0xff] %v11167_v39  ;;  %12883 = vst [vmem:[#allocation38_spill] sm:$0xff] %v11169_v63  ;;  %9123 = vmatprep.mubr.msk.f32.mxu0 %vm171_vm1, %v11167_v39  ;;  %v12887_v17 = vld [vmem:[#allocation53_spill] sm:$0xff]  ;;  %v12888_v11 = vld [vmem:[#allocation52_spill] sm:$0xff]  ;;  %v9034_v45 = vpop.f32.mrf.mxu0  ;;  %9074 = vmatmul.mubr.msk.f32.gmra.mxu1 %vm171_vm1, %v11178_v22  ;;  %v3326_v3 = vadd.f32 %v10999_v30, %v2936_v34 }
 0x207   : > { %v2547_v58 = vadd.f32 %v12888_v11, %v12887_v17  ;;  %9124 = vmatmul.mubr.msk.f32.gmra.mxu0 %vm171_vm1, %v11169_v63  ;;  %3776 = vst.msk [vmem:[#allocation2 + $0xc9] sm:$0xff] %vm171_vm1, %v3744_v2  ;;  %v3743_v43 = vmax.f32 %v3711_v46, 0.0  ;;  %v3714_v25 = vadd.f32 %v9034_v45, %v3324_v37  ;;  %v12890_v48 = vld [vmem:[#allocation9_spill] sm:$0xff]  ;;  %v12892_v47 = vld [vmem:[#allocation55_spill] sm:$0xff]  ;;  %v12893_v23 = vld [vmem:[#allocation58_spill] sm:$0xff]  ;;  %v3325_v45 = vadd.f32 %v11018_v0, %v2935_v62 }
 0x208   : > { %v970_v14 = vadd.f32 %v12891_v16, %v12890_v48  ;;  %v2546_v44 = vadd.f32 %v12892_v47, %v2156_v10  ;;  %v2158_v26 = vadd.f32 %v12893_v23, %v1768_v19  ;;  %v3618_v18 = vpop.f32.mrf.mxu0  ;;  %v11197_v54 = vld [vmem:[#allocation2 + $0x91] sm:$0xff]  ;;  %v11210_v10 = vld [vmem:[#allocation2 + $0x99] sm:$0xff]  ;;  %v12897_v24 = vld [vmem:[#allocation26_spill] sm:$0xff] }
 0x209   : > { %v11199_v50 = vld [vmem:[#allocation2 + $0x90] sm:$0xff]  ;;  %v11201_v29 = vld [vmem:[#allocation2 + $0x98] sm:$0xff]  ;;  %3775 = vst.msk [vmem:[#allocation2 + $0xc1] sm:$0xff] %vm171_vm1, %v3743_v43  ;;  %v3746_v2 = vmax.f32 %v3714_v25, 0.0  ;;  %v3713_v46 = vadd.f32 %v3618_v18, %v3323_v51  ;;  %9076 = vmatprep.mubr.msk.f32.mxu1 %vm171_vm1, %v11197_v54  ;;  %v1770_v19 = vadd.f32 %v12897_v24, %v1380_v13  ;;  %v12899_v11 = vld [vmem:[#allocation57_spill] sm:$0xff] }
 0x20a   : > { %12894 = vst [vmem:[#allocation84_spill] sm:$0xff] %v11199_v50  ;;  %12895 = vst [vmem:[#allocation78_spill] sm:$0xff] %v11201_v29  ;;  %v12896_v12 = vld [vmem:[#allocation92_spill] sm:$0xff]  ;;  %9126 = vmatprep.mubr.msk.f32.mxu0 %vm171_vm1, %v11199_v50  ;;  %v12898_v20 = vld [vmem:[#allocation27_spill] sm:$0xff]  ;;  %9077 = vmatmul.mubr.msk.f32.gmra.mxu1 %vm171_vm1, %v11210_v10 }
 0x20b   : > { %v2938_v37 = vadd.f32 %v12896_v12, %v2547_v58  ;;  %v1382_v17 = vadd.f32 %v12898_v20, %v970_v14  ;;  %v12900_v30 = vld [vmem:[#allocation56_spill] sm:$0xff]  ;;  %v9037_v58 = vpop.f32.mrf.mxu0  ;;  %9127 = vmatmul.mubr.msk.f32.gmra.mxu0 %vm171_vm1, %v11201_v29  ;;  %v12901_v51 = vld [vmem:[#allocation93_spill] sm:$0xff]  ;;  %3778 = vst.msk [vmem:[#allocation2 + $0xe1] sm:$0xff] %vm171_vm1, %v3746_v2  ;;  %v3745_v43 = vmax.f32 %v3713_v46, 0.0  ;;  %v12902_v25 = vld [vmem:[#allocation11_spill] sm:$0xff]  ;;  %v11227_v12 = vpop.f32.mrf.mxu1 }
 0x20c   : > { %v2549_v34 = vadd.f32 %v12900_v30, %v12899_v11  ;;  %v2937_v41 = vadd.f32 %v12901_v51, %v2546_v44  ;;  %v3716_v13 = vadd.f32 %v9037_v58, %v3326_v3  ;;  %v12903_v48 = vld [vmem:[#allocation12_spill] sm:$0xff]  ;;  %v12904_v14 = vld [vmem:[#allocation59_spill] sm:$0xff]  ;;  %v12905_v23 = vld [vmem:[#allocation62_spill] sm:$0xff] }
 0x20d   : > { %v980_v16 = vadd.f32 %v12903_v48, %v12902_v25  ;;  %v2548_v47 = vadd.f32 %v12904_v14, %v2158_v26  ;;  %v2160_v18 = vadd.f32 %v12905_v23, %v1770_v19  ;;  %v3628_v24 = vpop.f32.mrf.mxu0  ;;  %v11229_v20 = vld [vmem:[#allocation2 + $0xa9] sm:$0xff]  ;;  %v3328_v62 = vadd.f32 %v11034_v38, %v2938_v37  ;;  %3777 = vst.msk [vmem:[#allocation2 + $0xd9] sm:$0xff] %vm171_vm1, %v3745_v43  ;;  %v11242_v26 = vld [vmem:[#allocation2 + $0xb1] sm:$0xff]  ;;  %v12913_v25 = vld [vmem:[#allocation61_spill] sm:$0xff] }
 0x20e   : > { %12906 = vst [vmem:[#allocation16_spill] sm:$0xff] %v11229_v20  ;;  %v11231_v11 = vld [vmem:[#allocation2 + $0xa8] sm:$0xff]  ;;  %v11233_v0 = vld [vmem:[#allocation2 + $0xb0] sm:$0xff]  ;;  %v3748_v2 = vmax.f32 %v3716_v13, 0.0  ;;  %v3715_v46 = vadd.f32 %v3628_v24, %v3325_v45  ;;  %9079 = vmatprep.mubr.msk.f32.mxu1 %vm171_vm1, %v11229_v20  ;;  %12910 = vst [vmem:[#allocation36_spill] sm:$0xff] %v11242_v26  ;;  %v3327_v45 = vadd.f32 %v11066_v56, %v2937_v41 }
 0x20f   : > { %12907 = vst [vmem:[#allocation15_spill] sm:$0xff] %v11231_v11  ;;  %12908 = vst [vmem:[#allocation37_spill] sm:$0xff] %v11233_v0  ;;  %v12909_v44 = vld [vmem:[#allocation94_spill] sm:$0xff]  ;;  %9129 = vmatprep.mubr.msk.f32.mxu0 %vm171_vm1, %v11231_v11  ;;  %v12911_v19 = vld [vmem:[#allocation28_spill] sm:$0xff]  ;;  %9080 = vmatmul.mubr.msk.f32.gmra.mxu1 %vm171_vm1, %v11242_v26 }
 0x210   : > { %v2940_v3 = vadd.f32 %v12909_v44, %v2549_v34  ;;  %v1772_v30 = vadd.f32 %v12911_v19, %v1382_v17  ;;  %v12912_v58 = vld [vmem:[#allocation31_spill] sm:$0xff]  ;;  %v12914_v38 = vld [vmem:[#allocation60_spill] sm:$0xff]  ;;  %v9040_v34 = vpop.f32.mrf.mxu0  ;;  %9130 = vmatmul.mubr.msk.f32.gmra.mxu0 %vm171_vm1, %v11233_v0  ;;  %3780 = vst.msk [vmem:[#allocation2 + $0xf9] sm:$0xff] %vm171_vm1, %v3748_v2  ;;  %v3747_v48 = vmax.f32 %v3715_v46, 0.0  ;;  %v12916_v14 = vld [vmem:[#allocation13_spill] sm:$0xff] }
 0x211   : > { %v1384_v51 = vadd.f32 %v12912_v58, %v980_v16  ;;  %v2551_v37 = vadd.f32 %v12914_v38, %v12913_v25  ;;  %v12915_v43 = vld [vmem:[#allocation96_spill] sm:$0xff]  ;;  %v3718_v17 = vadd.f32 %v9040_v34, %v3328_v62  ;;  %v12917_v16 = vld [vmem:[#allocation14_spill] sm:$0xff]  ;;  %v12918_v24 = vld [vmem:[#allocation63_spill] sm:$0xff]  ;;  %v11259_v25 = vpop.f32.mrf.mxu1 }
 0x212   : > { %v2939_v13 = vadd.f32 %v12915_v43, %v2548_v47  ;;  %v990_v23 = vadd.f32 %v12917_v16, %v12916_v14  ;;  %v2550_v44 = vadd.f32 %v12918_v24, %v2160_v18  ;;  %v12919_v19 = vld [vmem:[#allocation66_spill] sm:$0xff]  ;;  %v3638_v38 = vpop.f32.mrf.mxu0  ;;  %v11263_v20 = vld [vmem:[#allocation2 + $0xc0] sm:$0xff]  ;;  %v3330_v41 = vadd.f32 %v11099_v4, %v2940_v3  ;;  %3779 = vst.msk [vmem:[#allocation2 + $0xf1] sm:$0xff] %vm171_vm1, %v3747_v48  ;;  %v12927_v4 = vld [vmem:[#allocation64_spill] sm:$0xff] }
 0x213   : > { %v2162_v58 = vadd.f32 %v12919_v19, %v1772_v30  ;;  %v11261_v26 = vld [vmem:[#allocation2 + $0xc1] sm:$0xff]  ;;  %12920 = vst [vmem:[#allocation87_spill] sm:$0xff] %v11263_v20  ;;  %v3750_v2 = vmax.f32 %v3718_v17, 0.0  ;;  %v3717_v46 = vadd.f32 %v3638_v38, %v3327_v45  ;;  %9132 = vmatprep.mubr.msk.f32.mxu0 %vm171_vm1, %v11263_v20  ;;  %v11274_v18 = vld [vmem:[#allocation2 + $0xc9] sm:$0xff]  ;;  %v12924_v30 = vld [vmem:[#allocation32_spill] sm:$0xff] }
 0x214   : > { %v11265_v56 = vld [vmem:[#allocation2 + $0xc8] sm:$0xff]  ;;  %v12922_v47 = vld [vmem:[#allocation97_spill] sm:$0xff]  ;;  %9082 = vmatprep.mubr.msk.f32.mxu1 %vm171_vm1, %v11261_v26  ;;  %12923 = vst [vmem:[#allocation29_spill] sm:$0xff] %v11274_v18  ;;  %v1774_v34 = vadd.f32 %v12924_v30, %v1384_v51  ;;  %v3329_v45 = vadd.f32 %v11131_v55, %v2939_v13  ;;  %v12929_v19 = vld [vmem:[#allocation67_spill] sm:$0xff]  ;;  %v9002_v30 = vpop.f32.mrf.mxu1 }
 0x215   : > { %12921 = vst [vmem:[#allocation79_spill] sm:$0xff] %v11265_v56  ;;  %v2942_v62 = vadd.f32 %v12922_v47, %v2551_v37  ;;  %v12925_v43 = vld [vmem:[#allocation33_spill] sm:$0xff]  ;;  %v9043_v37 = vpop.f32.mrf.mxu0  ;;  %9083 = vmatmul.mubr.msk.f32.gmra.mxu1 %vm171_vm1, %v11274_v18  ;;  %9133 = vmatmul.mubr.msk.f32.gmra.mxu0 %vm171_vm1, %v11265_v56  ;;  %v12928_v48 = vld [vmem:[#allocation98_spill] sm:$0xff]  ;;  %3782 = vst.msk [vmem:[#allocation2 + $0x111] sm:$0xff] %vm171_vm1, %v3750_v2  ;;  %v3749_v24 = vmax.f32 %v3717_v46, 0.0 }
 0x216   : > { %v1386_v14 = vadd.f32 %v12925_v43, %v990_v23  ;;  %v12926_v16 = vld [vmem:[#allocation65_spill] sm:$0xff]  ;;  %v2941_v17 = vadd.f32 %v12928_v48, %v2550_v44  ;;  %v3720_v51 = vadd.f32 %v9043_v37, %v3330_v41  ;;  %v2552_v23 = vadd.f32 %v12929_v19, %v2162_v58  ;;  %v12930_v38 = vld [vmem:[#allocation70_spill] sm:$0xff]  ;;  %v12933_v13 = vld [vmem:[#allocation99_spill] sm:$0xff] }
 0x217   : > { %v2553_v3 = vadd.f32 %v12927_v4, %v12926_v16  ;;  %v2164_v47 = vadd.f32 %v12930_v38, %v1774_v34  ;;  %v3648_v43 = vpop.f32.mrf.mxu0  ;;  %v11289_v16 = vld [vmem:[#allocation2 + $0xd9] sm:$0xff]  ;;  %v3332_v55 = vadd.f32 %v11163_v5, %v2942_v62  ;;  %3781 = vst.msk [vmem:[#allocation2 + $0x109] sm:$0xff] %vm171_vm1, %v3749_v24  ;;  %v11302_v58 = vld [vmem:[#allocation2 + $0xe1] sm:$0xff] }
 0x218   : > { %v11291_v4 = vld [vmem:[#allocation2 + $0xd8] sm:$0xff]  ;;  %v11293_v18 = vld [vmem:[#allocation2 + $0xe0] sm:$0xff]  ;;  %v3752_v2 = vmax.f32 %v3720_v51, 0.0  ;;  %v3719_v41 = vadd.f32 %v3648_v43, %v3329_v45  ;;  %9085 = vmatprep.mubr.msk.f32.mxu1 %vm171_vm1, %v11289_v16  ;;  %12934 = vst [vmem:[#allocation42_spill] sm:$0xff] %v11302_v58  ;;  %v12935_v46 = vld [vmem:[#allocation34_spill] sm:$0xff]  ;;  %v3331_v62 = vadd.f32 %v11195_v28, %v2941_v17 }
 0x219   : > { %12931 = vst [vmem:[#allocation30_spill] sm:$0xff] %v11291_v4  ;;  %12932 = vst [vmem:[#allocation39_spill] sm:$0xff] %v11293_v18  ;;  %v2944_v44 = vadd.f32 %v12933_v13, %v2553_v3  ;;  %9135 = vmatprep.mubr.msk.f32.mxu0 %vm171_vm1, %v11291_v4  ;;  %v1776_v34 = vadd.f32 %v12935_v46, %v1386_v14  ;;  %v12936_v37 = vld [vmem:[#allocation69_spill] sm:$0xff]  ;;  %v12937_v48 = vld [vmem:[#allocation68_spill] sm:$0xff]  ;;  %v9046_v5 = vpop.f32.mrf.mxu0  ;;  %9086 = vmatmul.mubr.msk.f32.gmra.mxu1 %vm171_vm1, %v11302_v58  ;;  %v3288_v13 = vpop.f32.mrf.mxu1 }
 0x21a   : > { %v2555_v19 = vadd.f32 %v12937_v48, %v12936_v37  ;;  %9136 = vmatmul.mubr.msk.f32.gmra.mxu0 %vm171_vm1, %v11293_v18  ;;  %v2943_v3 = vadd.f32 %v10949_v53, %v2552_v23  ;;  %3784 = vst.msk [vmem:[#allocation2 + $0x129] sm:$0xff] %vm171_vm1, %v3752_v2  ;;  %v3751_v45 = vmax.f32 %v3719_v41, 0.0  ;;  %v3722_v24 = vadd.f32 %v9046_v5, %v3332_v55  ;;  %v12938_v51 = vld [vmem:[#allocation71_spill] sm:$0xff]  ;;  %v12939_v38 = vld [vmem:[#allocation74_spill] sm:$0xff]  ;;  %v11320_v58 = vld [vmem:[#allocation2 + $0xf8] sm:$0xff] }
 0x21b   : > { %v2554_v14 = vadd.f32 %v12938_v51, %v2164_v47  ;;  %v2166_v43 = vadd.f32 %v12939_v38, %v1776_v34  ;;  %v3658_v46 = vpop.f32.mrf.mxu0  ;;  %v11316_v37 = vld [vmem:[#allocation2 + $0xf1] sm:$0xff]  ;;  %12941 = vst [vmem:[#allocation80_spill] sm:$0xff] %v11320_v58  ;;  %v3334_v28 = vadd.f32 %v11227_v12, %v2944_v44  ;;  %v12942_v17 = vld [vmem:[#allocation101_spill] sm:$0xff]  ;;  %v9005_v51 = vpop.f32.mrf.mxu1 }
 0x21c   : > { %v11318_v48 = vld [vmem:[#allocation2 + $0xf0] sm:$0xff]  ;;  %v2946_v53 = vadd.f32 %v12942_v17, %v2555_v19  ;;  %3783 = vst.msk [vmem:[#allocation2 + $0x121] sm:$0xff] %vm171_vm1, %v3751_v45  ;;  %v3754_v23 = vmax.f32 %v3722_v24, 0.0  ;;  %v3721_v55 = vadd.f32 %v3658_v46, %v3331_v62  ;;  %9088 = vmatprep.mubr.msk.f32.mxu1 %vm171_vm1, %v11316_v37  ;;  %v11329_v47 = vld [vmem:[#allocation2 + $0xf9] sm:$0xff]  ;;  %v3333_v12 = vadd.f32 %v11259_v25, %v2943_v3 }
 0x21d   : > { %12940 = vst [vmem:[#allocation90_spill] sm:$0xff] %v11318_v48  ;;  %9138 = vmatprep.mubr.msk.f32.mxu0 %vm171_vm1, %v11318_v48  ;;  %12943 = vst [vmem:[#allocation18_spill] sm:$0xff] %v11329_v47  ;;  %v12944_v2 = vld [vmem:[#allocation73_spill] sm:$0xff]  ;;  %v12945_v41 = vld [vmem:[#allocation72_spill] sm:$0xff]  ;;  %v9049_v5 = vpop.f32.mrf.mxu0  ;;  %9089 = vmatmul.mubr.msk.f32.gmra.mxu1 %vm171_vm1, %v11329_v47  ;;  %v2945_v44 = vadd.f32 %v10960_v61, %v2554_v14 }
 0x21e   : > { %v2557_v34 = vadd.f32 %v12945_v41, %v12944_v2  ;;  %9139 = vmatmul.mubr.msk.f32.gmra.mxu0 %vm171_vm1, %v11320_v58  ;;  %3786 = vst.msk [vmem:[#allocation2 + $0x141] sm:$0xff] %vm171_vm1, %v3754_v23  ;;  %v3753_v19 = vmax.f32 %v3721_v55, 0.0  ;;  %v3724_v62 = vadd.f32 %v9049_v5, %v3334_v28  ;;  %v12946_v45 = vld [vmem:[#allocation75_spill] sm:$0xff]  ;;  %v11343_v17 = vld [vmem:[#allocation2 + $0x108] sm:$0xff]  ;;  %v3336_v41 = vadd.f32 %v9002_v30, %v2946_v53  ;;  %v3298_v53 = vpop.f32.mrf.mxu1 }
 0x21f   : > { %v2556_v24 = vadd.f32 %v12946_v45, %v2166_v43  ;;  %v3668_v38 = vpop.f32.mrf.mxu0  ;;  %v11341_v46 = vld [vmem:[#allocation2 + $0x109] sm:$0xff]  ;;  %12947 = vst [vmem:[#allocation17_spill] sm:$0xff] %v11343_v17  ;;  %9141 = vmatprep.mubr.msk.f32.mxu0 %vm171_vm1, %v11343_v17  ;;  %v11353_v3 = vld [vmem:[#allocation2 + $0x111] sm:$0xff] }
 0x220   : > { %v11345_v2 = vld [vmem:[#allocation2 + $0x110] sm:$0xff]  ;;  %v2948_v47 = vadd.f32 %v10966_v15, %v2557_v34  ;;  %3785 = vst.msk [vmem:[#allocation2 + $0x139] sm:$0xff] %vm171_vm1, %v3753_v19  ;;  %v3756_v61 = vmax.f32 %v3724_v62, 0.0  ;;  %v3723_v25 = vadd.f32 %v3668_v38, %v3333_v12  ;;  %9091 = vmatprep.mubr.msk.f32.mxu1 %vm171_vm1, %v11341_v46  ;;  %v3335_v15 = vadd.f32 %v3288_v13, %v2945_v44 }
 0x221   : > { %12948 = vst [vmem:[#allocation19_spill] sm:$0xff] %v11345_v2  ;;  %v9052_v14 = vpop.f32.mrf.mxu0  ;;  %9092 = vmatmul.mubr.msk.f32.gmra.mxu1 %vm171_vm1, %v11353_v3  ;;  %v2947_v30 = vadd.f32 %v10973_v31, %v2556_v24  ;;  %v11372_v31 = vld [vmem:[#allocation2 + $0x129] sm:$0xff] }
 0x222   : > { %9142 = vmatmul.mubr.msk.f32.gmra.mxu0 %vm171_vm1, %v11345_v2  ;;  %3788 = vst.msk [vmem:[#allocation2 + $0x159] sm:$0xff] %vm171_vm1, %v3756_v61  ;;  %v3755_v43 = vmax.f32 %v3723_v25, 0.0  ;;  %v3726_v28 = vadd.f32 %v9052_v14, %v3336_v41  ;;  %v3338_v12 = vadd.f32 %v9005_v51, %v2948_v47 }
 0x223   : > { %v3678_v23 = vpop.f32.mrf.mxu0  ;;  %v11361_v55 = vld [vmem:[#allocation2 + $0x121] sm:$0xff]  ;;  %v3337_v47 = vadd.f32 %v3298_v53, %v2947_v30 }
 0x224   : > { %v11363_v34 = vld [vmem:[#allocation2 + $0x120] sm:$0xff]  ;;  %v11365_v5 = vld [vmem:[#allocation2 + $0x128] sm:$0xff]  ;;  %3787 = vst.msk [vmem:[#allocation2 + $0x151] sm:$0xff] %vm171_vm1, %v3755_v43  ;;  %v3758_v19 = vmax.f32 %v3726_v28, 0.0  ;;  %v3725_v62 = vadd.f32 %v3678_v23, %v3335_v15  ;;  %9094 = vmatprep.mubr.msk.f32.mxu1 %vm171_vm1, %v11361_v55 }
 0x225   : > { %12949 = vst [vmem:[#allocation41_spill] sm:$0xff] %v11363_v34  ;;  %12950 = vst [vmem:[#allocation40_spill] sm:$0xff] %v11365_v5  ;;  %9144 = vmatprep.mubr.msk.f32.mxu0 %vm171_vm1, %v11363_v34  ;;  %v9055_v13 = vpop.f32.mrf.mxu0  ;;  %9095 = vmatmul.mubr.msk.f32.gmra.mxu1 %vm171_vm1, %v11372_v31  ;;  %v11390_v14 = vld [vmem:[#allocation2 + $0x141] sm:$0xff] }
 0x226   : > { %9145 = vmatmul.mubr.msk.f32.gmra.mxu0 %vm171_vm1, %v11365_v5  ;;  %3790 = vst.msk [vmem:[#allocation2 + $0x171] sm:$0xff] %vm171_vm1, %v3758_v19  ;;  %v3757_v44 = vmax.f32 %v3725_v62, 0.0  ;;  %v3728_v45 = vadd.f32 %v9055_v13, %v3338_v12  ;;  %v4508_v23 = vld [vmem:[#allocation2 + $0x2] sm:$0xff] }
 0x227   : > { %v3688_v24 = vpop.f32.mrf.mxu0  ;;  %v11379_v51 = vld [vmem:[#allocation2 + $0x139] sm:$0xff] }
 0x228   : > { %v11381_v38 = vld [vmem:[#allocation2 + $0x138] sm:$0xff]  ;;  %v11383_v41 = vld [vmem:[#allocation2 + $0x140] sm:$0xff]  ;;  %3789 = vst.msk [vmem:[#allocation2 + $0x169] sm:$0xff] %vm171_vm1, %v3757_v44  ;;  %v3760_v61 = vmax.f32 %v3728_v45, 0.0  ;;  %v3727_v25 = vadd.f32 %v3688_v24, %v3337_v47  ;;  %9097 = vmatprep.mubr.msk.f32.mxu1 %vm171_vm1, %v11379_v51  ;;  %v4509_v47 = vld [vmem:[#allocation2 + $0xa] sm:$0xff] }
 0x229   : > { %12951 = vst [vmem:[#allocation82_spill] sm:$0xff] %v11381_v38  ;;  %12952 = vst [vmem:[#allocation3_spill] sm:$0xff] %v11383_v41  ;;  %9147 = vmatprep.mubr.msk.f32.mxu0 %vm171_vm1, %v11381_v38  ;;  %9098 = vmatmul.mubr.msk.f32.gmra.mxu1 %vm171_vm1, %v11390_v14  ;;  %v11408_v53 = vld [vmem:[#allocation2 + $0x159] sm:$0xff] }
 0x22a   : > { %9148 = vmatmul.mubr.msk.f32.gmra.mxu0 %vm171_vm1, %v11383_v41  ;;  %3792 = vst.msk [vmem:[#allocation2 + $0x189] sm:$0xff] %vm171_vm1, %v3760_v61  ;;  %v3759_v15 = vmax.f32 %v3727_v25, 0.0  ;;  %v11436_v24 = vld [vmem:[#allocation2 + $0x1a] sm:$0xff] }
 0x22b   : > { %v11397_v30 = vld [vmem:[#allocation2 + $0x151] sm:$0xff] }
 0x22c   : > { %v11399_v43 = vld [vmem:[#allocation2 + $0x150] sm:$0xff]  ;;  %v11401_v28 = vld [vmem:[#allocation2 + $0x158] sm:$0xff]  ;;  %3791 = vst.msk [vmem:[#allocation2 + $0x181] sm:$0xff] %vm171_vm1, %v3759_v15  ;;  %9100 = vmatprep.mubr.msk.f32.mxu1 %vm171_vm1, %v11397_v30  ;;  %v9060_v44 = vpop.f32.mrf.mxu1 }
 0x22d   : > { %12953 = vst [vmem:[#allocation4_spill] sm:$0xff] %v11399_v43  ;;  %12954 = vst [vmem:[#allocation43_spill] sm:$0xff] %v11401_v28  ;;  %9150 = vmatprep.mubr.msk.f32.mxu0 %vm171_vm1, %v11399_v43  ;;  %9101 = vmatmul.mubr.msk.f32.gmra.mxu1 %vm171_vm1, %v11408_v53  ;;  %v11424_v13 = vld [vmem:[#allocation2 + $0x171] sm:$0xff]  ;;  %v9110_v45 = vpop.f32.mrf.mxu0 }
 0x22e   : > { %9151 = vmatmul.mubr.msk.f32.gmra.mxu0 %vm171_vm1, %v11401_v28  ;;  %v11441_v61 = vld [vmem:[%s12604_s2 + $0x18] sm:$0xf]  ;;  %v11448_v25 = vadd.f32 %v9110_v45, %v9060_v44  ;;  %v11492_v45 = vld [vmem:[#allocation2 + $0x62] sm:$0xff] }
 0x22f   : > { %v11414_v12 = vld [vmem:[#allocation2 + $0x169] sm:$0xff]  ;;  %v12957_v15 = vld [vmem:[#allocation76_spill] sm:$0xff] }
 0x230   : > { %v11416_v19 = vld [vmem:[#allocation2 + $0x168] sm:$0xff]  ;;  %v11418_v62 = vld [vmem:[#allocation2 + $0x170] sm:$0xff]  ;;  %9103 = vmatprep.mubr.msk.f32.mxu1 %vm171_vm1, %v11414_v12  ;;  %12956 = vst [vmem:[#allocation95_spill] sm:$0xff] %v11448_v25  ;;  %v11504_v25 = vld [vmem:[#allocation2 + $0x7a] sm:$0xff] }
 0x231   : > { %12955 = vst [vmem:[#allocation46_spill] sm:$0xff] %v11416_v19  ;;  %9153 = vmatprep.mubr.msk.f32.mxu0 %vm171_vm1, %v11416_v19  ;;  %9104 = vmatmul.mubr.msk.f32.gmra.mxu1 %vm171_vm1, %v11424_v13  ;;  %v11486_v44 = vld [vmem:[#allocation2 + $0x52] sm:$0xff] }
 0x232   : > { %9154 = vmatmul.mubr.msk.f32.gmra.mxu0 %vm171_vm1, %v11418_v62  ;;  %9158 = vmatprep.mubr.msk.f32.mxu1 %vm171_vm1, %v4508_v23  ;;  %v11468_v23 = vld [vmem:[#allocation2 + $0x32] sm:$0xff] }
 0x233   : > { %9208 = vmatprep.mubr.msk.f32.mxu0 %vm171_vm1, %v11038_v40  ;;  %v11446_v40 = vld [vmem:[%s12604_s2 + $0x1c] sm:$0xf] }
 0x235   : > { %9159 = vmatmul.mubr.msk.f32.vlgmr.msra.gmra.mxu1 %vm171_vm1, %v4509_v47  ;;  %v11480_v47 = vld [vmem:[#allocation2 + $0x4a] sm:$0xff] }
 0x236   : > { %9209 = vmatmul.mubr.msk.f32.vlgmr.msra.gmra.mxu0 %vm171_vm1, %v11040_v6  ;;  %9257 = vmatpush3.msk.msra.mxu1 %vm445_vm0, %v12957_v15  ;;  %v11458_v6 = vld [vmem:[#allocation2 + $0x22] sm:$0xff]  ;;  %v11498_v15 = vld [vmem:[#allocation2 + $0x6a] sm:$0xff] }
 0x237   : > { %9161 = vmatprep.mubr.msk.f32.mxu1 %vm171_vm1, %v11436_v24  ;;  %9211 = vmatprep.mubr.msk.f32.mxu0 %vm171_vm1, %v11070_v57 }
 0x238   : > { %9307 = vmatpush3.msk.msra.mxu0 %vm445_vm0, %v11014_v1  ;;  %9356 = vmatprep.subr.msk.mxu1 %vm445_vm0, %v11441_v61  ;;  %v11474_v1 = vld [vmem:[#allocation2 + $0x3a] sm:$0xff] }
 0x239   : > { %9406 = vmatprep.subr.msk.mxu0 %vm445_vm0, %v11446_v40  ;;  %9162 = vmatmul.mubr.msk.f32.gmra.mxu1 %vm171_vm1, %v11458_v6 }
 0x23a   : > { %9212 = vmatmul.mubr.msk.f32.gmra.mxu0 %vm171_vm1, %v11072_v33  ;;  %9164 = vmatprep.mubr.msk.f32.mxu1 %vm171_vm1, %v11468_v23 }
 0x23b   : > { %9214 = vmatprep.mubr.msk.f32.mxu0 %vm171_vm1, %v11103_v52 }
 0x23d   : > { %9165 = vmatmul.mubr.msk.f32.gmra.mxu1 %vm171_vm1, %v11474_v1 }
 0x23e   : > { %9215 = vmatmul.mubr.msk.f32.gmra.mxu0 %vm171_vm1, %v11105_v60  ;;  %9167 = vmatprep.mubr.msk.f32.mxu1 %vm171_vm1, %v11480_v47 }
 0x23f   : > { %9217 = vmatprep.mubr.msk.f32.mxu0 %vm171_vm1, %v11135_v9  ;;  %v11626_v9 = vld [vmem:[#allocation2 + $0x180] sm:$0xff] }
 0x240   : > { %12958 = vst [vmem:[#allocation83_spill] sm:$0xff] %v11626_v9 }
 0x241   : > { %9168 = vmatmul.mubr.msk.f32.gmra.mxu1 %vm171_vm1, %v11486_v44 }
 0x242   : > { %9218 = vmatmul.mubr.msk.f32.gmra.mxu0 %vm171_vm1, %v11137_v36  ;;  %9170 = vmatprep.mubr.msk.f32.mxu1 %vm171_vm1, %v11492_v45  ;;  %v11510_v36 = vld [vmem:[#allocation2 + $0x82] sm:$0xff] }
 0x243   : > { %9220 = vmatprep.mubr.msk.f32.mxu0 %vm171_vm1, %v11167_v39  ;;  %v11516_v39 = vld [vmem:[#allocation2 + $0x92] sm:$0xff] }
 0x245   : > { %9171 = vmatmul.mubr.msk.f32.gmra.mxu1 %vm171_vm1, %v11498_v15 }
 0x246   : > { %9221 = vmatmul.mubr.msk.f32.gmra.mxu0 %vm171_vm1, %v11169_v63  ;;  %9173 = vmatprep.mubr.msk.f32.mxu1 %vm171_vm1, %v11504_v25  ;;  %v11522_v63 = vld [vmem:[#allocation2 + $0x9a] sm:$0xff] }
 0x247   : > { %9223 = vmatprep.mubr.msk.f32.mxu0 %vm171_vm1, %v11199_v50  ;;  %v11528_v50 = vld [vmem:[#allocation2 + $0xaa] sm:$0xff] }
 0x249   : > { %9174 = vmatmul.mubr.msk.f32.gmra.mxu1 %vm171_vm1, %v11510_v36 }
 0x24a   : > { %9224 = vmatmul.mubr.msk.f32.gmra.mxu0 %vm171_vm1, %v11201_v29  ;;  %9176 = vmatprep.mubr.msk.f32.mxu1 %vm171_vm1, %v11516_v39  ;;  %v11534_v29 = vld [vmem:[#allocation2 + $0xb2] sm:$0xff] }
 0x24b   : > { %9226 = vmatprep.mubr.msk.f32.mxu0 %vm171_vm1, %v11231_v11  ;;  %v11540_v11 = vld [vmem:[#allocation2 + $0xc2] sm:$0xff] }
 0x24d   : > { %9177 = vmatmul.mubr.msk.f32.gmra.mxu1 %vm171_vm1, %v11522_v63 }
 0x24e   : > { %9227 = vmatmul.mubr.msk.f32.gmra.mxu0 %vm171_vm1, %v11233_v0  ;;  %9179 = vmatprep.mubr.msk.f32.mxu1 %vm171_vm1, %v11528_v50  ;;  %v11546_v0 = vld [vmem:[#allocation2 + $0xca] sm:$0xff] }
 0x24f   : > { %9229 = vmatprep.mubr.msk.f32.mxu0 %vm171_vm1, %v11263_v20  ;;  %v11552_v20 = vld [vmem:[#allocation2 + $0xda] sm:$0xff] }
 0x251   : > { %9180 = vmatmul.mubr.msk.f32.gmra.mxu1 %vm171_vm1, %v11534_v29 }
 0x252   : > { %9230 = vmatmul.mubr.msk.f32.gmra.mxu0 %vm171_vm1, %v11265_v56  ;;  %9182 = vmatprep.mubr.msk.f32.mxu1 %vm171_vm1, %v11540_v11  ;;  %v11558_v56 = vld [vmem:[#allocation2 + $0xe2] sm:$0xff] }
 0x253   : > { %9232 = vmatprep.mubr.msk.f32.mxu0 %vm171_vm1, %v11291_v4  ;;  %v11564_v4 = vld [vmem:[#allocation2 + $0xf2] sm:$0xff] }
 0x255   : > { %9183 = vmatmul.mubr.msk.f32.gmra.mxu1 %vm171_vm1, %v11546_v0 }
 0x256   : > { %9233 = vmatmul.mubr.msk.f32.gmra.mxu0 %vm171_vm1, %v11293_v18  ;;  %9185 = vmatprep.mubr.msk.f32.mxu1 %vm171_vm1, %v11552_v20  ;;  %v11570_v18 = vld [vmem:[#allocation2 + $0xfa] sm:$0xff] }
 0x257   : > { %9235 = vmatprep.mubr.msk.f32.mxu0 %vm171_vm1, %v11318_v48  ;;  %v11576_v48 = vld [vmem:[#allocation2 + $0x10a] sm:$0xff] }
 0x259   : > { %9186 = vmatmul.mubr.msk.f32.gmra.mxu1 %vm171_vm1, %v11558_v56 }
 0x25a   : > { %9236 = vmatmul.mubr.msk.f32.gmra.mxu0 %vm171_vm1, %v11320_v58  ;;  %9188 = vmatprep.mubr.msk.f32.mxu1 %vm171_vm1, %v11564_v4  ;;  %v11582_v58 = vld [vmem:[#allocation2 + $0x112] sm:$0xff] }
 0x25b   : > { %9238 = vmatprep.mubr.msk.f32.mxu0 %vm171_vm1, %v11343_v17  ;;  %v11588_v17 = vld [vmem:[#allocation2 + $0x122] sm:$0xff] }
 0x25d   : > { %9189 = vmatmul.mubr.msk.f32.gmra.mxu1 %vm171_vm1, %v11570_v18 }
 0x25e   : > { %9239 = vmatmul.mubr.msk.f32.gmra.mxu0 %vm171_vm1, %v11345_v2  ;;  %9191 = vmatprep.mubr.msk.f32.mxu1 %vm171_vm1, %v11576_v48  ;;  %v11594_v2 = vld [vmem:[#allocation2 + $0x12a] sm:$0xff] }
 0x25f   : > { %9241 = vmatprep.mubr.msk.f32.mxu0 %vm171_vm1, %v11363_v34  ;;  %v11600_v34 = vld [vmem:[#allocation2 + $0x13a] sm:$0xff] }
 0x261   : > { %9192 = vmatmul.mubr.msk.f32.gmra.mxu1 %vm171_vm1, %v11582_v58 }
 0x262   : > { %9242 = vmatmul.mubr.msk.f32.gmra.mxu0 %vm171_vm1, %v11365_v5  ;;  %9194 = vmatprep.mubr.msk.f32.mxu1 %vm171_vm1, %v11588_v17  ;;  %v11606_v5 = vld [vmem:[#allocation2 + $0x142] sm:$0xff] }
 0x263   : > { %9244 = vmatprep.mubr.msk.f32.mxu0 %vm171_vm1, %v11381_v38  ;;  %v11612_v38 = vld [vmem:[#allocation2 + $0x152] sm:$0xff] }
 0x265   : > { %9195 = vmatmul.mubr.msk.f32.gmra.mxu1 %vm171_vm1, %v11594_v2 }
 0x266   : > { %9245 = vmatmul.mubr.msk.f32.gmra.mxu0 %vm171_vm1, %v11383_v41  ;;  %9197 = vmatprep.mubr.msk.f32.mxu1 %vm171_vm1, %v11600_v34  ;;  %v11618_v41 = vld [vmem:[#allocation2 + $0x15a] sm:$0xff] }
 0x267   : > { %9247 = vmatprep.mubr.msk.f32.mxu0 %vm171_vm1, %v11399_v43  ;;  %v11624_v43 = vld [vmem:[#allocation2 + $0x16a] sm:$0xff] }
 0x269   : > { %9198 = vmatmul.mubr.msk.f32.gmra.mxu1 %vm171_vm1, %v11606_v5 }
 0x26a   : > { %9248 = vmatmul.mubr.msk.f32.gmra.mxu0 %vm171_vm1, %v11401_v28  ;;  %9200 = vmatprep.mubr.msk.f32.mxu1 %vm171_vm1, %v11612_v38  ;;  %v11632_v28 = vld [vmem:[#allocation2 + $0x172] sm:$0xff] }
 0x26b   : > { %9250 = vmatprep.mubr.msk.f32.mxu0 %vm171_vm1, %v11416_v19  ;;  %v11634_v19 = vld [vmem:[#allocation2 + $0x188] sm:$0xff] }
 0x26d   : > { %9201 = vmatmul.mubr.msk.f32.gmra.mxu1 %vm171_vm1, %v11618_v41 }
 0x26e   : > { %9251 = vmatmul.mubr.msk.f32.gmra.mxu0 %vm171_vm1, %v11418_v62  ;;  %9203 = vmatprep.mubr.msk.f32.mxu1 %vm171_vm1, %v11624_v43 }
 0x26f   : > { %9253 = vmatprep.mubr.msk.f32.mxu0 %vm171_vm1, %v11626_v9  ;;  %v11651_v9 = vld [vmem:[%s12604_s2 + $0x20] sm:$0xf] }
 0x271   : > { %9204 = vmatmul.mubr.msk.f32.gmra.mxu1 %vm171_vm1, %v11632_v28 }
 0x272   : > { %9254 = vmatmul.mubr.msk.f32.gmra.mxu0 %vm171_vm1, %v11634_v19  ;;  %9258 = vmatprep.mubr.msk.f32.mxu1 %vm171_vm1, %v11036_v59  ;;  %v12959_v59 = vld [vmem:[#allocation16_spill] sm:$0xff] }
 0x273   : > { %9308 = vmatprep.mubr.msk.f32.mxu0 %vm171_vm1, %v11436_v24  ;;  %v12961_v24 = vld [vmem:[#allocation29_spill] sm:$0xff] }
 0x275   : > { %9259 = vmatmul.mubr.msk.f32.vlgmr.msra.gmra.mxu1 %vm171_vm1, %v11049_v42  ;;  %v12960_v42 = vld [vmem:[#allocation36_spill] sm:$0xff] }
 0x276   : > { %9309 = vmatmul.mubr.msk.f32.vlgmr.msra.gmra.mxu0 %vm171_vm1, %v11458_v6  ;;  %9357 = vmatpush3.msk.msra.mxu1 %vm445_vm0, %v11441_v61  ;;  %v12962_v61 = vld [vmem:[#allocation42_spill] sm:$0xff]  ;;  %v12965_v6 = vld [vmem:[#allocation77_spill] sm:$0xff] }
 0x277   : > { %9261 = vmatprep.mubr.msk.f32.mxu1 %vm171_vm1, %v11068_v35  ;;  %9311 = vmatprep.mubr.msk.f32.mxu0 %vm171_vm1, %v11468_v23 }
 0x278   : > { %9407 = vmatpush3.msk.msra.mxu0 %vm445_vm0, %v11446_v40  ;;  %9456 = vmatprep.subr.msk.mxu1 %vm445_vm0, %v11651_v9  ;;  %v12963_v40 = vld [vmem:[#allocation18_spill] sm:$0xff] }
 0x279   : > { %9262 = vmatmul.mubr.msk.f32.gmra.mxu1 %vm171_vm1, %v11081_v21 }
 0x27a   : > { %9312 = vmatmul.mubr.msk.f32.gmra.mxu0 %vm171_vm1, %v11474_v1  ;;  %9264 = vmatprep.mubr.msk.f32.mxu1 %vm171_vm1, %v11101_v32 }
 0x27b   : > { %9314 = vmatprep.mubr.msk.f32.mxu0 %vm171_vm1, %v11480_v47 }
 0x27d   : > { %9265 = vmatmul.mubr.msk.f32.gmra.mxu1 %vm171_vm1, %v11114_v27 }
 0x27e   : > { %9315 = vmatmul.mubr.msk.f32.gmra.mxu0 %vm171_vm1, %v11486_v44  ;;  %9267 = vmatprep.mubr.msk.f32.mxu1 %vm171_vm1, %v11133_v8 }
 0x27f   : > { %9317 = vmatprep.mubr.msk.f32.mxu0 %vm171_vm1, %v11492_v45 }
 0x281   : > { %9268 = vmatmul.mubr.msk.f32.gmra.mxu1 %vm171_vm1, %v11146_v7 }
 0x282   : > { %9318 = vmatmul.mubr.msk.f32.gmra.mxu0 %vm171_vm1, %v11498_v15  ;;  %9270 = vmatprep.mubr.msk.f32.mxu1 %vm171_vm1, %v11165_v49 }
 0x283   : > { %9320 = vmatprep.mubr.msk.f32.mxu0 %vm171_vm1, %v11504_v25 }
 0x285   : > { %9271 = vmatmul.mubr.msk.f32.gmra.mxu1 %vm171_vm1, %v11178_v22 }
 0x286   : > { %9321 = vmatmul.mubr.msk.f32.gmra.mxu0 %vm171_vm1, %v11510_v36  ;;  %9273 = vmatprep.mubr.msk.f32.mxu1 %vm171_vm1, %v11197_v54 }
 0x287   : > { %9323 = vmatprep.mubr.msk.f32.mxu0 %vm171_vm1, %v11516_v39 }
 0x289   : > { %9274 = vmatmul.mubr.msk.f32.gmra.mxu1 %vm171_vm1, %v11210_v10 }
 0x28a   : > { %9324 = vmatmul.mubr.msk.f32.gmra.mxu0 %vm171_vm1, %v11522_v63  ;;  %9276 = vmatprep.mubr.msk.f32.mxu1 %vm171_vm1, %v12959_v59 }
 0x28b   : > { %9326 = vmatprep.mubr.msk.f32.mxu0 %vm171_vm1, %v11528_v50 }
 0x28d   : > { %9277 = vmatmul.mubr.msk.f32.gmra.mxu1 %vm171_vm1, %v12960_v42 }
 0x28e   : > { %9327 = vmatmul.mubr.msk.f32.gmra.mxu0 %vm171_vm1, %v11534_v29  ;;  %9279 = vmatprep.mubr.msk.f32.mxu1 %vm171_vm1, %v11261_v26 }
 0x28f   : > { %9329 = vmatprep.mubr.msk.f32.mxu0 %vm171_vm1, %v11540_v11 }
 0x291   : > { %9280 = vmatmul.mubr.msk.f32.gmra.mxu1 %vm171_vm1, %v12961_v24 }
 0x292   : > { %9330 = vmatmul.mubr.msk.f32.gmra.mxu0 %vm171_vm1, %v11546_v0  ;;  %9282 = vmatprep.mubr.msk.f32.mxu1 %vm171_vm1, %v11289_v16 }
 0x293   : > { %9332 = vmatprep.mubr.msk.f32.mxu0 %vm171_vm1, %v11552_v20 }
 0x295   : > { %9283 = vmatmul.mubr.msk.f32.gmra.mxu1 %vm171_vm1, %v12962_v61 }
 0x296   : > { %9333 = vmatmul.mubr.msk.f32.gmra.mxu0 %vm171_vm1, %v11558_v56  ;;  %9285 = vmatprep.mubr.msk.f32.mxu1 %vm171_vm1, %v11316_v37 }
 0x297   : > { %9335 = vmatprep.mubr.msk.f32.mxu0 %vm171_vm1, %v11564_v4 }
 0x299   : > { %9286 = vmatmul.mubr.msk.f32.gmra.mxu1 %vm171_vm1, %v12963_v40 }
 0x29a   : > { %9336 = vmatmul.mubr.msk.f32.gmra.mxu0 %vm171_vm1, %v11570_v18  ;;  %9288 = vmatprep.mubr.msk.f32.mxu1 %vm171_vm1, %v11341_v46 }
 0x29b   : > { %9338 = vmatprep.mubr.msk.f32.mxu0 %vm171_vm1, %v11576_v48 }
 0x29d   : > { %9289 = vmatmul.mubr.msk.f32.gmra.mxu1 %vm171_vm1, %v11353_v3 }
 0x29e   : > { %9339 = vmatmul.mubr.msk.f32.gmra.mxu0 %vm171_vm1, %v11582_v58  ;;  %9291 = vmatprep.mubr.msk.f32.mxu1 %vm171_vm1, %v11361_v55  ;;  %v11771_v58 = vld [vmem:[#allocation2 + $0x181] sm:$0xff] }
 0x29f   : > { %9341 = vmatprep.mubr.msk.f32.mxu0 %vm171_vm1, %v11588_v17 }
 0x2a1   : > { %9292 = vmatmul.mubr.msk.f32.gmra.mxu1 %vm171_vm1, %v11372_v31 }
 0x2a2   : > { %9342 = vmatmul.mubr.msk.f32.gmra.mxu0 %vm171_vm1, %v11594_v2  ;;  %9294 = vmatprep.mubr.msk.f32.mxu1 %vm171_vm1, %v11379_v51  ;;  %v11773_v2 = vld [vmem:[#allocation2 + $0x182] sm:$0xff] }
 0x2a3   : > { %9344 = vmatprep.mubr.msk.f32.mxu0 %vm171_vm1, %v11600_v34  ;;  %v11779_v34 = vld [vmem:[#allocation2 + $0x189] sm:$0xff] }
 0x2a5   : > { %9295 = vmatmul.mubr.msk.f32.gmra.mxu1 %vm171_vm1, %v11390_v14 }
 0x2a6   : > { %9345 = vmatmul.mubr.msk.f32.gmra.mxu0 %vm171_vm1, %v11606_v5  ;;  %9297 = vmatprep.mubr.msk.f32.mxu1 %vm171_vm1, %v11397_v30  ;;  %v11781_v5 = vld [vmem:[#allocation2 + $0x18a] sm:$0xff] }
 0x2a7   : > { %9347 = vmatprep.mubr.msk.f32.mxu0 %vm171_vm1, %v11612_v38  ;;  %v11799_v38 = vpop.f32.mrf.mxu1 }
 0x2a9   : > { %9298 = vmatmul.mubr.msk.f32.gmra.mxu1 %vm171_vm1, %v11408_v53 }
 0x2aa   : > { %9348 = vmatmul.mubr.msk.f32.gmra.mxu0 %vm171_vm1, %v11618_v41  ;;  %9300 = vmatprep.mubr.msk.f32.mxu1 %vm171_vm1, %v11414_v12  ;;  %v11801_v41 = vpop.f32.mrf.mxu0 }
 0x2ab   : > { %9350 = vmatprep.mubr.msk.f32.mxu0 %vm171_vm1, %v11624_v43 }
 0x2ad   : > { %9301 = vmatmul.mubr.msk.f32.gmra.mxu1 %vm171_vm1, %v11424_v13 }
 0x2ae   : > { %9351 = vmatmul.mubr.msk.f32.gmra.mxu0 %vm171_vm1, %v11632_v28  ;;  %9303 = vmatprep.mubr.msk.f32.mxu1 %vm171_vm1, %v11771_v58 }
 0x2af   : > { %9353 = vmatprep.mubr.msk.f32.mxu0 %vm171_vm1, %v11773_v2 }
 0x2b1   : > { %9304 = vmatmul.mubr.msk.f32.gmra.mxu1 %vm171_vm1, %v11779_v34 }
 0x2b2   : > { %9354 = vmatmul.mubr.msk.f32.gmra.mxu0 %vm171_vm1, %v11781_v5  ;;  %9358 = vmatprep.mubr.msk.f32.mxu1 %vm171_vm1, %v11070_v57 }
 0x2b3   : > { %9408 = vmatprep.mubr.msk.f32.mxu0 %vm171_vm1, %v11068_v35 }
 0x2b5   : > { %9359 = vmatmul.mubr.msk.f32.vlgmr.msra.gmra.mxu1 %vm171_vm1, %v11072_v33 }
 0x2b6   : > { %9409 = vmatmul.mubr.msk.f32.vlgmr.msra.gmra.mxu0 %vm171_vm1, %v11081_v21  ;;  %9457 = vmatpush3.msk.msra.mxu1 %vm445_vm0, %v11651_v9  ;;  %v9063_v35 = vpop.f32.mrf.mxu1  ;;  %v12964_v21 = vld [vmem:[#allocation81_spill] sm:$0xff] }
 0x2b7   : > { %9361 = vmatprep.mubr.msk.f32.mxu1 %vm171_vm1, %v11103_v52  ;;  %9411 = vmatprep.mubr.msk.f32.mxu0 %vm171_vm1, %v11101_v32  ;;  %v9113_v57 = vpop.f32.mrf.mxu0 }
 0x2b8   : > { %v11809_v33 = vadd.f32 %v9113_v57, %v9063_v35  ;;  %v4035_v52 = vpop.f32.mrf.mxu1 }
 0x2b9   : > { %9362 = vmatmul.mubr.msk.f32.gmra.mxu1 %vm171_vm1, %v11105_v60  ;;  %v4359_v9 = vpop.f32.mrf.mxu0 }
 0x2ba   : > { %9412 = vmatmul.mubr.msk.f32.gmra.mxu0 %vm171_vm1, %v11114_v27  ;;  %9364 = vmatprep.mubr.msk.f32.mxu1 %vm171_vm1, %v12964_v21  ;;  %v11815_v43 = vadd.f32 %v4359_v9, %v4035_v52  ;;  %v9066_v32 = vpop.f32.mrf.mxu1  ;;  %v12966_v27 = vld [vmem:[#allocation35_spill] sm:$0xff]  ;;  %v12967_v9 = vld [vmem:[#allocation38_spill] sm:$0xff] }
 0x2bb   : > { %9414 = vmatprep.mubr.msk.f32.mxu0 %vm171_vm1, %v11133_v8  ;;  %v9116_v28 = vpop.f32.mrf.mxu0 }
 0x2bc   : > { %v11821_v60 = vadd.f32 %v9116_v28, %v9066_v32  ;;  %v4045_v8 = vpop.f32.mrf.mxu1  ;;  %v12968_v32 = vld [vmem:[#allocation84_spill] sm:$0xff] }
 0x2bd   : > { %9365 = vmatmul.mubr.msk.f32.gmra.mxu1 %vm171_vm1, %v12965_v6  ;;  %v4369_v35 = vpop.f32.mrf.mxu0 }
 0x2be   : > { %9415 = vmatmul.mubr.msk.f32.gmra.mxu0 %vm171_vm1, %v11146_v7  ;;  %9367 = vmatprep.mubr.msk.f32.mxu1 %vm171_vm1, %v12966_v27  ;;  %v11827_v57 = vadd.f32 %v4369_v35, %v4045_v8  ;;  %v9069_v21 = vpop.f32.mrf.mxu1  ;;  %v12969_v35 = vld [vmem:[#allocation78_spill] sm:$0xff] }
 0x2bf   : > { %9417 = vmatprep.mubr.msk.f32.mxu0 %vm171_vm1, %v11165_v49  ;;  %v9119_v52 = vpop.f32.mrf.mxu0 }
 0x2c0   : > { %v11833_v7 = vadd.f32 %v9119_v52, %v9069_v21  ;;  %v4055_v49 = vpop.f32.mrf.mxu1  ;;  %v12970_v21 = vld [vmem:[#allocation15_spill] sm:$0xff] }
 0x2c1   : > { %9368 = vmatmul.mubr.msk.f32.gmra.mxu1 %vm171_vm1, %v12967_v9  ;;  %v4379_v28 = vpop.f32.mrf.mxu0 }
 0x2c2   : > { %9418 = vmatmul.mubr.msk.f32.gmra.mxu0 %vm171_vm1, %v11178_v22  ;;  %9370 = vmatprep.mubr.msk.f32.mxu1 %vm171_vm1, %v12968_v32  ;;  %v11839_v6 = vadd.f32 %v4379_v28, %v4055_v49  ;;  %v9072_v27 = vpop.f32.mrf.mxu1  ;;  %v12971_v28 = vld [vmem:[#allocation37_spill] sm:$0xff] }
 0x2c3   : > { %9420 = vmatprep.mubr.msk.f32.mxu0 %vm171_vm1, %v11197_v54  ;;  %v9122_v8 = vpop.f32.mrf.mxu0 }
 0x2c4   : > { %v11845_v22 = vadd.f32 %v9122_v8, %v9072_v27  ;;  %v4065_v54 = vpop.f32.mrf.mxu1  ;;  %v12972_v27 = vld [vmem:[#allocation87_spill] sm:$0xff] }
 0x2c5   : > { %9371 = vmatmul.mubr.msk.f32.gmra.mxu1 %vm171_vm1, %v12969_v35  ;;  %v4389_v52 = vpop.f32.mrf.mxu0 }
 0x2c6   : > { %9421 = vmatmul.mubr.msk.f32.gmra.mxu0 %vm171_vm1, %v11210_v10  ;;  %9373 = vmatprep.mubr.msk.f32.mxu1 %vm171_vm1, %v12970_v21  ;;  %v11851_v9 = vadd.f32 %v4389_v52, %v4065_v54  ;;  %v9075_v32 = vpop.f32.mrf.mxu1  ;;  %v12973_v52 = vld [vmem:[#allocation79_spill] sm:$0xff] }
 0x2c7   : > { %9423 = vmatprep.mubr.msk.f32.mxu0 %vm171_vm1, %v12959_v59  ;;  %v9125_v49 = vpop.f32.mrf.mxu0 }
 0x2c8   : > { %v11857_v10 = vadd.f32 %v9125_v49, %v9075_v32  ;;  %v4075_v59 = vpop.f32.mrf.mxu1  ;;  %v12974_v32 = vld [vmem:[#allocation30_spill] sm:$0xff] }
 0x2c9   : > { %9374 = vmatmul.mubr.msk.f32.gmra.mxu1 %vm171_vm1, %v12971_v28  ;;  %v4399_v8 = vpop.f32.mrf.mxu0 }
 0x2ca   : > { %9424 = vmatmul.mubr.msk.f32.gmra.mxu0 %vm171_vm1, %v12960_v42  ;;  %9376 = vmatprep.mubr.msk.f32.mxu1 %vm171_vm1, %v12972_v27  ;;  %v11863_v35 = vadd.f32 %v4399_v8, %v4075_v59  ;;  %v9078_v21 = vpop.f32.mrf.mxu1  ;;  %v12975_v8 = vld [vmem:[#allocation39_spill] sm:$0xff] }
 0x2cb   : > { %9426 = vmatprep.mubr.msk.f32.mxu0 %vm171_vm1, %v11261_v26  ;;  %v9128_v54 = vpop.f32.mrf.mxu0 }
 0x2cc   : > { %v11869_v42 = vadd.f32 %v9128_v54, %v9078_v21  ;;  %v4085_v26 = vpop.f32.mrf.mxu1  ;;  %v12976_v21 = vld [vmem:[#allocation90_spill] sm:$0xff] }
 0x2cd   : > { %9377 = vmatmul.mubr.msk.f32.gmra.mxu1 %vm171_vm1, %v12973_v52  ;;  %v4409_v49 = vpop.f32.mrf.mxu0 }
 0x2ce   : > { %9427 = vmatmul.mubr.msk.f32.gmra.mxu0 %vm171_vm1, %v12961_v24  ;;  %9379 = vmatprep.mubr.msk.f32.mxu1 %vm171_vm1, %v12974_v32  ;;  %v11875_v28 = vadd.f32 %v4409_v49, %v4085_v26  ;;  %v12977_v49 = vld [vmem:[#allocation80_spill] sm:$0xff] }
 0x2cf   : > { %9429 = vmatprep.mubr.msk.f32.mxu0 %vm171_vm1, %v11289_v16  ;;  %v9081_v27 = vpop.f32.mrf.mxu1 }
 0x2d0   : > { %v9131_v59 = vpop.f32.mrf.mxu0 }
 0x2d1   : > { %9380 = vmatmul.mubr.msk.f32.gmra.mxu1 %vm171_vm1, %v12975_v8  ;;  %v11881_v24 = vadd.f32 %v9131_v59, %v9081_v27  ;;  %v4095_v16 = vpop.f32.mrf.mxu1  ;;  %v12978_v27 = vld [vmem:[#allocation17_spill] sm:$0xff] }
 0x2d2   : > { %9430 = vmatmul.mubr.msk.f32.gmra.mxu0 %vm171_vm1, %v12962_v61  ;;  %9382 = vmatprep.mubr.msk.f32.mxu1 %vm171_vm1, %v12976_v21  ;;  %v4419_v54 = vpop.f32.mrf.mxu0 }
 0x2d3   : > { %9432 = vmatprep.mubr.msk.f32.mxu0 %vm171_vm1, %v11316_v37  ;;  %v11887_v52 = vadd.f32 %v4419_v54, %v4095_v16  ;;  %v12979_v54 = vld [vmem:[#allocation19_spill] sm:$0xff] }
 0x2d5   : > { %v9084_v32 = vpop.f32.mrf.mxu1  ;;  %v9134_v26 = vpop.f32.mrf.mxu0  ;;  %9383 = vmatmul.mubr.msk.f32.gmra.mxu1 %vm171_vm1, %v12977_v49 }
 0x2d6   : > { %9433 = vmatmul.mubr.msk.f32.gmra.mxu0 %vm171_vm1, %v12963_v40  ;;  %v11893_v61 = vadd.f32 %v9134_v26, %v9084_v32  ;;  %9385 = vmatprep.mubr.msk.f32.mxu1 %vm171_vm1, %v12978_v27  ;;  %v12980_v32 = vld [vmem:[#allocation41_spill] sm:$0xff] }
 0x2d7   : > { %9435 = vmatprep.mubr.msk.f32.mxu0 %vm171_vm1, %v11341_v46  ;;  %v4105_v37 = vpop.f32.mrf.mxu1  ;;  %v4429_v59 = vpop.f32.mrf.mxu0 }
 0x2d8   : > { %v11899_v8 = vadd.f32 %v4429_v59, %v4105_v37  ;;  %v12981_v59 = vld [vmem:[#allocation40_spill] sm:$0xff] }
 0x2d9   : > { %v9087_v21 = vpop.f32.mrf.mxu1  ;;  %9386 = vmatmul.mubr.msk.f32.gmra.mxu1 %vm171_vm1, %v12979_v54 }
 0x2da   : > { %v9137_v16 = vpop.f32.mrf.mxu0  ;;  %9436 = vmatmul.mubr.msk.f32.gmra.mxu0 %vm171_vm1, %v11353_v3  ;;  %9388 = vmatprep.mubr.msk.f32.mxu1 %vm171_vm1, %v12980_v32 }
 0x2db   : > { %v11905_v40 = vadd.f32 %v9137_v16, %v9087_v21  ;;  %9438 = vmatprep.mubr.msk.f32.mxu0 %vm171_vm1, %v11361_v55  ;;  %v4115_v46 = vpop.f32.mrf.mxu1  ;;  %v12982_v21 = vld [vmem:[#allocation82_spill] sm:$0xff] }
 0x2dc   : > { %v4439_v26 = vpop.f32.mrf.mxu0 }
 0x2dd   : > { %v11911_v49 = vadd.f32 %v4439_v26, %v4115_v46  ;;  %v9090_v27 = vpop.f32.mrf.mxu1  ;;  %9389 = vmatmul.mubr.msk.f32.gmra.mxu1 %vm171_vm1, %v12981_v59  ;;  %v12983_v26 = vld [vmem:[#allocation3_spill] sm:$0xff] }
 0x2de   : > { %v9140_v37 = vpop.f32.mrf.mxu0  ;;  %9439 = vmatmul.mubr.msk.f32.gmra.mxu0 %vm171_vm1, %v11372_v31  ;;  %9391 = vmatprep.mubr.msk.f32.mxu1 %vm171_vm1, %v12982_v21 }
 0x2df   : > { %v11917_v3 = vadd.f32 %v9140_v37, %v9090_v27  ;;  %9441 = vmatprep.mubr.msk.f32.mxu0 %vm171_vm1, %v11379_v51  ;;  %v4125_v55 = vpop.f32.mrf.mxu1  ;;  %v12984_v27 = vld [vmem:[#allocation4_spill] sm:$0xff] }
 0x2e0   : > { %v4449_v16 = vpop.f32.mrf.mxu0 }
 0x2e1   : > { %v11923_v54 = vadd.f32 %v4449_v16, %v4125_v55  ;;  %v9093_v32 = vpop.f32.mrf.mxu1  ;;  %9392 = vmatmul.mubr.msk.f32.gmra.mxu1 %vm171_vm1, %v12983_v26  ;;  %v12985_v16 = vld [vmem:[#allocation43_spill] sm:$0xff] }
 0x2e2   : > { %v9143_v46 = vpop.f32.mrf.mxu0  ;;  %9442 = vmatmul.mubr.msk.f32.gmra.mxu0 %vm171_vm1, %v11390_v14  ;;  %9394 = vmatprep.mubr.msk.f32.mxu1 %vm171_vm1, %v12984_v27 }
 0x2e3   : > { %v11929_v31 = vadd.f32 %v9143_v46, %v9093_v32  ;;  %9444 = vmatprep.mubr.msk.f32.mxu0 %vm171_vm1, %v11397_v30  ;;  %v4135_v51 = vpop.f32.mrf.mxu1  ;;  %v12986_v32 = vld [vmem:[#allocation46_spill] sm:$0xff] }
 0x2e4   : > { %v4459_v37 = vpop.f32.mrf.mxu0 }
 0x2e5   : > { %v11935_v59 = vadd.f32 %v4459_v37, %v4135_v51  ;;  %v9096_v21 = vpop.f32.mrf.mxu1  ;;  %9395 = vmatmul.mubr.msk.f32.gmra.mxu1 %vm171_vm1, %v12985_v16  ;;  %v12987_v37 = vld [vmem:[#allocation83_spill] sm:$0xff]  ;;  %v6488_v16 = vld [vmem:[#allocation2 + $0x199] sm:$0xff] }
 0x2e6   : > { %v9146_v55 = vpop.f32.mrf.mxu0  ;;  %9445 = vmatmul.mubr.msk.f32.gmra.mxu0 %vm171_vm1, %v11408_v53  ;;  %9397 = vmatprep.mubr.msk.f32.mxu1 %vm171_vm1, %v12986_v32 }
 0x2e7   : > { %v11941_v14 = vadd.f32 %v9146_v55, %v9096_v21  ;;  %9447 = vmatprep.mubr.msk.f32.mxu0 %vm171_vm1, %v11414_v12  ;;  %v4145_v30 = vpop.f32.mrf.mxu1  ;;  %v6098_v55 = vld [vmem:[#allocation2 + $0x198] sm:$0xff] }
 0x2e8   : > { %v4469_v46 = vpop.f32.mrf.mxu0 }
 0x2e9   : > { %v11947_v26 = vadd.f32 %v4469_v46, %v4145_v30  ;;  %v9099_v27 = vpop.f32.mrf.mxu1  ;;  %9398 = vmatmul.mubr.msk.f32.gmra.mxu1 %vm171_vm1, %v11418_v62 }
 0x2ea   : > { %v9149_v51 = vpop.f32.mrf.mxu0  ;;  %9448 = vmatmul.mubr.msk.f32.gmra.mxu0 %vm171_vm1, %v11424_v13  ;;  %9400 = vmatprep.mubr.msk.f32.mxu1 %vm171_vm1, %v12987_v37  ;;  %v6099_v13 = vld [vmem:[#allocation2 + $0x1a0] sm:$0xff] }
 0x2eb   : > { %v11953_v53 = vadd.f32 %v9149_v51, %v9099_v27  ;;  %9450 = vmatprep.mubr.msk.f32.mxu0 %vm171_vm1, %v11771_v58  ;;  %v4155_v12 = vpop.f32.mrf.mxu1  ;;  %v6489_v58 = vld [vmem:[#allocation2 + $0x1a1] sm:$0xff] }
 0x2ec   : > { %v4479_v21 = vpop.f32.mrf.mxu0 }
 0x2ed   : > { %v11959_v32 = vadd.f32 %v4479_v21, %v4155_v12  ;;  %v9102_v30 = vpop.f32.mrf.mxu1  ;;  %9401 = vmatmul.mubr.msk.f32.gmra.mxu1 %vm171_vm1, %v11634_v19 }
 0x2ee   : > { %v9152_v46 = vpop.f32.mrf.mxu0  ;;  %9451 = vmatmul.mubr.msk.f32.gmra.mxu0 %vm171_vm1, %v11779_v34  ;;  %9403 = vmatprep.mubr.msk.f32.mxu1 %vm171_vm1, %v6098_v55 }
 0x2ef   : > { %v11965_v62 = vadd.f32 %v9152_v46, %v9102_v30  ;;  %9453 = vmatprep.mubr.msk.f32.mxu0 %vm171_vm1, %v6488_v16  ;;  %v4165_v27 = vpop.f32.mrf.mxu1 }
 0x2f0   : > { %v4489_v51 = vpop.f32.mrf.mxu0 }
 0x2f1   : > { %v11969_v37 = vadd.f32 %v4489_v51, %v4165_v27  ;;  %v9105_v12 = vpop.f32.mrf.mxu1  ;;  %9404 = vmatmul.mubr.msk.f32.gmra.mxu1 %vm171_vm1, %v6099_v13  ;;  %v4350_v27 = vadd.f32 %v11801_v41, %v11799_v38  ;;  %v12989_v13 = vld [vmem:[#allocation95_spill] sm:$0xff] }
 0x2f2   : > { %v9155_v21 = vpop.f32.mrf.mxu0  ;;  %9454 = vmatmul.mubr.msk.f32.gmra.mxu0 %vm171_vm1, %v6489_v58  ;;  %9458 = vmatprep.mubr.msk.f32.mxu1 %vm171_vm1, %v11468_v23 }
 0x2f3   : > { %v11973_v19 = vadd.f32 %v9155_v21, %v9105_v12  ;;  %v4175_v34 = vpop.f32.mrf.mxu1 }
 0x2f4   : > { %v4499_v55 = vpop.f32.mrf.mxu0 }
 0x2f5   : > { %v11977_v30 = vadd.f32 %v4499_v55, %v4175_v34  ;;  %v9160_v16 = vpop.f32.mrf.mxu1  ;;  %9459 = vmatmul.mubr.msk.f32.vlgmr.msra.gmra.mxu1 %vm171_vm1, %v11474_v1 }
 0x2f6   : > { %v9210_v46 = vpop.f32.mrf.mxu0  ;;  %v4867_v51 = vadd.f32 %v9160_v16, %v12989_v13  ;;  %9461 = vmatprep.mubr.msk.f32.mxu1 %vm171_vm1, %v11480_v47 }
 0x2f7   : > { %12988 = vst [vmem:[#allocation20_spill] sm:$0xff] %v11977_v30  ;;  %v4707_v58 = vpop.f32.mrf.mxu1 }
 0x2f8   : > { %v5097_v12 = vpop.f32.mrf.mxu0  ;;  %v11986_v23 = vadd.f32 %v9210_v46, %v4867_v51  ;;  %v4866_v21 = vadd.f32 %v4707_v58, %v4350_v27 }
 0x2f9   : > { %v9163_v34 = vpop.f32.mrf.mxu1  ;;  %9462 = vmatmul.mubr.msk.f32.gmra.mxu1 %vm171_vm1, %v11486_v44 }
 0x2fa   : > { %v9213_v55 = vpop.f32.mrf.mxu0  ;;  %v11990_v30 = vadd.f32 %v5097_v12, %v4866_v21  ;;  %v4869_v1 = vadd.f32 %v9163_v34, %v11809_v33  ;;  %9464 = vmatprep.mubr.msk.f32.mxu1 %vm171_vm1, %v11492_v45 }
 0x2fb   : > { %v4717_v38 = vpop.f32.mrf.mxu1 }
 0x2fc   : > { %v5107_v41 = vpop.f32.mrf.mxu0  ;;  %v11995_v47 = vadd.f32 %v9213_v55, %v4869_v1  ;;  %v4868_v16 = vadd.f32 %v4717_v38, %v11815_v43 }
 0x2fd   : > { %v9166_v46 = vpop.f32.mrf.mxu1  ;;  %9465 = vmatmul.mubr.msk.f32.gmra.mxu1 %vm171_vm1, %v11498_v15 }
 0x2fe   : > { %v9216_v27 = vpop.f32.mrf.mxu0  ;;  %v12000_v13 = vadd.f32 %v5107_v41, %v4868_v16  ;;  %v4871_v44 = vadd.f32 %v9166_v46, %v11821_v60  ;;  %9467 = vmatprep.mubr.msk.f32.mxu1 %vm171_vm1, %v11504_v25 }
 0x2ff   : > { %v4727_v33 = vpop.f32.mrf.mxu1 }
 0x300   : > { %v5117_v45 = vpop.f32.mrf.mxu0  ;;  %v12005_v51 = vadd.f32 %v9216_v27, %v4871_v44  ;;  %v4870_v58 = vadd.f32 %v4727_v33, %v11827_v57 }
 0x301   : > { %v9169_v12 = vpop.f32.mrf.mxu1  ;;  %9468 = vmatmul.mubr.msk.f32.gmra.mxu1 %vm171_vm1, %v11510_v36 }
 0x302   : > { %v9219_v43 = vpop.f32.mrf.mxu0  ;;  %v12010_v21 = vadd.f32 %v5117_v45, %v4870_v58  ;;  %v4873_v15 = vadd.f32 %v9169_v12, %v11833_v7  ;;  %9470 = vmatprep.mubr.msk.f32.mxu1 %vm171_vm1, %v11516_v39 }
 0x303   : > { %v4737_v60 = vpop.f32.mrf.mxu1 }
 0x304   : > { %v5127_v25 = vpop.f32.mrf.mxu0  ;;  %v12015_v34 = vadd.f32 %v9219_v43, %v4873_v15  ;;  %v4872_v55 = vadd.f32 %v4737_v60, %v11839_v6 }
 0x305   : > { %v9172_v1 = vpop.f32.mrf.mxu1  ;;  %9471 = vmatmul.mubr.msk.f32.gmra.mxu1 %vm171_vm1, %v11522_v63 }
 0x306   : > { %v9222_v57 = vpop.f32.mrf.mxu0  ;;  %v12020_v38 = vadd.f32 %v5127_v25, %v4872_v55  ;;  %v4875_v36 = vadd.f32 %v9172_v1, %v11845_v22  ;;  %9473 = vmatprep.mubr.msk.f32.mxu1 %vm171_vm1, %v11528_v50 }
 0x307   : > { %v4747_v7 = vpop.f32.mrf.mxu1 }
 0x308   : > { %v5137_v39 = vpop.f32.mrf.mxu0  ;;  %v12025_v41 = vadd.f32 %v9222_v57, %v4875_v36  ;;  %v4874_v16 = vadd.f32 %v4747_v7, %v11851_v9 }
 0x309   : > { %v9175_v46 = vpop.f32.mrf.mxu1  ;;  %9474 = vmatmul.mubr.msk.f32.gmra.mxu1 %vm171_vm1, %v11534_v29 }
 0x30a   : > { %v9225_v6 = vpop.f32.mrf.mxu0  ;;  %v12030_v27 = vadd.f32 %v5137_v39, %v4874_v16  ;;  %v4877_v63 = vadd.f32 %v9175_v46, %v11857_v10  ;;  %9476 = vmatprep.mubr.msk.f32.mxu1 %vm171_vm1, %v11540_v11  ;;  %v6867_v39 = vld [vmem:[#allocation2 + $0x112] sm:$0xff] }
 0x30b   : > { %v4757_v22 = vpop.f32.mrf.mxu1 }
 0x30c   : > { %v5147_v50 = vpop.f32.mrf.mxu0  ;;  %v12035_v44 = vadd.f32 %v9225_v6, %v4877_v63  ;;  %v4876_v33 = vadd.f32 %v4757_v22, %v11863_v35  ;;  %v6869_v22 = vld [vmem:[#allocation2 + $0x12a] sm:$0xff] }
 0x30d   : > { %v9178_v45 = vpop.f32.mrf.mxu1  ;;  %9477 = vmatmul.mubr.msk.f32.gmra.mxu1 %vm171_vm1, %v11546_v0 }
 0x30e   : > { %v9228_v9 = vpop.f32.mrf.mxu0  ;;  %v12040_v58 = vadd.f32 %v5147_v50, %v4876_v33  ;;  %v4879_v29 = vadd.f32 %v9178_v45, %v11869_v42  ;;  %9479 = vmatprep.mubr.msk.f32.mxu1 %vm171_vm1, %v11552_v20  ;;  %v6870_v33 = vld [vmem:[#allocation2 + $0x13a] sm:$0xff] }
 0x30f   : > { %v4767_v10 = vpop.f32.mrf.mxu1 }
 0x310   : > { %v5157_v11 = vpop.f32.mrf.mxu0  ;;  %v12045_v12 = vadd.f32 %v9228_v9, %v4879_v29  ;;  %v4878_v43 = vadd.f32 %v4767_v10, %v11875_v28 }
 0x311   : > { %v9181_v15 = vpop.f32.mrf.mxu1  ;;  %9480 = vmatmul.mubr.msk.f32.gmra.mxu1 %vm171_vm1, %v11558_v56 }
 0x312   : > { %v9231_v35 = vpop.f32.mrf.mxu0  ;;  %v12050_v60 = vadd.f32 %v5157_v11, %v4878_v43  ;;  %v4881_v0 = vadd.f32 %v9181_v15, %v11881_v24  ;;  %9482 = vmatprep.mubr.msk.f32.mxu1 %vm171_vm1, %v11564_v4  ;;  %v6871_v11 = vld [vmem:[#allocation2 + $0x142] sm:$0xff]  ;;  %v6872_v15 = vld [vmem:[#allocation2 + $0x152] sm:$0xff] }
 0x313   : > { %v4777_v42 = vpop.f32.mrf.mxu1 }
 0x314   : > { %v5167_v20 = vpop.f32.mrf.mxu0  ;;  %v12055_v25 = vadd.f32 %v9231_v35, %v4881_v0  ;;  %v4880_v55 = vadd.f32 %v4777_v42, %v11887_v52 }
 0x315   : > { %v9184_v1 = vpop.f32.mrf.mxu1  ;;  %9483 = vmatmul.mubr.msk.f32.gmra.mxu1 %vm171_vm1, %v11570_v18 }
 0x316   : > { %v9234_v28 = vpop.f32.mrf.mxu0  ;;  %v12060_v57 = vadd.f32 %v5167_v20, %v4880_v55  ;;  %v4883_v56 = vadd.f32 %v9184_v1, %v11893_v61  ;;  %9485 = vmatprep.mubr.msk.f32.mxu1 %vm171_vm1, %v11576_v48  ;;  %v6873_v1 = vld [vmem:[#allocation2 + $0x15a] sm:$0xff] }
 0x317   : > { %v4787_v24 = vpop.f32.mrf.mxu1 }
 0x318   : > { %v5177_v4 = vpop.f32.mrf.mxu0  ;;  %v12065_v36 = vadd.f32 %v9234_v28, %v4883_v56  ;;  %v4882_v7 = vadd.f32 %v4787_v24, %v11899_v8  ;;  %v6874_v56 = vld [vmem:[#allocation2 + $0x16a] sm:$0xff] }
 0x319   : > { %v9187_v52 = vpop.f32.mrf.mxu1  ;;  %9486 = vmatmul.mubr.msk.f32.gmra.mxu1 %vm171_vm1, %v6867_v39 }
 0x31a   : > { %v9237_v16 = vpop.f32.mrf.mxu0  ;;  %v12069_v46 = vadd.f32 %v5177_v4, %v4882_v7  ;;  %v4885_v18 = vadd.f32 %v9187_v52, %v11905_v40  ;;  %9488 = vmatprep.mubr.msk.f32.mxu1 %vm171_vm1, %v11588_v17 }
 0x31b   : > { %v4797_v61 = vpop.f32.mrf.mxu1 }
 0x31c   : > { %v5187_v48 = vpop.f32.mrf.mxu0  ;;  %v12074_v6 = vadd.f32 %v9237_v16, %v4885_v18  ;;  %v4884_v63 = vadd.f32 %v4797_v61, %v11911_v49  ;;  %v6875_v16 = vld [vmem:[#allocation2 + $0x172] sm:$0xff] }
 0x31d   : > { %v9190_v8 = vpop.f32.mrf.mxu1  ;;  %9489 = vmatmul.mubr.msk.f32.gmra.mxu1 %vm171_vm1, %v6869_v22  ;;  %v6878_v22 = vld [vmem:[#allocation2 + $0x19a] sm:$0xff] }
 0x31e   : > { %v9240_v50 = vpop.f32.mrf.mxu0  ;;  %v12078_v45 = vadd.f32 %v5187_v48, %v4884_v63  ;;  %v4887_v9 = vadd.f32 %v9190_v8, %v11917_v3  ;;  %9491 = vmatprep.mubr.msk.f32.mxu1 %vm171_vm1, %v6870_v33 }
 0x31f   : > { %v4807_v40 = vpop.f32.mrf.mxu1 }
 0x320   : > { %v5197_v17 = vpop.f32.mrf.mxu0  ;;  %v12082_v29 = vadd.f32 %v9240_v50, %v4887_v9  ;;  %v4886_v10 = vadd.f32 %v4807_v40, %v11923_v54 }
 0x321   : > { %v9193_v49 = vpop.f32.mrf.mxu1  ;;  %9492 = vmatmul.mubr.msk.f32.gmra.mxu1 %vm171_vm1, %v6871_v11 }
 0x322   : > { %v9243_v43 = vpop.f32.mrf.mxu0  ;;  %v12086_v35 = vadd.f32 %v5197_v17, %v4886_v10  ;;  %v4889_v0 = vadd.f32 %v9193_v49, %v11929_v31  ;;  %9494 = vmatprep.mubr.msk.f32.mxu1 %vm171_vm1, %v6872_v15 }
 0x323   : > { %v4817_v3 = vpop.f32.mrf.mxu1 }
 0x324   : > { %v5207_v42 = vpop.f32.mrf.mxu0  ;;  %v12090_v20 = vadd.f32 %v9243_v43, %v4889_v0  ;;  %v4888_v55 = vadd.f32 %v4817_v3, %v11935_v59  ;;  %v12990_v3 = vld [vmem:[#allocation20_spill] sm:$0xff] }
 0x325   : > { %v9196_v54 = vpop.f32.mrf.mxu1  ;;  %9495 = vmatmul.mubr.msk.f32.gmra.mxu1 %vm171_vm1, %v6873_v1 }
 0x326   : > { %v9246_v28 = vpop.f32.mrf.mxu0  ;;  %v12094_v24 = vadd.f32 %v5207_v42, %v4888_v55  ;;  %v4891_v4 = vadd.f32 %v9196_v54, %v11941_v14  ;;  %9497 = vmatprep.mubr.msk.f32.mxu1 %vm171_vm1, %v6874_v56 }
 0x327   : > { %v4827_v31 = vpop.f32.mrf.mxu1 }
 0x328   : > { %v5217_v7 = vpop.f32.mrf.mxu0  ;;  %v12098_v39 = vadd.f32 %v9246_v28, %v4891_v4  ;;  %v4890_v52 = vadd.f32 %v4827_v31, %v11947_v26 }
 0x329   : > { %v9199_v59 = vpop.f32.mrf.mxu1  ;;  %9498 = vmatmul.mubr.msk.f32.gmra.mxu1 %vm171_vm1, %v6875_v16 }
 0x32a   : > { %v9249_v18 = vpop.f32.mrf.mxu0  ;;  %v12102_v61 = vadd.f32 %v5217_v7, %v4890_v52  ;;  %v4893_v48 = vadd.f32 %v9199_v59, %v11953_v53  ;;  %9500 = vmatprep.mubr.msk.f32.mxu1 %vm171_vm1, %v11773_v2  ;;  %v6879_v53 = vld [vmem:[#allocation2 + $0x1a2] sm:$0xff] }
 0x32b   : > { %v4837_v14 = vpop.f32.mrf.mxu1 }
 0x32c   : > { %v5227_v63 = vpop.f32.mrf.mxu0  ;;  %v12107_v8 = vadd.f32 %v9249_v18, %v4893_v48  ;;  %v4892_v50 = vadd.f32 %v4837_v14, %v11959_v32 }
 0x32d   : > { %v9202_v26 = vpop.f32.mrf.mxu1  ;;  %9501 = vmatmul.mubr.msk.f32.gmra.mxu1 %vm171_vm1, %v11781_v5 }
 0x32e   : > { %v9252_v33 = vpop.f32.mrf.mxu0  ;;  %v12112_v9 = vadd.f32 %v5227_v63, %v4892_v50  ;;  %v4895_v40 = vadd.f32 %v9202_v26, %v11965_v62  ;;  %9503 = vmatprep.mubr.msk.f32.mxu1 %vm171_vm1, %v6878_v22 }
 0x32f   : > { %v4847_v2 = vpop.f32.mrf.mxu1 }
 0x330   : > { %v5237_v17 = vpop.f32.mrf.mxu0  ;;  %v12116_v10 = vadd.f32 %v9252_v33, %v4895_v40  ;;  %v4894_v11 = vadd.f32 %v4847_v2, %v11969_v37 }
 0x331   : > { %v9205_v49 = vpop.f32.mrf.mxu1  ;;  %9504 = vmatmul.mubr.msk.f32.gmra.mxu1 %vm171_vm1, %v6879_v53 }
 0x332   : > { %v9255_v32 = vpop.f32.mrf.mxu0  ;;  %v12120_v43 = vadd.f32 %v5237_v17, %v4894_v11  ;;  %v4897_v5 = vadd.f32 %v9205_v49, %v11973_v19 }
 0x333   : > { %v4857_v15 = vpop.f32.mrf.mxu1 }
 0x334   : > { %v5247_v0 = vpop.f32.mrf.mxu0  ;;  %v12123_v62 = vadd.f32 %v9255_v32, %v4897_v5  ;;  %v4896_v42 = vadd.f32 %v4857_v15, %v12990_v3 }
 0x335   : > { %v9260_v55 = vpop.f32.mrf.mxu1 }
 0x336   : > { %v12126_v1 = vpop.f32.mrf.mxu0  ;;  %v12128_v54 = vadd.f32 %v5247_v0, %v4896_v42  ;;  %v12131_v37 = vadd.f32 %v9260_v55, %v11986_v23 }
 0x337   : > { %v5487_v28 = vpop.f32.mrf.mxu1 }
 0x338   : > { %v12133_v56 = vpop.f32.mrf.mxu0  ;;  %v12136_v4 = vadd.f32 %v5487_v28, %v11990_v30 }
 0x339   : > { %v9263_v19 = vpop.f32.mrf.mxu1 }
 0x33a   : > { %v12138_v31 = vpop.f32.mrf.mxu0  ;;  %v12141_v7 = vadd.f32 %v9263_v19, %v11995_v47 }
 0x33b   : > { %v5497_v52 = vpop.f32.mrf.mxu1 }
 0x33c   : > { %v12143_v16 = vpop.f32.mrf.mxu0  ;;  %v12146_v59 = vadd.f32 %v5497_v52, %v12000_v13 }
 0x33d   : > { %v9266_v23 = vpop.f32.mrf.mxu1 }
 0x33e   : > { %v12148_v18 = vpop.f32.mrf.mxu0  ;;  %v12151_v48 = vadd.f32 %v9266_v23, %v12005_v51 }
 0x33f   : > { %v5507_v30 = vpop.f32.mrf.mxu1 }
 0x340   : > { %v12153_v14 = vpop.f32.mrf.mxu0  ;;  %v12156_v63 = vadd.f32 %v5507_v30, %v12010_v21 }
 0x341   : > { %v9269_v47 = vpop.f32.mrf.mxu1 }
 0x342   : > { %v12158_v22 = vpop.f32.mrf.mxu0  ;;  %v12161_v50 = vadd.f32 %v9269_v47, %v12015_v34 }
 0x343   : > { %v5517_v13 = vpop.f32.mrf.mxu1 }
 0x344   : > { %v12163_v26 = vpop.f32.mrf.mxu0  ;;  %v12166_v33 = vadd.f32 %v5517_v13, %v12020_v38 }
 0x345   : > { %v9272_v51 = vpop.f32.mrf.mxu1 }
 0x346   : > { %v12168_v40 = vpop.f32.mrf.mxu0  ;;  %v12171_v53 = vadd.f32 %v9272_v51, %v12025_v41 }
 0x347   : > { %v5527_v21 = vpop.f32.mrf.mxu1 }
 0x348   : > { %v12173_v2 = vpop.f32.mrf.mxu0  ;;  %v12176_v17 = vadd.f32 %v5527_v21, %v12030_v27 }
 0x349   : > { %v9275_v34 = vpop.f32.mrf.mxu1 }
 0x34a   : > { %v12178_v11 = vpop.f32.mrf.mxu0  ;;  %v12181_v49 = vadd.f32 %v9275_v34, %v12035_v44 }
 0x34b   : > { %v5537_v38 = vpop.f32.mrf.mxu1 }
 0x34c   : > { %v12183_v32 = vpop.f32.mrf.mxu0  ;;  %v12186_v5 = vadd.f32 %v5537_v38, %v12040_v58 }
 0x34d   : > { %v9278_v41 = vpop.f32.mrf.mxu1 }
 0x34e   : > { %v12188_v15 = vpop.f32.mrf.mxu0  ;;  %v12191_v0 = vadd.f32 %v9278_v41, %v12045_v12 }
 0x34f   : > { %v5547_v27 = vpop.f32.mrf.mxu1 }
 0x350   : > { %v12193_v3 = vpop.f32.mrf.mxu0  ;;  %v12196_v42 = vadd.f32 %v5547_v27, %v12050_v60 }
 0x351   : > { %v9281_v44 = vpop.f32.mrf.mxu1 }
 0x352   : > { %v12198_v55 = vpop.f32.mrf.mxu0  ;;  %v12201_v28 = vadd.f32 %v9281_v44, %v12055_v25 }
 0x353   : > { %12991 = vst [vmem:[#allocation21_spill] sm:$0xff] %v12198_v55  ;;  %v5557_v58 = vpop.f32.mrf.mxu1 }
 0x354   : > { %v12203_v19 = vpop.f32.mrf.mxu0  ;;  %v12206_v52 = vadd.f32 %v5557_v58, %v12060_v57 }
 0x355   : > { %12992 = vst [vmem:[#allocation45_spill] sm:$0xff] %v12203_v19  ;;  %v9284_v12 = vpop.f32.mrf.mxu1 }
 0x356   : > { %12993 = vst [vmem:[#allocation44_spill] sm:$0xff] %v12206_v52  ;;  %v12208_v23 = vpop.f32.mrf.mxu0  ;;  %v12211_v30 = vadd.f32 %v9284_v12, %v12065_v36 }
 0x357   : > { %12994 = vst [vmem:[#allocation85_spill] sm:$0xff] %v12208_v23  ;;  %v5567_v60 = vpop.f32.mrf.mxu1 }
 0x358   : > { %12995 = vst [vmem:[#allocation5_spill] sm:$0xff] %v12211_v30  ;;  %v12213_v47 = vpop.f32.mrf.mxu0  ;;  %v12216_v13 = vadd.f32 %v5567_v60, %v12069_v46 }
 0x359   : > { %12996 = vst [vmem:[#allocation6_spill] sm:$0xff] %v12213_v47  ;;  %v9287_v25 = vpop.f32.mrf.mxu1 }
 0x35a   : > { %12997 = vst [vmem:[#allocation47_spill] sm:$0xff] %v12216_v13  ;;  %v12218_v51 = vpop.f32.mrf.mxu0  ;;  %v12221_v21 = vadd.f32 %v9287_v25, %v12074_v6 }
 0x35b   : > { %12998 = vst [vmem:[#allocation50_spill] sm:$0xff] %v12218_v51  ;;  %v5577_v57 = vpop.f32.mrf.mxu1 }
 0x35c   : > { %12999 = vst [vmem:[#allocation100_spill] sm:$0xff] %v12221_v21  ;;  %v12223_v34 = vpop.f32.mrf.mxu0  ;;  %v12226_v38 = vadd.f32 %v5577_v57, %v12078_v45 }
 0x35d   : > { %13000 = vst [vmem:[#allocation86_spill] sm:$0xff] %v12223_v34  ;;  %v9290_v36 = vpop.f32.mrf.mxu1 }
 0x35e   : > { %13001 = vst [vmem:[#allocation22_spill] sm:$0xff] %v12226_v38  ;;  %v12228_v41 = vpop.f32.mrf.mxu0  ;;  %v12231_v27 = vadd.f32 %v9290_v36, %v12082_v29 }
 0x35f   : > { %13002 = vst [vmem:[#allocation23_spill] sm:$0xff] %v12228_v41  ;;  %v5587_v46 = vpop.f32.mrf.mxu1 }
 0x360   : > { %13003 = vst [vmem:[#allocation49_spill] sm:$0xff] %v12231_v27  ;;  %v12233_v44 = vpop.f32.mrf.mxu0  ;;  %v12236_v58 = vadd.f32 %v5587_v46, %v12086_v35 }
 0x361   : > { %13004 = vst [vmem:[#allocation48_spill] sm:$0xff] %v12233_v44  ;;  %v9293_v6 = vpop.f32.mrf.mxu1 }
 0x362   : > { %13005 = vst [vmem:[#allocation88_spill] sm:$0xff] %v12236_v58  ;;  %v12238_v12 = vpop.f32.mrf.mxu0  ;;  %v12241_v60 = vadd.f32 %v9293_v6, %v12090_v20 }
 0x363   : > { %13006 = vst [vmem:[#allocation7_spill] sm:$0xff] %v12238_v12  ;;  %v5597_v45 = vpop.f32.mrf.mxu1 }
 0x364   : > { %13007 = vst [vmem:[#allocation8_spill] sm:$0xff] %v12241_v60  ;;  %v12243_v25 = vpop.f32.mrf.mxu0  ;;  %v12246_v57 = vadd.f32 %v5597_v45, %v12094_v24 }
 0x365   : > { %13008 = vst [vmem:[#allocation51_spill] sm:$0xff] %v12243_v25  ;;  %v9296_v29 = vpop.f32.mrf.mxu1 }
 0x366   : > { %13009 = vst [vmem:[#allocation54_spill] sm:$0xff] %v12246_v57  ;;  %v12248_v36 = vpop.f32.mrf.mxu0  ;;  %v12251_v44 = vadd.f32 %v9296_v29, %v12098_v39 }
 0x367   : > { %13010 = vst [vmem:[#allocation89_spill] sm:$0xff] %v12248_v36  ;;  %v5607_v35 = vpop.f32.mrf.mxu1 }
 0x368   : > { %13011 = vst [vmem:[#allocation24_spill] sm:$0xff] %v12251_v44  ;;  %v12253_v46 = vpop.f32.mrf.mxu0  ;;  %v12256_v12 = vadd.f32 %v5607_v35, %v12102_v61 }
 0x369   : > { %13012 = vst [vmem:[#allocation25_spill] sm:$0xff] %v12253_v46  ;;  %v9299_v20 = vpop.f32.mrf.mxu1 }
 0x36a   : > { %13013 = vst [vmem:[#allocation53_spill] sm:$0xff] %v12256_v12  ;;  %v12258_v6 = vpop.f32.mrf.mxu0  ;;  %v12261_v25 = vadd.f32 %v9299_v20, %v12107_v8 }
 0x36b   : > { %13014 = vst [vmem:[#allocation52_spill] sm:$0xff] %v12258_v6  ;;  %v5617_v24 = vpop.f32.mrf.mxu1 }
 0x36c   : > { %13015 = vst [vmem:[#allocation91_spill] sm:$0xff] %v12261_v25  ;;  %v12263_v45 = vpop.f32.mrf.mxu0  ;;  %v12266_v36 = vadd.f32 %v5617_v24, %v12112_v9 }
 0x36d   : > { %13016 = vst [vmem:[#allocation9_spill] sm:$0xff] %v12263_v45  ;;  %v9302_v39 = vpop.f32.mrf.mxu1 }
 0x36e   : > { %13017 = vst [vmem:[#allocation10_spill] sm:$0xff] %v12266_v36  ;;  %v12268_v29 = vpop.f32.mrf.mxu0  ;;  %v12271_v46 = vadd.f32 %v9302_v39, %v12116_v10 }
 0x36f   : > { %13018 = vst [vmem:[#allocation55_spill] sm:$0xff] %v12268_v29  ;;  %v5627_v61 = vpop.f32.mrf.mxu1 }
 0x370   : > { %13019 = vst [vmem:[#allocation58_spill] sm:$0xff] %v12271_v46  ;;  %v12273_v35 = vpop.f32.mrf.mxu0  ;;  %v12276_v6 = vadd.f32 %v5627_v61, %v12120_v43 }
 0x371   : > { %13020 = vst [vmem:[#allocation92_spill] sm:$0xff] %v12273_v35  ;;  %v9305_v8 = vpop.f32.mrf.mxu1 }
 0x372   : > { %13021 = vst [vmem:[#allocation26_spill] sm:$0xff] %v12276_v6  ;;  %v12278_v20 = vpop.f32.mrf.mxu0  ;;  %v12281_v45 = vadd.f32 %v9305_v8, %v12123_v62 }
 0x373   : > { %13022 = vst [vmem:[#allocation27_spill] sm:$0xff] %v12278_v20  ;;  %v5637_v9 = vpop.f32.mrf.mxu1 }
 0x374   : > { %13023 = vst [vmem:[#allocation57_spill] sm:$0xff] %v12281_v45  ;;  %v12283_v24 = vpop.f32.mrf.mxu0  ;;  %v12286_v29 = vadd.f32 %v5637_v9, %v12128_v54 }
 0x375   : > { %13024 = vst [vmem:[#allocation56_spill] sm:$0xff] %v12283_v24  ;;  %v9360_v10 = vpop.f32.mrf.mxu1 }
 0x376   : > { %13025 = vst [vmem:[#allocation93_spill] sm:$0xff] %v12286_v29  ;;  %v9410_v39 = vpop.f32.mrf.mxu0 }
 0x377   : > { %v6267_v46 = vpop.f32.mrf.mxu1 }
 0x378   : > { %v6657_v36 = vpop.f32.mrf.mxu0 }
 0x379   : > { %v9363_v35 = vpop.f32.mrf.mxu1 }
 0x37a   : > { %v9413_v43 = vpop.f32.mrf.mxu0 }
 0x37b   : > { %v6277_v25 = vpop.f32.mrf.mxu1 }
 0x37c   : > { %v12290_v20 = vpop.f32.mrf.mxu0 }
 0x37d   : > { %v9366_v61 = vpop.f32.mrf.mxu1 }
 0x37e   : > { %v12296_v24 = vpop.f32.mrf.mxu0 }
 0x37f   : > { %v12288_v6 = vpop.f32.mrf.mxu1 }
 0x380   : > { %v12302_v29 = vpop.f32.mrf.mxu0 }
 0x381   : > { %v12292_v62 = vpop.f32.mrf.mxu1 }
 0x382   : > { %v12308_v44 = vpop.f32.mrf.mxu0 }
 0x383   : > { %v12294_v8 = vpop.f32.mrf.mxu1 }
 0x384   : > { %v12314_v58 = vpop.f32.mrf.mxu0 }
 0x385   : > { %v12298_v54 = vpop.f32.mrf.mxu1 }
 0x386   : > { %v12320_v34 = vpop.f32.mrf.mxu0 }
 0x387   : > { %v12300_v9 = vpop.f32.mrf.mxu1 }
 0x388   : > { %v12326_v21 = vpop.f32.mrf.mxu0 }
 0x389   : > { %v12304_v45 = vpop.f32.mrf.mxu1 }
 0x38a   : > { %v12332_v23 = vpop.f32.mrf.mxu0 }
 0x38b   : > { %v12306_v12 = vpop.f32.mrf.mxu1 }
 0x38d   : > { %v12310_v57 = vpop.f32.mrf.mxu1 }
 0x38f   : > { %v12312_v60 = vpop.f32.mrf.mxu1 }
 0x390   : > { %13026 = vst [vmem:[#allocation11_spill] sm:$0xff] %v12312_v60 }
 0x391   : > { %v12316_v41 = vpop.f32.mrf.mxu1 }
 0x392   : > { %13027 = vst [vmem:[#allocation12_spill] sm:$0xff] %v12316_v41  ;;  %v12338_v41 = vpop.f32.mrf.mxu0 }
 0x393   : > { %v12318_v27 = vpop.f32.mrf.mxu1 }
 0x394   : > { %13028 = vst [vmem:[#allocation59_spill] sm:$0xff] %v12318_v27 }
 0x395   : > { %v12322_v38 = vpop.f32.mrf.mxu1 }
 0x396   : > { %13029 = vst [vmem:[#allocation62_spill] sm:$0xff] %v12322_v38  ;;  %v12344_v38 = vpop.f32.mrf.mxu0 }
 0x397   : > { %v12324_v51 = vpop.f32.mrf.mxu1  ;;  %13037 = vst [vmem:[#allocation14_spill] sm:$0xff] %v12344_v38 }
 0x398   : > { %13030 = vst [vmem:[#allocation94_spill] sm:$0xff] %v12324_v51 }
 0x399   : > { %v12328_v47 = vpop.f32.mrf.mxu1 }
 0x39a   : > { %13031 = vst [vmem:[#allocation28_spill] sm:$0xff] %v12328_v47  ;;  %v12350_v47 = vpop.f32.mrf.mxu0 }
 0x39b   : > { %v12330_v13 = vpop.f32.mrf.mxu1  ;;  %13040 = vst [vmem:[#allocation97_spill] sm:$0xff] %v12350_v47 }
 0x39c   : > { %13032 = vst [vmem:[#allocation31_spill] sm:$0xff] %v12330_v13 }
 0x39d   : > { %v12334_v30 = vpop.f32.mrf.mxu1 }
 0x39e   : > { %13033 = vst [vmem:[#allocation61_spill] sm:$0xff] %v12334_v30  ;;  %v12356_v30 = vpop.f32.mrf.mxu0 }
 0x39f   : > { %v12336_v19 = vpop.f32.mrf.mxu1  ;;  %13043 = vst [vmem:[#allocation65_spill] sm:$0xff] %v12356_v30 }
 0x3a0   : > { %13034 = vst [vmem:[#allocation60_spill] sm:$0xff] %v12336_v19  ;;  %v12366_v38 = vpop.f32.mrf.mxu0 }
 0x3a1   : > { %v12340_v27 = vpop.f32.mrf.mxu1 }
 0x3a2   : > { %13035 = vst [vmem:[#allocation96_spill] sm:$0xff] %v12340_v27  ;;  %v12376_v47 = vpop.f32.mrf.mxu0 }
 0x3a3   : > { %v12342_v52 = vpop.f32.mrf.mxu1 }
 0x3a4   : > { %13036 = vst [vmem:[#allocation13_spill] sm:$0xff] %v12342_v52  ;;  %v6037_v52 = vadd.f32 %v12126_v1, %v12131_v37  ;;  %v6038_v1 = vadd.f32 %v12143_v16, %v12146_v59  ;;  %v7238_v59 = vld [vmem:[%s9631_s26] sm:$0xff] }
 0x3a5   : > { %v12346_v51 = vpop.f32.mrf.mxu1 }
 0x3a6   : > { %13038 = vst [vmem:[#allocation63_spill] sm:$0xff] %v12346_v51  ;;  %v6036_v51 = vadd.f32 %v12133_v56, %v12136_v4  ;;  %v7239_v4 = vld [vmem:[%s9631_s26 + $0x8] sm:$0xff] }
 0x3a7   : > { %v12348_v60 = vpop.f32.mrf.mxu1 }
 0x3a8   : > { %13039 = vst [vmem:[#allocation66_spill] sm:$0xff] %v12348_v60  ;;  %v6427_v60 = vadd.f32 %v9360_v10, %v6037_v52  ;;  %v6426_v30 = vadd.f32 %v6267_v46, %v6036_v51  ;;  %v6041_v52 = vadd.f32 %v12148_v18, %v12151_v48  ;;  %v6043_v48 = vadd.f32 %v12158_v22, %v12161_v50 }
 0x3a9   : > { %v12352_v13 = vpop.f32.mrf.mxu1 }
 0x3aa   : > { %13041 = vst [vmem:[#allocation32_spill] sm:$0xff] %v12352_v13  ;;  %v6817_v37 = vadd.f32 %v9410_v39, %v6427_v60  ;;  %v6816_v10 = vadd.f32 %v6657_v36, %v6426_v30  ;;  %v6431_v51 = vadd.f32 %v9366_v61, %v6041_v52  ;;  %v12393_v30 = vpop.f32.mrf.mxu0  ;;  %v6433_v50 = vadd.f32 %v12292_v62, %v6043_v48  ;;  %v7242_v52 = vld [vmem:[%s9631_s26 + $0x20] sm:$0xff] }
 0x3ab   : > { %v12354_v55 = vpop.f32.mrf.mxu1 }
 0x3ac   : > { %13042 = vst [vmem:[#allocation33_spill] sm:$0xff] %v12354_v55  ;;  %v6039_v55 = vadd.f32 %v12138_v31, %v12141_v7  ;;  %v6040_v7 = vadd.f32 %v12153_v14, %v12156_v63  ;;  %v7241_v63 = vld [vmem:[%s9631_s26 + $0x18] sm:$0xff]  ;;  %v6821_v22 = vadd.f32 %v12296_v24, %v6431_v51  ;;  %v12409_v61 = vpop.f32.mrf.mxu0  ;;  %v7244_v51 = vld [vmem:[%s9631_s26 + $0x30] sm:$0xff] }
 0x3ad   : > { %v12358_v19 = vpop.f32.mrf.mxu1 }
 0x3ae   : > { %13044 = vst [vmem:[#allocation64_spill] sm:$0xff] %v12358_v19  ;;  %v6430_v36 = vadd.f32 %v12288_v6, %v6040_v7 }
 0x3af   : > { %v12362_v27 = vpop.f32.mrf.mxu1 }
 0x3b0   : > { %13045 = vst [vmem:[#allocation98_spill] sm:$0xff] %v12362_v27  ;;  %v6429_v27 = vadd.f32 %v9363_v35, %v6039_v55  ;;  %v6042_v35 = vadd.f32 %v12163_v26, %v12166_v33  ;;  %v6820_v26 = vadd.f32 %v12302_v29, %v6430_v36  ;;  %v7246_v36 = vld [vmem:[%s9631_s26 + $0x40] sm:$0xff] }
 0x3b1   : > { %v12368_v13 = vpop.f32.mrf.mxu1 }
 0x3b2   : > { %13046 = vst [vmem:[#allocation67_spill] sm:$0xff] %v12368_v13  ;;  %v6428_v13 = vadd.f32 %v6277_v25, %v6038_v1  ;;  %v6819_v55 = vadd.f32 %v9413_v43, %v6429_v27  ;;  %v7240_v43 = vld [vmem:[%s9631_s26 + $0x10] sm:$0xff]  ;;  %v6432_v33 = vadd.f32 %v12294_v8, %v6042_v35 }
 0x3b3   : > { %v12372_v19 = vpop.f32.mrf.mxu1 }
 0x3b4   : > { %v6818_v25 = vadd.f32 %v12290_v20, %v6428_v13  ;;  %v6045_v20 = vadd.f32 %v12168_v40, %v12171_v53  ;;  %v6823_v40 = vadd.f32 %v12308_v44, %v6433_v50  ;;  %v13049_v50 = vld [vmem:[#allocation44_spill] sm:$0xff] }
 0x3b5   : > { %v9460_v56 = vpop.f32.mrf.mxu1 }
 0x3b6   : > { %v7207_v31 = vadd.f32 %v9460_v56, %v6817_v37  ;;  %v7243_v37 = vld [vmem:[%s9631_s26 + $0x28] sm:$0xff]  ;;  %v6044_v56 = vadd.f32 %v12173_v2, %v12176_v17  ;;  %v6435_v53 = vadd.f32 %v12298_v54, %v6045_v20  ;;  %v6822_v2 = vadd.f32 %v12314_v58, %v6432_v33 }
 0x3b7   : > { %v7047_v16 = vpop.f32.mrf.mxu1 }
 0x3b8   : > { %v7271_v60 = vadd.f32 %v7239_v4, %v7207_v31  ;;  %v7206_v18 = vadd.f32 %v7047_v16, %v6816_v10  ;;  %v6047_v10 = vadd.f32 %v12178_v11, %v12181_v49  ;;  %v12425_v31 = vpop.f32.mrf.mxu0  ;;  %v7245_v16 = vld [vmem:[%s9631_s26 + $0x38] sm:$0xff]  ;;  %v6434_v17 = vadd.f32 %v12300_v9, %v6044_v56  ;;  %v13054_v56 = vld [vmem:[#allocation85_spill] sm:$0xff] }
 0x3b9   : > { %v9463_v14 = vpop.f32.mrf.mxu1  ;;  %v6825_v11 = vadd.f32 %v12320_v34, %v6435_v53  ;;  %v7251_v53 = vld [vmem:[%s9631_s26 + $0x68] sm:$0xff] }
 0x3ba   : > { %7303 = vst.msk [vmem:[%s12388_s7 + $0x8] sm:$0xff] %vm171_vm1, %v7271_v60  ;;  %v7270_v46 = vadd.f32 %v7238_v59, %v7206_v18  ;;  %v7209_v27 = vadd.f32 %v9463_v14, %v6819_v55  ;;  %v6046_v59 = vadd.f32 %v12183_v32, %v12186_v5  ;;  %v6437_v49 = vadd.f32 %v12304_v45, %v6047_v10  ;;  %v12441_v18 = vpop.f32.mrf.mxu0  ;;  %v7247_v14 = vld [vmem:[%s9631_s26 + $0x48] sm:$0xff]  ;;  %v13056_v10 = vld [vmem:[#allocation59_spill] sm:$0xff] }
 0x3bb   : > { %v7057_v39 = vpop.f32.mrf.mxu1  ;;  %v6049_v60 = vadd.f32 %v12188_v15, %v12191_v0  ;;  %v6824_v32 = vadd.f32 %v12326_v21, %v6434_v17  ;;  %v13057_v17 = vld [vmem:[#allocation47_spill] sm:$0xff] }
 0x3bc   : > { %7302 = vst.msk [vmem:[%s12388_s7] sm:$0xff] %vm171_vm1, %v7270_v46  ;;  %v7273_v13 = vadd.f32 %v7241_v63, %v7209_v27  ;;  %v7208_v6 = vadd.f32 %v7057_v39, %v6818_v25  ;;  %v6436_v5 = vadd.f32 %v12306_v12, %v6046_v59  ;;  %v6048_v63 = vadd.f32 %v12193_v3, %v12196_v42  ;;  %v13047_v46 = vld [vmem:[#allocation21_spill] sm:$0xff]  ;;  %v12457_v35 = vpop.f32.mrf.mxu0  ;;  %v13048_v42 = vld [vmem:[#allocation11_spill] sm:$0xff] }
 0x3bd   : > { %v9466_v1 = vpop.f32.mrf.mxu1  ;;  %v6827_v15 = vadd.f32 %v12332_v23, %v6437_v49  ;;  %v6439_v0 = vadd.f32 %v12310_v57, %v6049_v60  ;;  %v6051_v27 = vadd.f32 %v13047_v46, %v12201_v28  ;;  %v13051_v28 = vld [vmem:[#allocation14_spill] sm:$0xff] }
 0x3be   : > { %7305 = vst.msk [vmem:[%s12388_s7 + $0x18] sm:$0xff] %vm171_vm1, %v7273_v13  ;;  %v7272_v24 = vadd.f32 %v7240_v43, %v7208_v6  ;;  %v7211_v62 = vadd.f32 %v9466_v1, %v6821_v22  ;;  %v7249_v43 = vld [vmem:[%s9631_s26 + $0x58] sm:$0xff]  ;;  %v6826_v3 = vadd.f32 %v12338_v41, %v6436_v5  ;;  %v6438_v23 = vadd.f32 %v13048_v42, %v6048_v63  ;;  %v13050_v13 = vld [vmem:[#allocation45_spill] sm:$0xff]  ;;  %v7248_v1 = vld [vmem:[%s9631_s26 + $0x50] sm:$0xff] }
 0x3bf   : > { %v7067_v4 = vpop.f32.mrf.mxu1  ;;  %v6050_v6 = vadd.f32 %v13050_v13, %v13049_v50  ;;  %v13060_v49 = vld [vmem:[#allocation62_spill] sm:$0xff] }
 0x3c0   : > { %7304 = vst.msk [vmem:[%s12388_s7 + $0x10] sm:$0xff] %vm171_vm1, %v7272_v24  ;;  %v7275_v29 = vadd.f32 %v7243_v37, %v7211_v62  ;;  %v7210_v8 = vadd.f32 %v7067_v4, %v6820_v26  ;;  %v6829_v37 = vadd.f32 %v13051_v28, %v6439_v0  ;;  %v13052_v26 = vld [vmem:[#allocation12_spill] sm:$0xff]  ;;  %v13053_v62 = vld [vmem:[#allocation5_spill] sm:$0xff]  ;;  %v13069_v28 = vld [vmem:[#allocation31_spill] sm:$0xff] }
 0x3c1   : > { %v9469_v7 = vpop.f32.mrf.mxu1  ;;  %v6441_v33 = vadd.f32 %v13052_v26, %v6051_v27  ;;  %v6053_v4 = vadd.f32 %v13054_v56, %v13053_v62  ;;  %v7254_v56 = vld [vmem:[%s9631_s26 + $0x80] sm:$0xff] }
 0x3c2   : > { %7307 = vst.msk [vmem:[%s12388_s7 + $0x28] sm:$0xff] %vm171_vm1, %v7275_v29  ;;  %v7274_v44 = vadd.f32 %v7242_v52, %v7210_v8  ;;  %v7213_v54 = vadd.f32 %v9469_v7, %v6823_v40  ;;  %v12473_v52 = vpop.f32.mrf.mxu0  ;;  %v13055_v29 = vld [vmem:[#allocation97_spill] sm:$0xff]  ;;  %v6440_v7 = vadd.f32 %v13056_v10, %v6050_v6  ;;  %v13074_v10 = vld [vmem:[#allocation7_spill] sm:$0xff] }
 0x3c3   : > { %v7077_v55 = vpop.f32.mrf.mxu1  ;;  %v6828_v8 = vadd.f32 %v13055_v29, %v6438_v23 }
 0x3c4   : > { %7306 = vst.msk [vmem:[%s12388_s7 + $0x20] sm:$0xff] %vm171_vm1, %v7274_v44  ;;  %v7277_v58 = vadd.f32 %v7245_v16, %v7213_v54  ;;  %v7212_v9 = vadd.f32 %v7077_v55, %v6822_v2  ;;  %v13058_v44 = vld [vmem:[#allocation6_spill] sm:$0xff]  ;;  %v7250_v55 = vld [vmem:[%s9631_s26 + $0x60] sm:$0xff]  ;;  %v12489_v5 = vpop.f32.mrf.mxu0  ;;  %v6830_v63 = vadd.f32 %v12366_v38, %v6440_v7 }
 0x3c5   : > { %v9472_v48 = vpop.f32.mrf.mxu1  ;;  %v6052_v54 = vadd.f32 %v13058_v44, %v13057_v17  ;;  %v7257_v17 = vld [vmem:[%s9631_s26 + $0x98] sm:$0xff] }
 0x3c6   : > { %7309 = vst.msk [vmem:[%s12388_s7 + $0x38] sm:$0xff] %vm171_vm1, %v7277_v58  ;;  %v7276_v34 = vadd.f32 %v7244_v51, %v7212_v9  ;;  %v7215_v45 = vadd.f32 %v9472_v48, %v6825_v11  ;;  %v13059_v51 = vld [vmem:[#allocation65_spill] sm:$0xff]  ;;  %v6443_v58 = vadd.f32 %v13060_v49, %v6053_v4  ;;  %v13061_v48 = vld [vmem:[#allocation100_spill] sm:$0xff]  ;;  %v9446_v13 = vpop.f32.mrf.mxu0 }
 0x3c7   : > { %v7087_v25 = vpop.f32.mrf.mxu1  ;;  %v6831_v11 = vadd.f32 %v13059_v51, %v6441_v33  ;;  %v13070_v33 = vld [vmem:[#allocation88_spill] sm:$0xff]  ;;  %v13076_v51 = vld [vmem:[#allocation54_spill] sm:$0xff] }
 0x3c8   : > { %7308 = vst.msk [vmem:[%s12388_s7 + $0x30] sm:$0xff] %vm171_vm1, %v7276_v34  ;;  %v7279_v21 = vadd.f32 %v7247_v14, %v7215_v45  ;;  %v7214_v12 = vadd.f32 %v7087_v25, %v6824_v32  ;;  %v13062_v14 = vld [vmem:[#allocation50_spill] sm:$0xff]  ;;  %v7253_v45 = vld [vmem:[%s9631_s26 + $0x78] sm:$0xff] }
 0x3c9   : > { %v9475_v39 = vpop.f32.mrf.mxu1  ;;  %v6055_v32 = vadd.f32 %v13062_v14, %v13061_v48  ;;  %v13063_v25 = vld [vmem:[#allocation94_spill] sm:$0xff]  ;;  %v13078_v48 = vld [vmem:[#allocation96_spill] sm:$0xff] }
 0x3ca   : > { %7311 = vst.msk [vmem:[%s12388_s7 + $0x48] sm:$0xff] %vm171_vm1, %v7279_v21  ;;  %v7278_v57 = vadd.f32 %v7246_v36, %v7214_v12  ;;  %v7217_v22 = vadd.f32 %v9475_v39, %v6827_v15  ;;  %v6442_v36 = vadd.f32 %v13063_v25, %v6052_v54  ;;  %v13064_v21 = vld [vmem:[#allocation22_spill] sm:$0xff]  ;;  %v7252_v39 = vld [vmem:[%s9631_s26 + $0x70] sm:$0xff]  ;;  %v13075_v54 = vld [vmem:[#allocation60_spill] sm:$0xff] }
 0x3cb   : > { %v7097_v20 = vpop.f32.mrf.mxu1  ;;  %v13065_v12 = vld [vmem:[#allocation86_spill] sm:$0xff] }
 0x3cc   : > { %7310 = vst.msk [vmem:[%s12388_s7 + $0x40] sm:$0xff] %vm171_vm1, %v7278_v57  ;;  %v7281_v41 = vadd.f32 %v7249_v43, %v7217_v22  ;;  %v7216_v24 = vadd.f32 %v7097_v20, %v6826_v3  ;;  %v6054_v46 = vadd.f32 %v13065_v12, %v13064_v21  ;;  %v6833_v43 = vadd.f32 %v12376_v47, %v6443_v58  ;;  %v13066_v3 = vld [vmem:[#allocation28_spill] sm:$0xff]  ;;  %v13067_v57 = vld [vmem:[#allocation49_spill] sm:$0xff]  ;;  %v13068_v22 = vld [vmem:[#allocation23_spill] sm:$0xff] }
 0x3cd   : > { %v9478_v40 = vpop.f32.mrf.mxu1  ;;  %v6445_v42 = vadd.f32 %v13066_v3, %v6055_v32  ;;  %v6057_v50 = vadd.f32 %v13068_v22, %v13067_v57  ;;  %v7255_v20 = vld [vmem:[%s9631_s26 + $0x88] sm:$0xff]  ;;  %v13081_v21 = vld [vmem:[#allocation13_spill] sm:$0xff] }
 0x3ce   : > { %7313 = vst.msk [vmem:[%s12388_s7 + $0x58] sm:$0xff] %vm171_vm1, %v7281_v41  ;;  %v7280_v16 = vadd.f32 %v7248_v1, %v7216_v24  ;;  %v7219_v2 = vadd.f32 %v9478_v40, %v6829_v37  ;;  %v6832_v1 = vadd.f32 %v12393_v30, %v6442_v36  ;;  %v6444_v37 = vadd.f32 %v13069_v28, %v6054_v46  ;;  %v13071_v41 = vld [vmem:[#allocation48_spill] sm:$0xff]  ;;  %v13072_v40 = vld [vmem:[#allocation61_spill] sm:$0xff] }
 0x3cf   : > { %v7107_v59 = vpop.f32.mrf.mxu1  ;;  %v6056_v24 = vadd.f32 %v13071_v41, %v13070_v33  ;;  %v6835_v4 = vadd.f32 %v12409_v61, %v6445_v42  ;;  %v7258_v42 = vld [vmem:[%s9631_s26 + $0xa0] sm:$0xff] }
 0x3d0   : > { %7312 = vst.msk [vmem:[%s12388_s7 + $0x50] sm:$0xff] %vm171_vm1, %v7280_v16  ;;  %v7283_v9 = vadd.f32 %v7251_v53, %v7219_v2  ;;  %v7218_v60 = vadd.f32 %v7107_v59, %v6828_v8  ;;  %v6447_v53 = vadd.f32 %v13072_v40, %v6057_v50  ;;  %v13073_v8 = vld [vmem:[#allocation8_spill] sm:$0xff]  ;;  %v6777_v16 = vpop.f32.mrf.mxu0  ;;  %v6834_v44 = vadd.f32 %v12425_v31, %v6444_v37  ;;  %v13085_v50 = vld [vmem:[#allocation91_spill] sm:$0xff] }
 0x3d1   : > { %v9481_v34 = vpop.f32.mrf.mxu1  ;;  %v6059_v7 = vadd.f32 %v13074_v10, %v13073_v8  ;;  %v6446_v59 = vadd.f32 %v13075_v54, %v6056_v24  ;;  %v7261_v37 = vld [vmem:[%s9631_s26 + $0xb8] sm:$0xff]  ;;  %v13088_v24 = vld [vmem:[#allocation10_spill] sm:$0xff]  ;;  %v7260_v40 = vld [vmem:[%s9631_s26 + $0xb0] sm:$0xff] }
 0x3d2   : > { %7315 = vst.msk [vmem:[%s12388_s7 + $0x68] sm:$0xff] %vm171_vm1, %v7283_v9  ;;  %v7282_v15 = vadd.f32 %v7250_v55, %v7218_v60  ;;  %v7221_v0 = vadd.f32 %v9481_v34, %v6831_v11  ;;  %v13077_v11 = vld [vmem:[#allocation51_spill] sm:$0xff]  ;;  %v6837_v60 = vadd.f32 %v12441_v18, %v6447_v53  ;;  %v13079_v34 = vld [vmem:[#allocation24_spill] sm:$0xff]  ;;  %v9449_v25 = vpop.f32.mrf.mxu0  ;;  %v13091_v10 = vld [vmem:[#allocation58_spill] sm:$0xff] }
 0x3d3   : > { %v7117_v27 = vpop.f32.mrf.mxu1  ;;  %v6058_v49 = vadd.f32 %v13077_v11, %v13076_v51  ;;  %v7256_v9 = vld [vmem:[%s9631_s26 + $0x90] sm:$0xff]  ;;  %v6449_v14 = vadd.f32 %v13078_v48, %v6059_v7  ;;  %v7263_v54 = vld [vmem:[%s9631_s26 + $0xc8] sm:$0xff] }
 0x3d4   : > { %7314 = vst.msk [vmem:[%s12388_s7 + $0x60] sm:$0xff] %vm171_vm1, %v7282_v15  ;;  %v7285_v38 = vadd.f32 %v7253_v45, %v7221_v0  ;;  %v7220_v23 = vadd.f32 %v7117_v27, %v6830_v63  ;;  %v13080_v45 = vld [vmem:[#allocation89_spill] sm:$0xff]  ;;  %v7259_v15 = vld [vmem:[%s9631_s26 + $0xa8] sm:$0xff]  ;;  %v6836_v0 = vadd.f32 %v12457_v35, %v6446_v59  ;;  %v13092_v7 = vld [vmem:[#allocation55_spill] sm:$0xff] }
 0x3d5   : > { %v9484_v6 = vpop.f32.mrf.mxu1  ;;  %v6061_v63 = vadd.f32 %v13080_v45, %v13079_v34  ;;  %v6448_v12 = vadd.f32 %v13081_v21, %v6058_v49  ;;  %v13082_v27 = vld [vmem:[#allocation53_spill] sm:$0xff]  ;;  %v13094_v11 = vld [vmem:[#allocation26_spill] sm:$0xff]  ;;  %v13095_v49 = vld [vmem:[#allocation92_spill] sm:$0xff] }
 0x3d6   : > { %7317 = vst.msk [vmem:[%s12388_s7 + $0x78] sm:$0xff] %vm171_vm1, %v7285_v38  ;;  %v7284_v47 = vadd.f32 %v7252_v39, %v7220_v23  ;;  %v7223_v26 = vadd.f32 %v9484_v6, %v6833_v43  ;;  %v13083_v39 = vld [vmem:[#allocation25_spill] sm:$0xff]  ;;  %v6839_v38 = vadd.f32 %v12473_v52, %v6449_v14  ;;  %v13084_v23 = vld [vmem:[#allocation63_spill] sm:$0xff]  ;;  %v13086_v6 = vld [vmem:[#allocation52_spill] sm:$0xff] }
 0x3d7   : > { %v7127_v62 = vpop.f32.mrf.mxu1  ;;  %v6060_v43 = vadd.f32 %v13083_v39, %v13082_v27  ;;  %v6451_v57 = vadd.f32 %v13084_v23, %v6061_v63  ;;  %v13096_v14 = vld [vmem:[#allocation64_spill] sm:$0xff]  ;;  %v13097_v34 = vld [vmem:[#allocation57_spill] sm:$0xff]  ;;  %v13098_v45 = vld [vmem:[#allocation27_spill] sm:$0xff] }
 0x3d8   : > { %7316 = vst.msk [vmem:[%s12388_s7 + $0x70] sm:$0xff] %vm171_vm1, %v7284_v47  ;;  %v7287_v30 = vadd.f32 %v7255_v20, %v7223_v26  ;;  %v7222_v29 = vadd.f32 %v7127_v62, %v6832_v1  ;;  %v6063_v20 = vadd.f32 %v13086_v6, %v13085_v50  ;;  %v6787_v1 = vpop.f32.mrf.mxu0  ;;  %v6838_v47 = vadd.f32 %v12489_v5, %v6448_v12  ;;  %v13087_v26 = vld [vmem:[#allocation66_spill] sm:$0xff]  ;;  %v13089_v62 = vld [vmem:[#allocation9_spill] sm:$0xff]  ;;  %v13101_v39 = vld [vmem:[#allocation56_spill] sm:$0xff] }
 0x3d9   : > { %v9487_v2 = vpop.f32.mrf.mxu1  ;;  %v6450_v33 = vadd.f32 %v13087_v26, %v6060_v43  ;;  %v6841_v53 = vadd.f32 %v9446_v13, %v6451_v57  ;;  %v6067_v63 = vadd.f32 %v13098_v45, %v13097_v34  ;;  %v13099_v12 = vld [vmem:[#allocation98_spill] sm:$0xff]  ;;  %v13100_v27 = vld [vmem:[#allocation93_spill] sm:$0xff]  ;;  %v13102_v57 = vld [vmem:[#allocation67_spill] sm:$0xff] }
 0x3da   : > { %7319 = vst.msk [vmem:[%s12388_s7 + $0x88] sm:$0xff] %vm171_vm1, %v7287_v30  ;;  %v7286_v61 = vadd.f32 %v7254_v56, %v7222_v29  ;;  %v7225_v55 = vadd.f32 %v9487_v2, %v6835_v4  ;;  %v6062_v56 = vadd.f32 %v13089_v62, %v13088_v24  ;;  %v13090_v30 = vld [vmem:[#allocation32_spill] sm:$0xff]  ;;  %v6065_v2 = vadd.f32 %v13092_v7, %v13091_v10 }
 0x3db   : > { %v7137_v58 = vpop.f32.mrf.mxu1  ;;  %v6453_v29 = vadd.f32 %v13090_v30, %v6063_v20  ;;  %v6840_v59 = vadd.f32 %v6777_v16, %v6450_v33  ;;  %v6066_v43 = vadd.f32 %v13101_v39, %v13100_v27  ;;  %v7267_v20 = vld [vmem:[%s9631_s26 + $0xe8] sm:$0xff] }
 0x3dc   : > { %7318 = vst.msk [vmem:[%s12388_s7 + $0x80] sm:$0xff] %vm171_vm1, %v7286_v61  ;;  %v7289_v31 = vadd.f32 %v7257_v17, %v7225_v55  ;;  %v7224_v32 = vadd.f32 %v7137_v58, %v6834_v44  ;;  %v9452_v17 = vpop.f32.mrf.mxu0  ;;  %v13093_v61 = vld [vmem:[#allocation33_spill] sm:$0xff]  ;;  %v6064_v58 = vadd.f32 %v13095_v49, %v13094_v11 }
 0x3dd   : > { %v9490_v36 = vpop.f32.mrf.mxu1  ;;  %v6452_v55 = vadd.f32 %v13093_v61, %v6062_v56  ;;  %v6843_v48 = vadd.f32 %v9449_v25, %v6453_v29  ;;  %v7268_v29 = vld [vmem:[%s9631_s26 + $0xf0] sm:$0xff] }
 0x3de   : > { %7321 = vst.msk [vmem:[%s12388_s7 + $0x98] sm:$0xff] %vm171_vm1, %v7289_v31  ;;  %v7288_v18 = vadd.f32 %v7256_v9, %v7224_v32  ;;  %v7227_v46 = vadd.f32 %v9490_v36, %v6837_v60  ;;  %v7262_v60 = vld [vmem:[%s9631_s26 + $0xc0] sm:$0xff]  ;;  %v6455_v31 = vadd.f32 %v13096_v14, %v6065_v2  ;;  %v6797_v36 = vpop.f32.mrf.mxu0 }
 0x3df   : > { %v7147_v3 = vpop.f32.mrf.mxu1  ;;  %v6842_v21 = vadd.f32 %v6787_v1, %v6452_v55 }
 0x3e0   : > { %7320 = vst.msk [vmem:[%s12388_s7 + $0x90] sm:$0xff] %vm171_vm1, %v7288_v18  ;;  %v7291_v35 = vadd.f32 %v7259_v15, %v7227_v46  ;;  %v7226_v22 = vadd.f32 %v7147_v3, %v6836_v0  ;;  %v7265_v0 = vld [vmem:[%s9631_s26 + $0xd8] sm:$0xff]  ;;  %v6454_v18 = vadd.f32 %v13099_v12, %v6064_v58  ;;  %v9455_v3 = vpop.f32.mrf.mxu0  ;;  %v6845_v23 = vadd.f32 %v9452_v17, %v6455_v31 }
 0x3e1   : > { %v9493_v28 = vpop.f32.mrf.mxu1 }
 0x3e2   : > { %7323 = vst.msk [vmem:[%s12388_s7 + $0xa8] sm:$0xff] %vm171_vm1, %v7291_v35  ;;  %v7290_v52 = vadd.f32 %v7258_v42, %v7226_v22  ;;  %v7229_v41 = vadd.f32 %v9493_v28, %v6839_v38  ;;  %v7264_v38 = vld [vmem:[%s9631_s26 + $0xd0] sm:$0xff]  ;;  %v6457_v35 = vadd.f32 %v13102_v57, %v6067_v63  ;;  %v6844_v1 = vadd.f32 %v6797_v36, %v6454_v18  ;;  %v6807_v26 = vpop.f32.mrf.mxu0 }
 0x3e3   : > { %v7157_v4 = vpop.f32.mrf.mxu1  ;;  %v6456_v28 = vadd.f32 %v12372_v19, %v6066_v43 }
 0x3e4   : > { %7322 = vst.msk [vmem:[%s12388_s7 + $0xa0] sm:$0xff] %vm171_vm1, %v7290_v52  ;;  %v7293_v5 = vadd.f32 %v7261_v37, %v7229_v41  ;;  %v7228_v8 = vadd.f32 %v7157_v4, %v6838_v47  ;;  %v7266_v52 = vld [vmem:[%s9631_s26 + $0xe0] sm:$0xff]  ;;  %v6847_v41 = vadd.f32 %v9455_v3, %v6457_v35  ;;  %v7269_v4 = vld [vmem:[%s9631_s26 + $0xf8] sm:$0xff] }
 0x3e5   : > { %v9496_v44 = vpop.f32.mrf.mxu1 }
 0x3e6   : > { %7325 = vst.msk [vmem:[%s12388_s7 + $0xb8] sm:$0xff] %vm171_vm1, %v7293_v5  ;;  %v7292_v13 = vadd.f32 %v7260_v40, %v7228_v8  ;;  %v7231_v51 = vadd.f32 %v9496_v44, %v6841_v53  ;;  %v6846_v40 = vadd.f32 %v6807_v26, %v6456_v28 }
 0x3e7   : > { %v7167_v9 = vpop.f32.mrf.mxu1 }
 0x3e8   : > { %7324 = vst.msk [vmem:[%s12388_s7 + $0xb0] sm:$0xff] %vm171_vm1, %v7292_v13  ;;  %v7295_v16 = vadd.f32 %v7263_v54, %v7231_v51  ;;  %v7230_v32 = vadd.f32 %v7167_v9, %v6840_v59 }
 0x3e9   : > { %v9499_v15 = vpop.f32.mrf.mxu1 }
 0x3ea   : > { %7327 = vst.msk [vmem:[%s12388_s7 + $0xc8] sm:$0xff] %vm171_vm1, %v7295_v16  ;;  %v7294_v25 = vadd.f32 %v7262_v60, %v7230_v32  ;;  %v7233_v46 = vadd.f32 %v9499_v15, %v6843_v48 }
 0x3eb   : > { %v7177_v42 = vpop.f32.mrf.mxu1 }
 0x3ec   : > { %7326 = vst.msk [vmem:[%s12388_s7 + $0xc0] sm:$0xff] %vm171_vm1, %v7294_v25  ;;  %v7297_v22 = vadd.f32 %v7265_v0, %v7233_v46  ;;  %v7232_v50 = vadd.f32 %v7177_v42, %v6842_v21 }
 0x3ed   : > { %v9502_v6 = vpop.f32.mrf.mxu1 }
 0x3ee   : > { %7329 = vst.msk [vmem:[%s12388_s7 + $0xd8] sm:$0xff] %vm171_vm1, %v7297_v22  ;;  %v7296_v37 = vadd.f32 %v7264_v38, %v7232_v50  ;;  %v7235_v47 = vadd.f32 %v9502_v6, %v6845_v23 }
 0x3ef   : > { %v7187_v33 = vpop.f32.mrf.mxu1 }
 0x3f0   : > { %7328 = vst.msk [vmem:[%s12388_s7 + $0xd0] sm:$0xff] %vm171_vm1, %v7296_v37  ;;  %v7299_v24 = vadd.f32 %v7267_v20, %v7235_v47  ;;  %v7234_v62 = vadd.f32 %v7187_v33, %v6844_v1 }
 0x3f1   : > { %v9505_v56 = vpop.f32.mrf.mxu1 }
 0x3f2   : > { %7331 = vst.msk [vmem:[%s12388_s7 + $0xe8] sm:$0xff] %vm171_vm1, %v7299_v24  ;;  %v7298_v19 = vadd.f32 %v7266_v52, %v7234_v62  ;;  %v7237_v53 = vadd.f32 %v9505_v56, %v6847_v41 }
 0x3f3   : > { %v7197_v30 = vpop.f32.mrf.mxu1 }
 0x3f4   : > { %7330 = vst.msk [vmem:[%s12388_s7 + $0xe0] sm:$0xff] %vm171_vm1, %v7298_v19  ;;  %v7301_v5 = vadd.f32 %v7269_v4, %v7237_v53  ;;  %v7236_v8 = vadd.f32 %v7197_v30, %v6846_v40 }
 0x3f6   : > { %7333 = vst.msk [vmem:[%s12388_s7 + $0xf8] sm:$0xff] %vm171_vm1, %v7301_v5  ;;  %v7300_v10 = vadd.f32 %v7268_v29, %v7236_v8 }
 0x3f8   : > { %7332 = vst.msk [vmem:[%s12388_s7 + $0xf0] sm:$0xff] %vm171_vm1, %v7300_v10 }
 0x3f9 PF: > { %s13_s12 = sadd.s32 1, %s9521_s12  }
 0x3fa   : > { %p10_p4 = scmp.ge.s32.totalorder %s13_s12, 4  }
 0x3fc   :  { %12 = sbr.rel (!%p10_p4) target bundleno = 1 (0x1), region = 81 }

</bundles_post_ra>
